<compile_context>
chip_gen: v7x
topology: tpu7x:2x2x1
jax: 0.10.0
libtpu: 0.0.40
codegen_flags: <defaults>
</compile_context>

<pallas_src>
import functools

import jax
import jax.numpy as jnp
from jax.experimental import pallas as pl
from jax.experimental.pallas import tpu as pltpu


# ----------------------------------------------------------------------------
# Helpers
# ----------------------------------------------------------------------------
def _layernorm(x, gamma, beta, eps=1e-5):
    mu = jnp.mean(x, axis=-1, keepdims=True)
    var = jnp.mean(jnp.square(x - mu), axis=-1, keepdims=True)
    return (x - mu) * jax.lax.rsqrt(var + eps) * gamma + beta


def _vmem_limit_bytes():
    """Per-generation scoped VMEM budget (leave headroom for the pipeline)."""
    cap = 128 * 1024 * 1024
    try:
        cap = int(pltpu.get_tpu_info().vmem_capacity_bytes)
    except Exception:
        pass
    return min(max(cap - 12 * 1024 * 1024, 32 * 1024 * 1024), 128 * 1024 * 1024)


def _pick_batch_tile(B, L, D, budget_bytes=8 * 1024 * 1024):
    """Largest divisor of B whose (BT*L, D) f32 activation slab fits the budget
    (sublane-aligned unless the tile covers all of B)."""
    best = 1
    for bt in range(1, B + 1):
        if B % bt:
            continue
        if bt != 1 and bt * L * D * 4 > budget_bytes:
            continue
        if bt != B and (bt * L) % 8 != 0:
            continue
        best = bt
    return best


# ----------------------------------------------------------------------------
# Fused kernel: all encoder blocks, activations resident in VMEM scratch
# ----------------------------------------------------------------------------
def fused_transformer_kernel(x0_ref,
                             ln1_g_ref, ln1_b_ref, wqkv_ref, bqkv_ref,
                             wo_ref, bo_ref, ln2_g_ref, ln2_b_ref,
                             w1_ref, b1_ref, w2_ref, b2_ref,
                             o_ref, x_scr,
                             *, num_heads, batch_tile, seq_len):
    n = pl.program_id(1)                       # encoder-block index
    M, D = x_scr.shape                         # M = batch_tile * seq_len
    BT, L = batch_tile, seq_len
    H = num_heads
    hd = D // H

    # ---- block 0: load precomputed token embeddings (single aligned copy) ----
    @pl.when(n == 0)
    def _():
        x_scr[...] = x0_ref[...].astype(jnp.float32)

    x = x_scr[...]                             # (M, D) f32

    # ---- multi-head self-attention (pre-LN) ----
    hn = _layernorm(x, ln1_g_ref[0], ln1_b_ref[0])
    # Fused QKV: one lane-dense matmul, N = 3D, contraction depth D.
    qkv = jnp.dot(hn.astype(jnp.bfloat16), wqkv_ref[0],
                  preferred_element_type=jnp.float32) + bqkv_ref[0]   # (M, 3D)

    ctx_parts = []
    for h in range(H):                         # static unroll over heads
        qh = qkv[:, h * hd:(h + 1) * hd].reshape(BT, L, hd).astype(jnp.bfloat16)
        kh = qkv[:, D + h * hd:D + (h + 1) * hd].reshape(BT, L, hd).astype(jnp.bfloat16)
        vh = qkv[:, 2 * D + h * hd:2 * D + (h + 1) * hd].reshape(BT, L, hd).astype(jnp.bfloat16)
        # 1/sqrt(hd) is pre-folded into Wq / bq.
        s = jnp.einsum('ble,bme->blm', qh, kh,
                       preferred_element_type=jnp.float32)            # (BT, L, L)
        s = s - jnp.max(s, axis=-1, keepdims=True)
        p = jnp.exp(s)
        denom = jnp.sum(p, axis=-1, keepdims=True)                    # (BT, L, 1)
        c = jnp.einsum('blm,bme->ble', p.astype(jnp.bfloat16), vh,
                       preferred_element_type=jnp.float32)            # (BT, L, hd)
        # Deferred softmax normalization: scale ctx (hd wide), not p (L wide).
        ctx_parts.append((c * pl.reciprocal(denom, approx=True))
                         .astype(jnp.bfloat16))
    ctx = jnp.concatenate(ctx_parts, axis=-1).reshape(M, D)           # (M, D) bf16

    # Fused output projection: one (M,D)@(D,D) matmul, contraction depth D.
    attn = jnp.dot(ctx, wo_ref[0],
                   preferred_element_type=jnp.float32) + bo_ref[0]
    x = x + attn

    # ---- MLP (pre-LN) ----
    hn2 = _layernorm(x, ln2_g_ref[0], ln2_b_ref[0])
    h1 = jnp.dot(hn2.astype(jnp.bfloat16), w1_ref[0],
                 preferred_element_type=jnp.float32) + b1_ref[0]
    h1 = jax.nn.gelu(h1, approximate=True)     # tanh-GELU (safe Mosaic lowering)
    h2 = jnp.dot(h1.astype(jnp.bfloat16), w2_ref[0],
                 preferred_element_type=jnp.float32) + b2_ref[0]
    x = x + h2

    x_scr[...] = x                             # carry to next block

    @pl.when(n == pl.num_programs(1) - 1)
    def _():
        o_ref[...] = x.astype(o_ref.dtype)


# ----------------------------------------------------------------------------
# Parameter construction (torch-like shapes) + one-time packing for the kernel
# ----------------------------------------------------------------------------
def init_params(key, *, embed_dim, num_blocks, num_k, num_timestep, num_joints,
                ratio):
    D, Hm = embed_dim, embed_dim * ratio
    keys = jax.random.split(key, 3 + 4 * num_blocks)
    std = 0.02
    params = {
        "hypo_embed": std * jax.random.normal(keys[0], (num_k, D), jnp.float32),
        "pos_embed_t": std * jax.random.normal(keys[1], (num_timestep, D), jnp.float32),
        "pos_embed_j": std * jax.random.normal(keys[2], (num_joints, D), jnp.float32),
        "blocks": [],
    }
    for i in range(num_blocks):
        k0, k1, k2, k3 = keys[3 + 4 * i: 3 + 4 * (i + 1)]
        params["blocks"].append({
            "ln1_g": jnp.ones((D,), jnp.float32),
            "ln1_b": jnp.zeros((D,), jnp.float32),
            "wqkv": std * jax.random.normal(k0, (D, 3 * D), jnp.float32),
            "bqkv": jnp.zeros((3 * D,), jnp.float32),
            "wo": std * jax.random.normal(k1, (D, D), jnp.float32),
            "bo": jnp.zeros((D,), jnp.float32),
            "ln2_g": jnp.ones((D,), jnp.float32),
            "ln2_b": jnp.zeros((D,), jnp.float32),
            "w1": std * jax.random.normal(k2, (D, Hm), jnp.float32),
            "b1": jnp.zeros((Hm,), jnp.float32),
            "w2": std * jax.random.normal(k3, (Hm, D), jnp.float32),
            "b2": jnp.zeros((D,), jnp.float32),
        })
    return params


def pack_params(params, *, num_heads):
    """One-time preprocessing: stack per-block weights along a leading axis,
    fold 1/sqrt(hd) into the Q columns of the fused QKV weight/bias, cast the
    large streamed matmul weights to bf16, and precompute the additive
    (1,K,T,J,D) embedding table (consumed by the wrapper, not the kernel)."""
    blocks = params["blocks"]
    D = params["hypo_embed"].shape[-1]
    hd = D // num_heads
    scale = 1.0 / (hd ** 0.5)

    hypo, pos_t, pos_j = (params["hypo_embed"], params["pos_embed_t"],
                          params["pos_embed_j"])
    emb = (hypo[None, :, None, None, :] + pos_t[None, None, :, None, :]
           + pos_j[None, None, None, :, :])                     # (1,K,T,J,D)

    stk = lambda xs: jnp.stack(list(xs), axis=0)
    return {
        "emb": emb,
        "ln1_g": stk(b["ln1_g"][None] for b in blocks),          # (N, 1, D) f32
        "ln1_b": stk(b["ln1_b"][None] for b in blocks),
        "wqkv": stk(b["wqkv"].at[:, :D].multiply(scale)          # (N, D, 3D) bf16
                    for b in blocks).astype(jnp.bfloat16),
        "bqkv": stk(b["bqkv"].at[:D].multiply(scale)[None]       # (N, 1, 3D) f32
                    for b in blocks),
        "wo": stk(b["wo"] for b in blocks).astype(jnp.bfloat16), # (N, D, D) bf16
        "bo": stk(b["bo"][None] for b in blocks),                # (N, 1, D) f32
        "ln2_g": stk(b["ln2_g"][None] for b in blocks),
        "ln2_b": stk(b["ln2_b"][None] for b in blocks),
        "w1": stk(b["w1"] for b in blocks).astype(jnp.bfloat16), # (N, D, Hm) bf16
        "b1": stk(b["b1"][None] for b in blocks),                # (N, 1, Hm) f32
        "w2": stk(b["w2"] for b in blocks).astype(jnp.bfloat16), # (N, Hm, D) bf16
        "b2": stk(b["b2"][None] for b in blocks),                # (N, 1, D) f32
    }


# ----------------------------------------------------------------------------
# Forward (matches Transformer.forward): one pallas_call for everything
# ----------------------------------------------------------------------------
def transformer_forward(feat_joint, packed, *, num_heads, batch_tile=None):
    B, T, J, D = feat_joint.shape
    emb = packed["emb"]                      # (1, K, T, J, D)
    K = emb.shape[1]
    L = K * T * J
    N = packed["wqkv"].shape[0]

    # Embedding add in the wrapper (single elementwise pass) -> x0 = (B*L, D).
    x0 = (feat_joint[:, None].astype(jnp.float32) + emb).reshape(B * L, D)

    BT = batch_tile if batch_tile is not None else _pick_batch_tile(B, L, D)
    assert B % BT == 0, (B, BT)
    M = BT * L
    grid = (B // BT, N)
    # TODO(synk): on v7x (2 TensorCores) prefer BT such that B//BT >= 2 so the
    # "parallel" grid axis keeps both cores busy.

    def _wspec(arr):
        nd = arr.ndim
        return pl.BlockSpec((1,) + tuple(arr.shape[1:]),
                            lambda b, n: (n,) + (0,) * (nd - 1))

    weight_names = ("ln1_g", "ln1_b", "wqkv", "bqkv", "wo", "bo",
                    "ln2_g", "ln2_b", "w1", "b1", "w2", "b2")

    kernel = functools.partial(fused_transformer_kernel, num_heads=num_heads,
                               batch_tile=BT, seq_len=L)
    out = pl.pallas_call(
        kernel,
        out_shape=jax.ShapeDtypeStruct((B * L, D), jnp.float32),
        grid=grid,
        in_specs=[pl.BlockSpec((M, D), lambda b, n: (b, 0))] +
                 [_wspec(packed[k]) for k in weight_names],
        out_specs=pl.BlockSpec((M, D), lambda b, n: (b, 0)),
        scratch_shapes=[pltpu.VMEM((M, D), jnp.float32)],
        compiler_params=pltpu.CompilerParams(
            dimension_semantics=("parallel", "arbitrary"),
            vmem_limit_bytes=_vmem_limit_bytes()),
    )(x0, *[packed[k] for k in weight_names])

    # feat_refine = x.reshape(B, K, T, J, -1).transpose(0, 1)
    return out.reshape(B, K, T, J, D).transpose(1, 0, 2, 3, 4)


# ----------------------------------------------------------------------------
# Pure-JAX reference (same assumed EncoderBlock), for a correctness check
# ----------------------------------------------------------------------------
def reference_forward(feat_joint, params, *, num_heads):
    B, T, J, D = feat_joint.shape
    hypo, pos_t, pos_j = (params["hypo_embed"], params["pos_embed_t"],
                          params["pos_embed_j"])
    K = hypo.shape[0]
    H = num_heads
    hd = D // H
    scale = 1.0 / (hd ** 0.5)

    x = (feat_joint[:, None] + hypo[None, :, None, None, :]
         + pos_t[None, None, :, None, :] + pos_j[None, None, None, :, :])
    x = x.reshape(B, K * T * J, D)

    def ln(v, g, b, eps=1e-5):
        mu = v.mean(-1, keepdims=True)
        var = ((v - mu) ** 2).mean(-1, keepdims=True)
        return (v - mu) / jnp.sqrt(var + eps) * g + b

    for blk in params["blocks"]:
        h = ln(x, blk["ln1_g"], blk["ln1_b"])
        qkv = h @ blk["wqkv"] + blk["bqkv"]
        q, k, v = jnp.split(qkv, 3, axis=-1)
        q = q.reshape(B, -1, H, hd).transpose(0, 2, 1, 3)
        k = k.reshape(B, -1, H, hd).transpose(0, 2, 1, 3)
        v = v.reshape(B, -1, H, hd).transpose(0, 2, 1, 3)
        p = jax.nn.softmax((q @ jnp.swapaxes(k, -1, -2)) * scale, axis=-1)
        a = (p @ v).transpose(0, 2, 1, 3).reshape(B, -1, D)
        x = x + a @ blk["wo"] + blk["bo"]
        h = ln(x, blk["ln2_g"], blk["ln2_b"])
        h = jax.nn.gelu(h @ blk["w1"] + blk["b1"], approximate=True)
        x = x + h @ blk["w2"] + blk["b2"]
    return x.reshape(B, K, T, J, D).transpose(1, 0, 2, 3, 4)


if __name__ == "__main__":
    # small config consistent with the module's constructor
    B = 2
    embed_dim = 32      # in_dim == embed_dim (no input projection in forward)
    num_blocks = 2
    num_heads = 4
    num_k = 2
    num_timestep = 4
    num_joints = 4
    ratio = 4

    key = jax.random.PRNGKey(0)
    kp, kx = jax.random.split(key)
    params = init_params(kp, embed_dim=embed_dim, num_blocks=num_blocks,
                         num_k=num_k, num_timestep=num_timestep,
                         num_joints=num_joints, ratio=ratio)
    packed = pack_params(params, num_heads=num_heads)
    feat_joint = jax.random.normal(
        kx, (B, num_timestep, num_joints, embed_dim), jnp.float32)

    fwd = jax.jit(functools.partial(transformer_forward, num_heads=num_heads))
    out = jax.block_until_ready(fwd(feat_joint, packed))
    assert out.shape == (num_k, B, num_timestep, num_joints, embed_dim), out.shape

    ref = reference_forward(feat_joint, params, num_heads=num_heads)
    err = float(jnp.max(jnp.abs(out - ref)))
    assert jnp.allclose(out, ref, atol=5e-2, rtol=5e-2), err
    print("KERNEL_OK")
</pallas_src>

<mosaic_0001>
module attributes {stable_mosaic.version = 11 : i64} {
  func.func @fused_transformer_kernel(%arg0: i32, %arg1: i32, %arg2: memref<64x32xf32, #tpu.memory_space<vmem>>, %arg3: memref<1x1x32xf32, #tpu.memory_space<vmem>>, %arg4: memref<1x1x32xf32, #tpu.memory_space<vmem>>, %arg5: memref<1x32x96xbf16, #tpu.memory_space<vmem>>, %arg6: memref<1x1x96xf32, #tpu.memory_space<vmem>>, %arg7: memref<1x32x32xbf16, #tpu.memory_space<vmem>>, %arg8: memref<1x1x32xf32, #tpu.memory_space<vmem>>, %arg9: memref<1x1x32xf32, #tpu.memory_space<vmem>>, %arg10: memref<1x1x32xf32, #tpu.memory_space<vmem>>, %arg11: memref<1x32x128xbf16, #tpu.memory_space<vmem>>, %arg12: memref<1x1x128xf32, #tpu.memory_space<vmem>>, %arg13: memref<1x128x32xbf16, #tpu.memory_space<vmem>>, %arg14: memref<1x1x32xf32, #tpu.memory_space<vmem>>, %arg15: memref<64x32xf32, #tpu.memory_space<vmem>>, %arg16: memref<64x32xf32, #tpu.memory_space<vmem>>) attributes {dimension_semantics = [#tpu.dimension_semantics<parallel>, #tpu.dimension_semantics<arbitrary>], iteration_bounds = array<i64: 1, 2>, scalar_prefetch = 0 : i64, scratch_operands = 1 : i64, tpu.core_type = #tpu.core_type<tc>, window_params = [{transform_indices = @transform_0, window_bounds = array<i64: 64, 32>}, {transform_indices = @transform_1, window_bounds = array<i64: 1, 1, 32>}, {transform_indices = @transform_2, window_bounds = array<i64: 1, 1, 32>}, {transform_indices = @transform_3, window_bounds = array<i64: 1, 32, 96>}, {transform_indices = @transform_4, window_bounds = array<i64: 1, 1, 96>}, {transform_indices = @transform_5, window_bounds = array<i64: 1, 32, 32>}, {transform_indices = @transform_6, window_bounds = array<i64: 1, 1, 32>}, {transform_indices = @transform_7, window_bounds = array<i64: 1, 1, 32>}, {transform_indices = @transform_8, window_bounds = array<i64: 1, 1, 32>}, {transform_indices = @transform_9, window_bounds = array<i64: 1, 32, 128>}, {transform_indices = @transform_10, window_bounds = array<i64: 1, 1, 128>}, {transform_indices = @transform_11, window_bounds = array<i64: 1, 128, 32>}, {transform_indices = @transform_12, window_bounds = array<i64: 1, 1, 32>}, {transform_indices = @transform_13, window_bounds = array<i64: 64, 32>}]} {
    %c0_i32 = arith.constant 0 : i32
    %0 = arith.cmpi eq, %arg1, %c0_i32 : i32
    %1 = arith.extui %0 : i1 to i32
    %c0_i32_0 = arith.constant 0 : i32
    %2 = arith.cmpi ne, %1, %c0_i32_0 : i32
    scf.if %2 {
      %c0_74 = arith.constant 0 : index
      %c0_75 = arith.constant 0 : index
      %200 = vector.load %arg2[%c0_74, %c0_75] : memref<64x32xf32, #tpu.memory_space<vmem>>, vector<64x32xf32>
      %c0_76 = arith.constant 0 : index
      %c0_77 = arith.constant 0 : index
      %201 = vector.load %arg16[%c0_76, %c0_77] : memref<64x32xf32, #tpu.memory_space<vmem>>, vector<64x32xf32>
      tpu.vector_store %arg16[%c0_76, %c0_77], %200 {strides = array<i32>} : memref<64x32xf32, #tpu.memory_space<vmem>>, vector<64x32xf32>,
    } else {
    }
    %c0 = arith.constant 0 : index
    %c0_1 = arith.constant 0 : index
    %3 = vector.load %arg16[%c0, %c0_1] : memref<64x32xf32, #tpu.memory_space<vmem>>, vector<64x32xf32>
    %c0_2 = arith.constant 0 : index
    %c0_3 = arith.constant 0 : index
    %c0_4 = arith.constant 0 : index
    %4 = vector.load %arg3[%c0_2, %c0_3, %c0_4] : memref<1x1x32xf32, #tpu.memory_space<vmem>>, vector<1x1x32xf32>
    %5 = vector.shape_cast %4 : vector<1x1x32xf32> to vector<1x32xf32>
    %c0_5 = arith.constant 0 : index
    %c0_6 = arith.constant 0 : index
    %c0_7 = arith.constant 0 : index
    %6 = vector.load %arg4[%c0_5, %c0_6, %c0_7] : memref<1x1x32xf32, #tpu.memory_space<vmem>>, vector<1x1x32xf32>
    %7 = vector.shape_cast %6 : vector<1x1x32xf32> to vector<1x32xf32>
    %cst = arith.constant dense<0.000000e+00> : vector<64xf32>
    %8 = vector.multi_reduction <add>, %3, %cst [1] : vector<64x32xf32> to vector<64xf32>
    %9 = vector.shape_cast %8 : vector<64xf32> to vector<64x1xf32>
    %cst_8 = arith.constant 3.200000e+01 : f32
    %10 = vector.broadcast %cst_8 : f32 to vector<64x1xf32>
    %11 = arith.divf %9, %10 : vector<64x1xf32>
    %12 = vector.broadcast %11 : vector<64x1xf32> to vector<64x32xf32>
    %13 = arith.subf %3, %12 : vector<64x32xf32>
    %14 = arith.mulf %13, %13 : vector<64x32xf32>
    %cst_9 = arith.constant dense<0.000000e+00> : vector<64xf32>
    %15 = vector.multi_reduction <add>, %14, %cst_9 [1] : vector<64x32xf32> to vector<64xf32>
    %16 = vector.shape_cast %15 : vector<64xf32> to vector<64x1xf32>
    %cst_10 = arith.constant 3.200000e+01 : f32
    %17 = vector.broadcast %cst_10 : f32 to vector<64x1xf32>
    %18 = arith.divf %16, %17 : vector<64x1xf32>
    %19 = vector.broadcast %11 : vector<64x1xf32> to vector<64x32xf32>
    %20 = arith.subf %3, %19 : vector<64x32xf32>
    %cst_11 = arith.constant 9.99999974E-6 : f32
    %21 = vector.broadcast %cst_11 : f32 to vector<64x1xf32>
    %22 = arith.addf %18, %21 : vector<64x1xf32>
    %23 = math.rsqrt %22 : vector<64x1xf32>
    %24 = vector.broadcast %23 : vector<64x1xf32> to vector<64x32xf32>
    %25 = arith.mulf %20, %24 : vector<64x32xf32>
    %26 = vector.broadcast %5 : vector<1x32xf32> to vector<64x32xf32>
    %27 = arith.mulf %25, %26 : vector<64x32xf32>
    %28 = vector.broadcast %7 : vector<1x32xf32> to vector<64x32xf32>
    %29 = arith.addf %27, %28 : vector<64x32xf32>
    %30 = arith.truncf %29 : vector<64x32xf32> to vector<64x32xbf16>
    %c0_12 = arith.constant 0 : index
    %c0_13 = arith.constant 0 : index
    %c0_14 = arith.constant 0 : index
    %31 = vector.load %arg5[%c0_12, %c0_13, %c0_14] : memref<1x32x96xbf16, #tpu.memory_space<vmem>>, vector<1x32x96xbf16>
    %32 = vector.shape_cast %31 : vector<1x32x96xbf16> to vector<32x96xbf16>
    %cst_15 = arith.constant dense<0.000000e+00> : vector<64x96xf32>
    %33 = tpu.matmul %30, %32, %cst_15 {dimension_numbers = #tpu.dot_dimension_numbers<[1], [0], [0], [1], [0, 0, 1, 1], [], []>} : vector<64x32xbf16>, vector<32x96xbf16>, vector<64x96xf32> -> vector<64x96xf32>
    %c0_16 = arith.constant 0 : index
    %c0_17 = arith.constant 0 : index
    %c0_18 = arith.constant 0 : index
    %34 = vector.load %arg6[%c0_16, %c0_17, %c0_18] : memref<1x1x96xf32, #tpu.memory_space<vmem>>, vector<1x1x96xf32>
    %35 = vector.shape_cast %34 : vector<1x1x96xf32> to vector<1x96xf32>
    %36 = vector.broadcast %35 : vector<1x96xf32> to vector<64x96xf32>
    %37 = arith.addf %33, %36 : vector<64x96xf32>
    %38 = vector.extract_strided_slice %37 {offsets = [0, 0], sizes = [64, 8], strides = [1, 1]} : vector<64x96xf32> to vector<64x8xf32>
    %39 = vector.shape_cast %38 : vector<64x8xf32> to vector<2x32x8xf32>
    %40 = arith.truncf %39 : vector<2x32x8xf32> to vector<2x32x8xbf16>
    %41 = vector.extract_strided_slice %37 {offsets = [0, 32], sizes = [64, 8], strides = [1, 1]} : vector<64x96xf32> to vector<64x8xf32>
    %42 = vector.shape_cast %41 : vector<64x8xf32> to vector<2x32x8xf32>
    %43 = arith.truncf %42 : vector<2x32x8xf32> to vector<2x32x8xbf16>
    %44 = vector.extract_strided_slice %37 {offsets = [0, 64], sizes = [64, 8], strides = [1, 1]} : vector<64x96xf32> to vector<64x8xf32>
    %45 = vector.shape_cast %44 : vector<64x8xf32> to vector<2x32x8xf32>
    %46 = arith.truncf %45 : vector<2x32x8xf32> to vector<2x32x8xbf16>
    "tpu.trace_start"() <{level = 10 : i32, message = "ble,bme->blm"}> : () -> ()
    %cst_19 = arith.constant dense<0.000000e+00> : vector<2x32x32xf32>
    %47 = tpu.matmul %40, %43, %cst_19 {dimension_numbers = #tpu.dot_dimension_numbers<[2], [2], [1], [1], [0, 0, 0, 1, 1, 1], [0], [0]>} : vector<2x32x8xbf16>, vector<2x32x8xbf16>, vector<2x32x32xf32> -> vector<2x32x32xf32>
    "tpu.trace_stop"() : () -> ()
    %cst_20 = arith.constant dense<0xFF800000> : vector<2x32xf32>
    %48 = vector.multi_reduction <maximumf>, %47, %cst_20 [2] : vector<2x32x32xf32> to vector<2x32xf32>
    %49 = vector.shape_cast %48 : vector<2x32xf32> to vector<2x32x1xf32>
    %50 = vector.broadcast %49 : vector<2x32x1xf32> to vector<2x32x32xf32>
    %51 = arith.subf %47, %50 : vector<2x32x32xf32>
    %52 = math.exp %51 : vector<2x32x32xf32>
    %cst_21 = arith.constant dense<0.000000e+00> : vector<2x32xf32>
    %53 = vector.multi_reduction <add>, %52, %cst_21 [2] : vector<2x32x32xf32> to vector<2x32xf32>
    %54 = vector.shape_cast %53 : vector<2x32xf32> to vector<2x32x1xf32>
    %55 = arith.truncf %52 : vector<2x32x32xf32> to vector<2x32x32xbf16>
    "tpu.trace_start"() <{level = 10 : i32, message = "blm,bme->ble"}> : () -> ()
    %cst_22 = arith.constant dense<0.000000e+00> : vector<2x32x8xf32>
    %56 = tpu.matmul %55, %46, %cst_22 {dimension_numbers = #tpu.dot_dimension_numbers<[2], [1], [1], [2], [0, 0, 0, 1, 1, 2], [0], [0]>} : vector<2x32x32xbf16>, vector<2x32x8xbf16>, vector<2x32x8xf32> -> vector<2x32x8xf32>
    "tpu.trace_stop"() : () -> ()
    %57 = tpu.reciprocal %54 {approx = true} : vector<2x32x1xf32> -> vector<2x32x1xf32>
    %58 = vector.broadcast %57 : vector<2x32x1xf32> to vector<2x32x8xf32>
    %59 = arith.mulf %56, %58 : vector<2x32x8xf32>
    %60 = arith.truncf %59 : vector<2x32x8xf32> to vector<2x32x8xbf16>
    %61 = vector.extract_strided_slice %37 {offsets = [0, 8], sizes = [64, 8], strides = [1, 1]} : vector<64x96xf32> to vector<64x8xf32>
    %62 = vector.shape_cast %61 : vector<64x8xf32> to vector<2x32x8xf32>
    %63 = arith.truncf %62 : vector<2x32x8xf32> to vector<2x32x8xbf16>
    %64 = vector.extract_strided_slice %37 {offsets = [0, 40], sizes = [64, 8], strides = [1, 1]} : vector<64x96xf32> to vector<64x8xf32>
    %65 = vector.shape_cast %64 : vector<64x8xf32> to vector<2x32x8xf32>
    %66 = arith.truncf %65 : vector<2x32x8xf32> to vector<2x32x8xbf16>
    %67 = vector.extract_strided_slice %37 {offsets = [0, 72], sizes = [64, 8], strides = [1, 1]} : vector<64x96xf32> to vector<64x8xf32>
    %68 = vector.shape_cast %67 : vector<64x8xf32> to vector<2x32x8xf32>
    %69 = arith.truncf %68 : vector<2x32x8xf32> to vector<2x32x8xbf16>
    "tpu.trace_start"() <{level = 10 : i32, message = "ble,bme->blm"}> : () -> ()
    %cst_23 = arith.constant dense<0.000000e+00> : vector<2x32x32xf32>
    %70 = tpu.matmul %63, %66, %cst_23 {dimension_numbers = #tpu.dot_dimension_numbers<[2], [2], [1], [1], [0, 0, 0, 1, 1, 1], [0], [0]>} : vector<2x32x8xbf16>, vector<2x32x8xbf16>, vector<2x32x32xf32> -> vector<2x32x32xf32>
    "tpu.trace_stop"() : () -> ()
    %cst_24 = arith.constant dense<0xFF800000> : vector<2x32xf32>
    %71 = vector.multi_reduction <maximumf>, %70, %cst_24 [2] : vector<2x32x32xf32> to vector<2x32xf32>
    %72 = vector.shape_cast %71 : vector<2x32xf32> to vector<2x32x1xf32>
    %73 = vector.broadcast %72 : vector<2x32x1xf32> to vector<2x32x32xf32>
    %74 = arith.subf %70, %73 : vector<2x32x32xf32>
    %75 = math.exp %74 : vector<2x32x32xf32>
    %cst_25 = arith.constant dense<0.000000e+00> : vector<2x32xf32>
    %76 = vector.multi_reduction <add>, %75, %cst_25 [2] : vector<2x32x32xf32> to vector<2x32xf32>
    %77 = vector.shape_cast %76 : vector<2x32xf32> to vector<2x32x1xf32>
    %78 = arith.truncf %75 : vector<2x32x32xf32> to vector<2x32x32xbf16>
    "tpu.trace_start"() <{level = 10 : i32, message = "blm,bme->ble"}> : () -> ()
    %cst_26 = arith.constant dense<0.000000e+00> : vector<2x32x8xf32>
    %79 = tpu.matmul %78, %69, %cst_26 {dimension_numbers = #tpu.dot_dimension_numbers<[2], [1], [1], [2], [0, 0, 0, 1, 1, 2], [0], [0]>} : vector<2x32x32xbf16>, vector<2x32x8xbf16>, vector<2x32x8xf32> -> vector<2x32x8xf32>
    "tpu.trace_stop"() : () -> ()
    %80 = tpu.reciprocal %77 {approx = true} : vector<2x32x1xf32> -> vector<2x32x1xf32>
    %81 = vector.broadcast %80 : vector<2x32x1xf32> to vector<2x32x8xf32>
    %82 = arith.mulf %79, %81 : vector<2x32x8xf32>
    %83 = arith.truncf %82 : vector<2x32x8xf32> to vector<2x32x8xbf16>
    %84 = vector.extract_strided_slice %37 {offsets = [0, 16], sizes = [64, 8], strides = [1, 1]} : vector<64x96xf32> to vector<64x8xf32>
    %85 = vector.shape_cast %84 : vector<64x8xf32> to vector<2x32x8xf32>
    %86 = arith.truncf %85 : vector<2x32x8xf32> to vector<2x32x8xbf16>
    %87 = vector.extract_strided_slice %37 {offsets = [0, 48], sizes = [64, 8], strides = [1, 1]} : vector<64x96xf32> to vector<64x8xf32>
    %88 = vector.shape_cast %87 : vector<64x8xf32> to vector<2x32x8xf32>
    %89 = arith.truncf %88 : vector<2x32x8xf32> to vector<2x32x8xbf16>
    %90 = vector.extract_strided_slice %37 {offsets = [0, 80], sizes = [64, 8], strides = [1, 1]} : vector<64x96xf32> to vector<64x8xf32>
    %91 = vector.shape_cast %90 : vector<64x8xf32> to vector<2x32x8xf32>
    %92 = arith.truncf %91 : vector<2x32x8xf32> to vector<2x32x8xbf16>
    "tpu.trace_start"() <{level = 10 : i32, message = "ble,bme->blm"}> : () -> ()
    %cst_27 = arith.constant dense<0.000000e+00> : vector<2x32x32xf32>
    %93 = tpu.matmul %86, %89, %cst_27 {dimension_numbers = #tpu.dot_dimension_numbers<[2], [2], [1], [1], [0, 0, 0, 1, 1, 1], [0], [0]>} : vector<2x32x8xbf16>, vector<2x32x8xbf16>, vector<2x32x32xf32> -> vector<2x32x32xf32>
    "tpu.trace_stop"() : () -> ()
    %cst_28 = arith.constant dense<0xFF800000> : vector<2x32xf32>
    %94 = vector.multi_reduction <maximumf>, %93, %cst_28 [2] : vector<2x32x32xf32> to vector<2x32xf32>
    %95 = vector.shape_cast %94 : vector<2x32xf32> to vector<2x32x1xf32>
    %96 = vector.broadcast %95 : vector<2x32x1xf32> to vector<2x32x32xf32>
    %97 = arith.subf %93, %96 : vector<2x32x32xf32>
    %98 = math.exp %97 : vector<2x32x32xf32>
    %cst_29 = arith.constant dense<0.000000e+00> : vector<2x32xf32>
    %99 = vector.multi_reduction <add>, %98, %cst_29 [2] : vector<2x32x32xf32> to vector<2x32xf32>
    %100 = vector.shape_cast %99 : vector<2x32xf32> to vector<2x32x1xf32>
    %101 = arith.truncf %98 : vector<2x32x32xf32> to vector<2x32x32xbf16>
    "tpu.trace_start"() <{level = 10 : i32, message = "blm,bme->ble"}> : () -> ()
    %cst_30 = arith.constant dense<0.000000e+00> : vector<2x32x8xf32>
    %102 = tpu.matmul %101, %92, %cst_30 {dimension_numbers = #tpu.dot_dimension_numbers<[2], [1], [1], [2], [0, 0, 0, 1, 1, 2], [0], [0]>} : vector<2x32x32xbf16>, vector<2x32x8xbf16>, vector<2x32x8xf32> -> vector<2x32x8xf32>
    "tpu.trace_stop"() : () -> ()
    %103 = tpu.reciprocal %100 {approx = true} : vector<2x32x1xf32> -> vector<2x32x1xf32>
    %104 = vector.broadcast %103 : vector<2x32x1xf32> to vector<2x32x8xf32>
    %105 = arith.mulf %102, %104 : vector<2x32x8xf32>
    %106 = arith.truncf %105 : vector<2x32x8xf32> to vector<2x32x8xbf16>
    %107 = vector.extract_strided_slice %37 {offsets = [0, 24], sizes = [64, 8], strides = [1, 1]} : vector<64x96xf32> to vector<64x8xf32>
    %108 = vector.shape_cast %107 : vector<64x8xf32> to vector<2x32x8xf32>
    %109 = arith.truncf %108 : vector<2x32x8xf32> to vector<2x32x8xbf16>
    %110 = vector.extract_strided_slice %37 {offsets = [0, 56], sizes = [64, 8], strides = [1, 1]} : vector<64x96xf32> to vector<64x8xf32>
    %111 = vector.shape_cast %110 : vector<64x8xf32> to vector<2x32x8xf32>
    %112 = arith.truncf %111 : vector<2x32x8xf32> to vector<2x32x8xbf16>
    %113 = vector.extract_strided_slice %37 {offsets = [0, 88], sizes = [64, 8], strides = [1, 1]} : vector<64x96xf32> to vector<64x8xf32>
    %114 = vector.shape_cast %113 : vector<64x8xf32> to vector<2x32x8xf32>
    %115 = arith.truncf %114 : vector<2x32x8xf32> to vector<2x32x8xbf16>
    "tpu.trace_start"() <{level = 10 : i32, message = "ble,bme->blm"}> : () -> ()
    %cst_31 = arith.constant dense<0.000000e+00> : vector<2x32x32xf32>
    %116 = tpu.matmul %109, %112, %cst_31 {dimension_numbers = #tpu.dot_dimension_numbers<[2], [2], [1], [1], [0, 0, 0, 1, 1, 1], [0], [0]>} : vector<2x32x8xbf16>, vector<2x32x8xbf16>, vector<2x32x32xf32> -> vector<2x32x32xf32>
    "tpu.trace_stop"() : () -> ()
    %cst_32 = arith.constant dense<0xFF800000> : vector<2x32xf32>
    %117 = vector.multi_reduction <maximumf>, %116, %cst_32 [2] : vector<2x32x32xf32> to vector<2x32xf32>
    %118 = vector.shape_cast %117 : vector<2x32xf32> to vector<2x32x1xf32>
    %119 = vector.broadcast %118 : vector<2x32x1xf32> to vector<2x32x32xf32>
    %120 = arith.subf %116, %119 : vector<2x32x32xf32>
    %121 = math.exp %120 : vector<2x32x32xf32>
    %cst_33 = arith.constant dense<0.000000e+00> : vector<2x32xf32>
    %122 = vector.multi_reduction <add>, %121, %cst_33 [2] : vector<2x32x32xf32> to vector<2x32xf32>
    %123 = vector.shape_cast %122 : vector<2x32xf32> to vector<2x32x1xf32>
    %124 = arith.truncf %121 : vector<2x32x32xf32> to vector<2x32x32xbf16>
    "tpu.trace_start"() <{level = 10 : i32, message = "blm,bme->ble"}> : () -> ()
    %cst_34 = arith.constant dense<0.000000e+00> : vector<2x32x8xf32>
    %125 = tpu.matmul %124, %115, %cst_34 {dimension_numbers = #tpu.dot_dimension_numbers<[2], [1], [1], [2], [0, 0, 0, 1, 1, 2], [0], [0]>} : vector<2x32x32xbf16>, vector<2x32x8xbf16>, vector<2x32x8xf32> -> vector<2x32x8xf32>
    "tpu.trace_stop"() : () -> ()
    %126 = tpu.reciprocal %123 {approx = true} : vector<2x32x1xf32> -> vector<2x32x1xf32>
    %127 = vector.broadcast %126 : vector<2x32x1xf32> to vector<2x32x8xf32>
    %128 = arith.mulf %125, %127 : vector<2x32x8xf32>
    %129 = arith.truncf %128 : vector<2x32x8xf32> to vector<2x32x8xbf16>
    %130 = tpu.concatenate %60, %83, %106, %129 in 2 : vector<2x32x8xbf16>, vector<2x32x8xbf16>, vector<2x32x8xbf16>, vector<2x32x8xbf16> -> vector<2x32x32xbf16>
    %131 = vector.shape_cast %130 : vector<2x32x32xbf16> to vector<64x32xbf16>
    %c0_35 = arith.constant 0 : index
    %c0_36 = arith.constant 0 : index
    %c0_37 = arith.constant 0 : index
    %132 = vector.load %arg7[%c0_35, %c0_36, %c0_37] : memref<1x32x32xbf16, #tpu.memory_space<vmem>>, vector<1x32x32xbf16>
    %133 = vector.shape_cast %132 : vector<1x32x32xbf16> to vector<32x32xbf16>
    %cst_38 = arith.constant dense<0.000000e+00> : vector<64x32xf32>
    %134 = tpu.matmul %131, %133, %cst_38 {dimension_numbers = #tpu.dot_dimension_numbers<[1], [0], [0], [1], [0, 0, 1, 1], [], []>} : vector<64x32xbf16>, vector<32x32xbf16>, vector<64x32xf32> -> vector<64x32xf32>
    %c0_39 = arith.constant 0 : index
    %c0_40 = arith.constant 0 : index
    %c0_41 = arith.constant 0 : index
    %135 = vector.load %arg8[%c0_39, %c0_40, %c0_41] : memref<1x1x32xf32, #tpu.memory_space<vmem>>, vector<1x1x32xf32>
    %136 = vector.shape_cast %135 : vector<1x1x32xf32> to vector<1x32xf32>
    %137 = vector.broadcast %136 : vector<1x32xf32> to vector<64x32xf32>
    %138 = arith.addf %134, %137 : vector<64x32xf32>
    %139 = arith.addf %3, %138 : vector<64x32xf32>
    %c0_42 = arith.constant 0 : index
    %c0_43 = arith.constant 0 : index
    %c0_44 = arith.constant 0 : index
    %140 = vector.load %arg9[%c0_42, %c0_43, %c0_44] : memref<1x1x32xf32, #tpu.memory_space<vmem>>, vector<1x1x32xf32>
    %141 = vector.shape_cast %140 : vector<1x1x32xf32> to vector<1x32xf32>
    %c0_45 = arith.constant 0 : index
    %c0_46 = arith.constant 0 : index
    %c0_47 = arith.constant 0 : index
    %142 = vector.load %arg10[%c0_45, %c0_46, %c0_47] : memref<1x1x32xf32, #tpu.memory_space<vmem>>, vector<1x1x32xf32>
    %143 = vector.shape_cast %142 : vector<1x1x32xf32> to vector<1x32xf32>
    %cst_48 = arith.constant dense<0.000000e+00> : vector<64xf32>
    %144 = vector.multi_reduction <add>, %139, %cst_48 [1] : vector<64x32xf32> to vector<64xf32>
    %145 = vector.shape_cast %144 : vector<64xf32> to vector<64x1xf32>
    %cst_49 = arith.constant 3.200000e+01 : f32
    %146 = vector.broadcast %cst_49 : f32 to vector<64x1xf32>
    %147 = arith.divf %145, %146 : vector<64x1xf32>
    %148 = vector.broadcast %147 : vector<64x1xf32> to vector<64x32xf32>
    %149 = arith.subf %139, %148 : vector<64x32xf32>
    %150 = arith.mulf %149, %149 : vector<64x32xf32>
    %cst_50 = arith.constant dense<0.000000e+00> : vector<64xf32>
    %151 = vector.multi_reduction <add>, %150, %cst_50 [1] : vector<64x32xf32> to vector<64xf32>
    %152 = vector.shape_cast %151 : vector<64xf32> to vector<64x1xf32>
    %cst_51 = arith.constant 3.200000e+01 : f32
    %153 = vector.broadcast %cst_51 : f32 to vector<64x1xf32>
    %154 = arith.divf %152, %153 : vector<64x1xf32>
    %155 = vector.broadcast %147 : vector<64x1xf32> to vector<64x32xf32>
    %156 = arith.subf %139, %155 : vector<64x32xf32>
    %cst_52 = arith.constant 9.99999974E-6 : f32
    %157 = vector.broadcast %cst_52 : f32 to vector<64x1xf32>
    %158 = arith.addf %154, %157 : vector<64x1xf32>
    %159 = math.rsqrt %158 : vector<64x1xf32>
    %160 = vector.broadcast %159 : vector<64x1xf32> to vector<64x32xf32>
    %161 = arith.mulf %156, %160 : vector<64x32xf32>
    %162 = vector.broadcast %141 : vector<1x32xf32> to vector<64x32xf32>
    %163 = arith.mulf %161, %162 : vector<64x32xf32>
    %164 = vector.broadcast %143 : vector<1x32xf32> to vector<64x32xf32>
    %165 = arith.addf %163, %164 : vector<64x32xf32>
    %166 = arith.truncf %165 : vector<64x32xf32> to vector<64x32xbf16>
    %c0_53 = arith.constant 0 : index
    %c0_54 = arith.constant 0 : index
    %c0_55 = arith.constant 0 : index
    %167 = vector.load %arg11[%c0_53, %c0_54, %c0_55] : memref<1x32x128xbf16, #tpu.memory_space<vmem>>, vector<1x32x128xbf16>
    %168 = vector.shape_cast %167 : vector<1x32x128xbf16> to vector<32x128xbf16>
    %cst_56 = arith.constant dense<0.000000e+00> : vector<64x128xf32>
    %169 = tpu.matmul %166, %168, %cst_56 {dimension_numbers = #tpu.dot_dimension_numbers<[1], [0], [0], [1], [0, 0, 1, 1], [], []>} : vector<64x32xbf16>, vector<32x128xbf16>, vector<64x128xf32> -> vector<64x128xf32>
    %c0_57 = arith.constant 0 : index
    %c0_58 = arith.constant 0 : index
    %c0_59 = arith.constant 0 : index
    %170 = vector.load %arg12[%c0_57, %c0_58, %c0_59] : memref<1x1x128xf32, #tpu.memory_space<vmem>>, vector<1x1x128xf32>
    %171 = vector.shape_cast %170 : vector<1x1x128xf32> to vector<1x128xf32>
    %172 = vector.broadcast %171 : vector<1x128xf32> to vector<64x128xf32>
    %173 = arith.addf %169, %172 : vector<64x128xf32>
    %174 = arith.mulf %173, %173 : vector<64x128xf32>
    %175 = arith.mulf %173, %174 : vector<64x128xf32>
    %cst_60 = arith.constant 4.471500e-02 : f32
    %176 = vector.broadcast %cst_60 : f32 to vector<64x128xf32>
    %177 = arith.mulf %176, %175 : vector<64x128xf32>
    %178 = arith.addf %173, %177 : vector<64x128xf32>
    %cst_61 = arith.constant 0.797884583 : f32
    %179 = vector.broadcast %cst_61 : f32 to vector<64x128xf32>
    %180 = arith.mulf %179, %178 : vector<64x128xf32>
    %181 = math.tanh %180 : vector<64x128xf32>
    %cst_62 = arith.constant 1.000000e+00 : f32
    %182 = vector.broadcast %cst_62 : f32 to vector<64x128xf32>
    %183 = arith.addf %182, %181 : vector<64x128xf32>
    %cst_63 = arith.constant 5.000000e-01 : f32
    %184 = vector.broadcast %cst_63 : f32 to vector<64x128xf32>
    %185 = arith.mulf %184, %183 : vector<64x128xf32>
    %186 = arith.mulf %173, %185 : vector<64x128xf32>
    %187 = arith.truncf %186 : vector<64x128xf32> to vector<64x128xbf16>
    %c0_64 = arith.constant 0 : index
    %c0_65 = arith.constant 0 : index
    %c0_66 = arith.constant 0 : index
    %188 = vector.load %arg13[%c0_64, %c0_65, %c0_66] : memref<1x128x32xbf16, #tpu.memory_space<vmem>>, vector<1x128x32xbf16>
    %189 = vector.shape_cast %188 : vector<1x128x32xbf16> to vector<128x32xbf16>
    %cst_67 = arith.constant dense<0.000000e+00> : vector<64x32xf32>
    %190 = tpu.matmul %187, %189, %cst_67 {dimension_numbers = #tpu.dot_dimension_numbers<[1], [0], [0], [1], [0, 0, 1, 1], [], []>} : vector<64x128xbf16>, vector<128x32xbf16>, vector<64x32xf32> -> vector<64x32xf32>
    %c0_68 = arith.constant 0 : index
    %c0_69 = arith.constant 0 : index
    %c0_70 = arith.constant 0 : index
    %191 = vector.load %arg14[%c0_68, %c0_69, %c0_70] : memref<1x1x32xf32, #tpu.memory_space<vmem>>, vector<1x1x32xf32>
    %192 = vector.shape_cast %191 : vector<1x1x32xf32> to vector<1x32xf32>
    %193 = vector.broadcast %192 : vector<1x32xf32> to vector<64x32xf32>
    %194 = arith.addf %190, %193 : vector<64x32xf32>
    %195 = arith.addf %139, %194 : vector<64x32xf32>
    %c0_71 = arith.constant 0 : index
    %c0_72 = arith.constant 0 : index
    %196 = vector.load %arg16[%c0_71, %c0_72] : memref<64x32xf32, #tpu.memory_space<vmem>>, vector<64x32xf32>
    tpu.vector_store %arg16[%c0_71, %c0_72], %195 {strides = array<i32>} : memref<64x32xf32, #tpu.memory_space<vmem>>, vector<64x32xf32>,
    %c1_i32 = arith.constant 1 : i32
    %197 = arith.cmpi eq, %arg1, %c1_i32 : i32
    %198 = arith.extui %197 : i1 to i32
    %c0_i32_73 = arith.constant 0 : i32
    %199 = arith.cmpi ne, %198, %c0_i32_73 : i32
    scf.if %199 {
      %c0_74 = arith.constant 0 : index
      %c0_75 = arith.constant 0 : index
      %200 = vector.load %arg15[%c0_74, %c0_75] : memref<64x32xf32, #tpu.memory_space<vmem>>, vector<64x32xf32>
      tpu.vector_store %arg15[%c0_74, %c0_75], %195 {strides = array<i32>} : memref<64x32xf32, #tpu.memory_space<vmem>>, vector<64x32xf32>,
    } else {
    }
    return
  }
  func.func @transform_0(%arg0: i32, %arg1: i32) -> (i32, i32) {
    %c0_i32 = arith.constant 0 : i32
    %c0_i32_0 = arith.constant 0 : i32
    return %arg0, %c0_i32 : i32, i32
  }
  func.func @transform_1(%arg0: i32, %arg1: i32) -> (i32, i32, i32) {
    %c0_i32 = arith.constant 0 : i32
    %c0_i32_0 = arith.constant 0 : i32
    %c0_i32_1 = arith.constant 0 : i32
    return %arg1, %c0_i32, %c0_i32_0 : i32, i32, i32
  }
  func.func @transform_2(%arg0: i32, %arg1: i32) -> (i32, i32, i32) {
    %c0_i32 = arith.constant 0 : i32
    %c0_i32_0 = arith.constant 0 : i32
    %c0_i32_1 = arith.constant 0 : i32
    return %arg1, %c0_i32, %c0_i32_0 : i32, i32, i32
  }
  func.func @transform_3(%arg0: i32, %arg1: i32) -> (i32, i32, i32) {
    %c0_i32 = arith.constant 0 : i32
    %c0_i32_0 = arith.constant 0 : i32
    %c0_i32_1 = arith.constant 0 : i32
    return %arg1, %c0_i32, %c0_i32_0 : i32, i32, i32
  }
  func.func @transform_4(%arg0: i32, %arg1: i32) -> (i32, i32, i32) {
    %c0_i32 = arith.constant 0 : i32
    %c0_i32_0 = arith.constant 0 : i32
    %c0_i32_1 = arith.constant 0 : i32
    return %arg1, %c0_i32, %c0_i32_0 : i32, i32, i32
  }
  func.func @transform_5(%arg0: i32, %arg1: i32) -> (i32, i32, i32) {
    %c0_i32 = arith.constant 0 : i32
    %c0_i32_0 = arith.constant 0 : i32
    %c0_i32_1 = arith.constant 0 : i32
    return %arg1, %c0_i32, %c0_i32_0 : i32, i32, i32
  }
  func.func @transform_6(%arg0: i32, %arg1: i32) -> (i32, i32, i32) {
    %c0_i32 = arith.constant 0 : i32
    %c0_i32_0 = arith.constant 0 : i32
    %c0_i32_1 = arith.constant 0 : i32
    return %arg1, %c0_i32, %c0_i32_0 : i32, i32, i32
  }
  func.func @transform_7(%arg0: i32, %arg1: i32) -> (i32, i32, i32) {
    %c0_i32 = arith.constant 0 : i32
    %c0_i32_0 = arith.constant 0 : i32
    %c0_i32_1 = arith.constant 0 : i32
    return %arg1, %c0_i32, %c0_i32_0 : i32, i32, i32
  }
  func.func @transform_8(%arg0: i32, %arg1: i32) -> (i32, i32, i32) {
    %c0_i32 = arith.constant 0 : i32
    %c0_i32_0 = arith.constant 0 : i32
    %c0_i32_1 = arith.constant 0 : i32
    return %arg1, %c0_i32, %c0_i32_0 : i32, i32, i32
  }
  func.func @transform_9(%arg0: i32, %arg1: i32) -> (i32, i32, i32) {
    %c0_i32 = arith.constant 0 : i32
    %c0_i32_0 = arith.constant 0 : i32
    %c0_i32_1 = arith.constant 0 : i32
    return %arg1, %c0_i32, %c0_i32_0 : i32, i32, i32
  }
  func.func @transform_10(%arg0: i32, %arg1: i32) -> (i32, i32, i32) {
    %c0_i32 = arith.constant 0 : i32
    %c0_i32_0 = arith.constant 0 : i32
    %c0_i32_1 = arith.constant 0 : i32
    return %arg1, %c0_i32, %c0_i32_0 : i32, i32, i32
  }
  func.func @transform_11(%arg0: i32, %arg1: i32) -> (i32, i32, i32) {
    %c0_i32 = arith.constant 0 : i32
    %c0_i32_0 = arith.constant 0 : i32
    %c0_i32_1 = arith.constant 0 : i32
    return %arg1, %c0_i32, %c0_i32_0 : i32, i32, i32
  }
  func.func @transform_12(%arg0: i32, %arg1: i32) -> (i32, i32, i32) {
    %c0_i32 = arith.constant 0 : i32
    %c0_i32_0 = arith.constant 0 : i32
    %c0_i32_1 = arith.constant 0 : i32
    return %arg1, %c0_i32, %c0_i32_0 : i32, i32, i32
  }
  func.func @transform_13(%arg0: i32, %arg1: i32) -> (i32, i32) {
    %c0_i32 = arith.constant 0 : i32
    %c0_i32_0 = arith.constant 0 : i32
    return %arg0, %c0_i32 : i32, i32
  }
}

</mosaic_0001>

<bundles_post_ra>
// kernel: transformer_forward.1
= control target key start
LH: loop header
LB: loop body
LE: loop exit
PB: predicated region body
PF: predicated region fallthrough
CT: control target
= control target key end

     0   :  { %s6090_s0 = inlined_call_operand.hbm [shape: f32[64,32], index: 0, kind: input, shape index: {}]   ;;  %s6091_s1 = inlined_call_operand.hbm [shape: f32[2,1,32], index: 1, kind: input, shape index: {}]   ;;  %s6092_s2 = inlined_call_operand.hbm [shape: f32[2,1,32], index: 2, kind: input, shape index: {}]   ;;  %s6093_s3 = inlined_call_operand.hbm [shape: bf16[2,32,96], index: 3, kind: input, shape index: {}]   ;;  %s6094_s4 = inlined_call_operand.hbm [shape: f32[2,1,96], index: 4, kind: input, shape index: {}]   ;;  %s6095_s5 = inlined_call_operand.hbm [shape: bf16[2,32,32], index: 5, kind: input, shape index: {}]   ;;  %s6096_s6 = inlined_call_operand.hbm [shape: f32[2,1,32], index: 6, kind: input, shape index: {}]   ;;  %s6097_s7 = inlined_call_operand.hbm [shape: f32[2,1,32], index: 7, kind: input, shape index: {}]   ;;  %s6098_s8 = inlined_call_operand.hbm [shape: f32[2,1,32], index: 8, kind: input, shape index: {}]   ;;  %s6099_s9 = inlined_call_operand.hbm [shape: bf16[2,32,128], index: 9, kind: input, shape index: {}]   ;;  %s6100_s10 = inlined_call_operand.hbm [shape: f32[2,1,128], index: 10, kind: input, shape index: {}]   ;;  %s6101_s11 = inlined_call_operand.hbm [shape: bf16[2,128,32], index: 11, kind: input, shape index: {}]   ;;  %s6102_s12 = inlined_call_operand.hbm [shape: f32[2,1,32], index: 12, kind: input, shape index: {}]   ;;  %s6103_s13 = inlined_call_operand.hbm [shape: f32[64,32], index: 13, kind: output, shape index: {}]  }
   0x1   :  { %6125 = sst [smem:[#allocation37_spill]] %s6090_s0 }
   0x2   :  { %6126 = sst [smem:[#allocation38_spill]] %s6091_s1 }
   0x3   :  { %6127 = sst [smem:[#allocation39_spill]] %s6093_s3 }
   0x4   :  { %6128 = sst [smem:[#allocation40_spill]] %s6095_s5 }
   0x5   :  { %6129 = sst [smem:[#allocation41_spill]] %s6097_s7 }
   0x6   :  { %6130 = sst [smem:[#allocation42_spill]] %s6098_s8 }
   0x7   :  { %6131 = sst [smem:[#allocation43_spill]] %s6100_s10 }
   0x8   :  { %6132 = sst [smem:[#allocation44_spill]] %s6102_s12 }
   0x9   :  { %6133 = sst [smem:[#allocation45_spill]] %s6103_s13 }
   0xa   :  { %18 = vsyncpa [#allocation4], 0 }
   0xb   :  { %19 = vsyncpa [#allocation7], 0 }
   0xc   :  { %21 = vsyncpa [#allocation7 + $0x1], 0 }
   0xd   :  { %22 = vsyncpa [#allocation10], 0 }
   0xe   :  { %24 = vsyncpa [#allocation10 + $0x1], 0 }
   0xf   :  { %25 = vsyncpa [#allocation13], 0 }
  0x10   :  { %27 = vsyncpa [#allocation13 + $0x1], 0 }
  0x11   :  { %28 = vsyncpa [#allocation16], 0 }
  0x12   :  { %30 = vsyncpa [#allocation16 + $0x1], 0 }
  0x13   :  { %31 = vsyncpa [#allocation19], 0 }
  0x14   :  { %33 = vsyncpa [#allocation19 + $0x1], 0 }
  0x15   :  { %34 = vsyncpa [#allocation22], 0 }
  0x16   :  { %36 = vsyncpa [#allocation22 + $0x1], 0 }
  0x17   :  { %37 = vsyncpa [#allocation5], 0  ;;  %s4850_s25 = smov 0   ;;  %s4852_s26 = smov 0  }
  0x18   :  { %s4854_s27 = smov 0   ;;  %s4856_s28 = smov 0  }
  0x19   :  { %s4858_s29 = smov 0   ;;  %s4860_s30 = smov 0  }
  0x1a LB: > { %6134 = sst [smem:[#allocation33_spill]] %s4733_s27  ;;  %s52_s14 = sadd.s32 1, %s4741_s29  ;;  %s4745_s30 = sphi %s4860_s30, %s43_s30   ;;  %s4741_s29 = sphi %s4858_s29, %s6183_s29   ;;  %s4737_s28 = sphi %s4856_s28, %s6182_s28   ;;  %s4733_s27 = sphi %s4854_s27, %s6178_s27   ;;  %s4729_s26 = sphi %s4852_s26, %s6181_s26   ;;  %s4725_s25 = sphi %s4850_s25, %s6180_s25  }
  0x1b   : > { %6135 = sst [smem:[#allocation34_spill]] %s4737_s28  ;;  %s88_s15 = sadd.s32 1, %s4733_s27 }
  0x1c   : > { %p53_p0 = scmp.ge.s32.totalorder %s52_s14, 2  ;;  %p95_p1 = scmp.ne.s32.totalorder %s4733_s27, %s4729_s26 }
  0x1d   : > { %p96_p2 = scmp.eq.s32.totalorder %s4745_s30, 0  ;;  %p3982_p4 = scmp.lt.s32.totalorder %s4745_s30, 2 }
  0x1e   : > { %s6185_s14 = smov (%p53_p0, %s52_s14), 0  ;;  %s4891_s17 = sand.u32 1, %s4745_s30  }
  0x1f   : > { %6136 = sst [smem:[#allocation35_spill]] %s6185_s14  ;;  %p97_p3 = por %p96_p2, %p95_p1 }
  0x20   : > { %s85_s16 = ssub.s32 %s4741_s29, %s6185_s14  ;;  %s4894_s18 = sand.u32 1, %s4733_s27  }
  0x21   : > { %p86_p5 = scmp.eq.s32.totalorder %s85_s16, 0  ;;  %s4897_s19 = sshll.u32 %s4741_s29, 4 }
  0x22   : > { %s6138_s1 = sld [smem:[#allocation38_spill]]  ;;  %s456_s24 = scalar_lea.vmem [#allocation6], %s4894_s18 }
  0x23   : > { %s4900_s20 = scalar_select %p86_p5, %s4733_s27, %s88_s15  }
  0x24   : > { %s463_s16 = sshll.u32 %s456_s24, 4  ;;  %p4909_p6 = pnand %p3982_p4, %p97_p3  ;;  %s4913_s16 = int_to_ptr.vmem [resolvable:$true] %s463_s16 }
  0x25   : > { %6137 = sst [smem:[#allocation36_spill]] %s4900_s20  ;;  %s4916_s15 = sshll.u32 %s4894_s18, 4 }
  0x26   : > { %s6139_s14 = scalar_select %p4909_p6, 1, 0 }
  0x27   : > { %p4923_p8 = pneg %p4909_p6 }
  0x28   : > { %s4906_s23 = scalar_lea.hbm %s6138_s1, %s4897_s19  ;;  %s4258_s13 = scalar_lea.hbm %s6138_s1, 32 }
  0x29   : > { %s4253_s27 = scalar_lea.hbm %s4906_s23, 16  ;;  %p4259_p11 = scmp.lt.u32.totalorder %s4906_s23, %s6138_s1 }
  0x2a   : > { %p4254_p7 = scmp.ne.s32.totalorder %s4906_s23, %s4253_s27  ;;  %p4260_p12 = scmp.lt.u32.totalorder %s4258_s13, %s4253_s27 }
  0x2b   : > { %s6140_s21 = scalar_select %p4923_p8, 1, 0 }
  0x2c   : > { %p4256_p9 = pnand %p4923_p8, %p4254_p7  ;;  %p4261_p13 = por %p4260_p12, %p4259_p11 }
  0x2d   : > { %p4262_p0 = scmp.lt.u32.totalorder %s4253_s27, %s4906_s23 }
  0x2e   : > { %p4257_p10 = pneg %p4256_p9 }
  0x2f   : > { %p4263_p1 = por %p4262_p0, %p4261_p13 }
  0x31   : > { %p4264_p2 = pnand %p4263_p1, %p4257_p10 }
  0x33   : > { %4267 = shalt.err (!%p4264_p2)
}
  0x34   : > { %s4268_s20 = scalar_lea.vmem %s4913_s16, 16  ;;  %s4747_s22 = smov [#allocation6]  }
  0x35   : > { %p4269_p3 = scmp.ne.s32.totalorder %s4913_s16, %s4268_s20  ;;  %s4273_s24 = sshll.u32 %s4747_s22, 4  ;;  %s4274_s24 = int_to_ptr.vmem [resolvable:$false] %s4273_s24 }
  0x36   : > { %s4275_s12 = scalar_lea.vmem %s4274_s24, 32  ;;  %p4276_p7 = scmp.lt.s32.totalorder %s4913_s16, %s4274_s24 }
  0x37   : > { %p4271_p4 = pnand %p4269_p3, %p4923_p8  ;;  %p4277_p9 = scmp.lt.s32.totalorder %s4275_s12, %s4268_s20 }
  0x39   : > { %p4272_p5 = pneg %p4271_p4  ;;  %p4278_p11 = por %p4277_p9, %p4276_p7 }
  0x3b   : > { %p4279_p12 = pnand %p4278_p11, %p4272_p5 }
  0x3d   : > { %4282 = shalt.err (!%p4279_p12)
}
  0x3e   : > { %s6141_s13 = scalar_lea.sflag [#allocation7], %s4891_s17  ;;  %s4949_s27 = sshll.u32 %s4741_s29, 8 }
  0x3f   : > { %3947 = dma.hbm_to_vmem [thread:$0]  (!%p4909_p6), %s4906_s23, 16, %s4913_s16, %s6141_s13  }
  0x40   : > { %s6142_s3 = sld [smem:[#allocation39_spill]]  ;;  %s491_s24 = scalar_lea.vmem [#allocation9], %s4916_s15 }
  0x41   : > { %s498_s12 = sshll.u32 %s491_s24, 4  ;;  %s6110_s1 = scalar_lea.sflag [#allocation10], %s4891_s17  ;;  %s4958_s12 = int_to_ptr.vmem [resolvable:$true] %s498_s12 }
  0x46   : > { %s4955_s20 = scalar_lea.hbm %s6142_s3, %s4949_s27  ;;  %s4288_s13 = scalar_lea.hbm %s6142_s3, 512 }
  0x47   : > { %s4283_s10 = scalar_lea.hbm %s4955_s20, 256  ;;  %p4289_p1 = scmp.lt.u32.totalorder %s4955_s20, %s6142_s3 }
  0x48   : > { %p4284_p10 = scmp.ne.s32.totalorder %s4955_s20, %s4283_s10  ;;  %p4290_p2 = scmp.lt.u32.totalorder %s4288_s13, %s4283_s10 }
  0x49   : > { %p4292_p4 = scmp.lt.u32.totalorder %s4283_s10, %s4955_s20 }
  0x4a   : > { %p4286_p13 = pnand %p4284_p10, %p4923_p8  ;;  %p4291_p3 = por %p4290_p2, %p4289_p1 }
  0x4c   : > { %p4287_p0 = pneg %p4286_p13  ;;  %p4293_p5 = por %p4292_p4, %p4291_p3 }
  0x4e   : > { %p4294_p7 = pnand %p4293_p5, %p4287_p0 }
  0x50   : > { %4297 = shalt.err (!%p4294_p7)
}
  0x51   : > { %s4298_s24 = scalar_lea.vmem %s4958_s12, 256  ;;  %s4748_s23 = smov [#allocation9]  }
  0x52   : > { %p4299_p9 = scmp.ne.s32.totalorder %s4958_s12, %s4298_s24  ;;  %s4303_s16 = sshll.u32 %s4748_s23, 4  ;;  %s4304_s16 = int_to_ptr.vmem [resolvable:$false] %s4303_s16 }
  0x53   : > { %s4305_s28 = scalar_lea.vmem %s4304_s16, 512  ;;  %p4306_p10 = scmp.lt.s32.totalorder %s4958_s12, %s4304_s16 }
  0x54   : > { %p4301_p11 = pnand %p4299_p9, %p4923_p8  ;;  %p4307_p13 = scmp.lt.s32.totalorder %s4305_s28, %s4298_s24 }
  0x56   : > { %p4302_p12 = pneg %p4301_p11  ;;  %p4308_p1 = por %p4307_p13, %p4306_p10 }
  0x58   : > { %p4309_p2 = pnand %p4308_p1, %p4302_p12 }
  0x5a   : > { %4312 = shalt.err (!%p4309_p2)
}
  0x5b   : > { %s6112_s10 = smov 64   ;;  %s4750_s13 = smov 4  }
  0x5c   : > { %3953 = dma.hbm_to_vmem [thread:$0]  (!%p4909_p6), %s4955_s20, 256, %s4958_s12, %s6110_s1, %s6112_s10, %s6112_s10, %s4750_s13  }
  0x5d   : > { %s6143_s5 = sld [smem:[#allocation40_spill]]  ;;  %s529_s16 = scalar_lea.vmem [#allocation12], %s4916_s15 }
  0x5e   : > { %s536_s28 = sshll.u32 %s529_s16, 4  ;;  %s6111_s3 = scalar_lea.sflag [#allocation13], %s4891_s17  ;;  %s4994_s28 = int_to_ptr.vmem [resolvable:$true] %s536_s28 }
  0x63   : > { %s4991_s23 = scalar_lea.hbm %s6143_s5, %s4949_s27  ;;  %s4318_s22 = scalar_lea.hbm %s6143_s5, 512 }
  0x64   : > { %s4313_s8 = scalar_lea.hbm %s4991_s23, 256  ;;  %p4319_p5 = scmp.lt.u32.totalorder %s4991_s23, %s6143_s5 }
  0x65   : > { %p4314_p0 = scmp.ne.s32.totalorder %s4991_s23, %s4313_s8  ;;  %p4320_p7 = scmp.lt.u32.totalorder %s4318_s22, %s4313_s8 }
  0x66   : > { %p4322_p11 = scmp.lt.u32.totalorder %s4313_s8, %s4991_s23 }
  0x67   : > { %p4316_p3 = pnand %p4314_p0, %p4923_p8  ;;  %p4321_p9 = por %p4320_p7, %p4319_p5 }
  0x69   : > { %p4317_p4 = pneg %p4316_p3  ;;  %p4323_p12 = por %p4322_p11, %p4321_p9 }
  0x6b   : > { %p4324_p10 = pnand %p4323_p12, %p4317_p4 }
  0x6d   : > { %4327 = shalt.err (!%p4324_p10)
}
  0x6e   : > { %s4328_s16 = scalar_lea.vmem %s4994_s28, 256  ;;  %s4751_s20 = smov [#allocation12]  }
  0x6f   : > { %p4329_p13 = scmp.ne.s32.totalorder %s4994_s28, %s4328_s16  ;;  %s4333_s12 = sshll.u32 %s4751_s20, 4  ;;  %s4334_s12 = int_to_ptr.vmem [resolvable:$false] %s4333_s12 }
  0x70   : > { %s4335_s1 = scalar_lea.vmem %s4334_s12, 512  ;;  %p4336_p0 = scmp.lt.s32.totalorder %s4994_s28, %s4334_s12 }
  0x71   : > { %p4331_p1 = pnand %p4329_p13, %p4923_p8  ;;  %p4337_p3 = scmp.lt.s32.totalorder %s4335_s1, %s4328_s16 }
  0x73   : > { %p4332_p2 = pneg %p4331_p1  ;;  %p4338_p5 = por %p4337_p3, %p4336_p0 }
  0x75   : > { %p4339_p7 = pnand %p4338_p5, %p4332_p2 }
  0x77   : > { %4342 = shalt.err (!%p4339_p7)
}
  0x78   : > { %3959 = dma.hbm_to_vmem [thread:$0]  (!%p4909_p6), %s4991_s23, 256, %s4994_s28, %s6111_s3, %s6112_s10, %s6112_s10, %s4750_s13  }
  0x79   : > { %s6144_s7 = sld [smem:[#allocation41_spill]]  ;;  %s566_s16 = scalar_lea.vmem [#allocation15], %s4894_s18 }
  0x7a   : > { %s573_s20 = sshll.u32 %s566_s16, 4  ;;  %s6124_s12 = scalar_lea.sflag [#allocation16], %s4891_s17  ;;  %s574_s20 = int_to_ptr.vmem [resolvable:$true] %s573_s20 }
  0x7f   : > { %s5027_s24 = scalar_lea.hbm %s6144_s7, %s4897_s19  ;;  %s4348_s28 = scalar_lea.hbm %s6144_s7, 32 }
  0x80   : > { %s4343_s1 = scalar_lea.hbm %s5027_s24, 16  ;;  %p4349_p12 = scmp.lt.u32.totalorder %s5027_s24, %s6144_s7 }
  0x81   : > { %p4344_p4 = scmp.ne.s32.totalorder %s5027_s24, %s4343_s1  ;;  %p4350_p10 = scmp.lt.u32.totalorder %s4348_s28, %s4343_s1 }
  0x82   : > { %p4352_p1 = scmp.lt.u32.totalorder %s4343_s1, %s5027_s24 }
  0x83   : > { %p4346_p9 = pnand %p4344_p4, %p4923_p8  ;;  %p4351_p13 = por %p4350_p10, %p4349_p12 }
  0x85   : > { %p4347_p11 = pneg %p4346_p9  ;;  %p4353_p2 = por %p4352_p1, %p4351_p13 }
  0x87   : > { %p4354_p0 = pnand %p4353_p2, %p4347_p11 }
  0x89   : > { %4357 = shalt.err (!%p4354_p0)
}
  0x8a   : > { %s4358_s16 = scalar_lea.vmem %s574_s20, 16  ;;  %s4752_s3 = smov [#allocation15]  }
  0x8b   : > { %p4359_p3 = scmp.ne.s32.totalorder %s574_s20, %s4358_s16  ;;  %s4363_s10 = sshll.u32 %s4752_s3, 4  ;;  %s4364_s10 = int_to_ptr.vmem [resolvable:$false] %s4363_s10 }
  0x8c   : > { %s4365_s5 = scalar_lea.vmem %s4364_s10, 32  ;;  %p4366_p4 = scmp.lt.s32.totalorder %s574_s20, %s4364_s10 }
  0x8d   : > { %p4361_p5 = pnand %p4359_p3, %p4923_p8  ;;  %p4367_p9 = scmp.lt.s32.totalorder %s4365_s5, %s4358_s16 }
  0x8f   : > { %p4362_p7 = pneg %p4361_p5  ;;  %p4368_p6 = por %p4367_p9, %p4366_p4 }
  0x91   : > { %p4369_p10 = pnand %p4368_p6, %p4362_p7 }
  0x93   : > { %4372 = shalt.err (!%p4369_p10)
}
  0x94   : > { %p6145_p12 = scmp.ne.s32.totalorder %s6139_s14, 0  ;;  %s5054_s23 = scalar_lea.hbm %s6099_s9, %s4949_s27 }
  0x95   : > { %s601_s10 = scalar_lea.vmem [#allocation18], %s4916_s15  ;;  %s3524_s8 = sshll.u32 %s4894_s18, 6 }
  0x96   : > { %3965 = dma.hbm_to_vmem [thread:$0]  (!%p6145_p12), %s5027_s24, 16, %s574_s20, %s6124_s12  }
  0x97   : > { %s608_s28 = sshll.u32 %s601_s10, 4  ;;  %s6117_s22 = scalar_lea.sflag [#allocation19], %s4891_s17  ;;  %s5057_s28 = int_to_ptr.vmem [resolvable:$true] %s608_s28 }
  0x98   : > { %s4373_s16 = scalar_lea.hbm %s5054_s23, 256  ;;  %s4378_s27 = scalar_lea.hbm %s6099_s9, 512 }
  0x99   : > { %p4374_p6 = scmp.ne.s32.totalorder %s5054_s23, %s4373_s16  ;;  %p4379_p1 = scmp.lt.u32.totalorder %s5054_s23, %s6099_s9 }
  0x9a   : > { %p4380_p2 = scmp.lt.u32.totalorder %s4378_s27, %s4373_s16  ;;  %p4382_p3 = scmp.lt.u32.totalorder %s4373_s16, %s5054_s23 }
  0x9b   : > { %p4376_p11 = pnand %p4374_p6, %p4923_p8 }
  0x9c   : > { %p4381_p0 = por %p4380_p2, %p4379_p1 }
  0x9d   : > { %p4377_p13 = pneg %p4376_p11 }
  0x9e   : > { %p4383_p5 = por %p4382_p3, %p4381_p0 }
  0xa0   : > { %p4384_p7 = pnand %p4383_p5, %p4377_p13 }
  0xa2   : > { %4387 = shalt.err (!%p4384_p7)
}
  0xa3   : > { %s4388_s15 = scalar_lea.vmem %s5057_s28, 256  ;;  %s4753_s3 = smov [#allocation18]  }
  0xa4   : > { %p4389_p4 = scmp.ne.s32.totalorder %s5057_s28, %s4388_s15  ;;  %s4393_s10 = sshll.u32 %s4753_s3, 4  ;;  %s4394_s10 = int_to_ptr.vmem [resolvable:$false] %s4393_s10 }
  0xa5   : > { %s4395_s24 = scalar_lea.vmem %s4394_s10, 512  ;;  %p4396_p6 = scmp.lt.s32.totalorder %s5057_s28, %s4394_s10 }
  0xa6   : > { %p4391_p9 = pnand %p4389_p4, %p4923_p8  ;;  %p4397_p11 = scmp.lt.s32.totalorder %s4395_s24, %s4388_s15 }
  0xa8   : > { %p4392_p10 = pneg %p4391_p9  ;;  %p4398_p1 = por %p4397_p11, %p4396_p6 }
  0xaa   : > { %p4399_p2 = pnand %p4398_p1, %p4392_p10 }
  0xac   : > { %4402 = shalt.err (!%p4399_p2)
}
  0xad   : > { %s6146_s16 = smov 64   ;;  %s3609_s20 = sshll.u32 %s4741_s29, 10 }
  0xae   : > { %3971 = dma.hbm_to_vmem [thread:$0]  (!%p6145_p12), %s5054_s23, 256, %s5057_s28, %s6117_s22, %s6146_s16, %s6146_s16, %s4750_s13  }
  0xaf   : > { %s5091_s1 = scalar_lea.hbm %s6101_s11, %s3609_s20  ;;  %s639_s15 = scalar_lea.vmem [#allocation21], %s3524_s8 }
  0xb0   : > { %s646_s3 = sshll.u32 %s639_s15, 4  ;;  %s6116_s10 = scalar_lea.sflag [#allocation22], %s4891_s17  ;;  %s5095_s3 = int_to_ptr.vmem [resolvable:$true] %s646_s3 }
  0xb1   : > { %s4403_s24 = scalar_lea.hbm %s5091_s1, 1024  ;;  %s4408_s20 = scalar_lea.hbm %s6101_s11, 2048 }
  0xb2   : > { %p4404_p13 = scmp.ne.s32.totalorder %s5091_s1, %s4403_s24  ;;  %p4409_p5 = scmp.lt.u32.totalorder %s5091_s1, %s6101_s11 }
  0xb3   : > { %p4410_p7 = scmp.lt.u32.totalorder %s4408_s20, %s4403_s24  ;;  %p4412_p9 = scmp.lt.u32.totalorder %s4403_s24, %s5091_s1 }
  0xb4   : > { %p4406_p0 = pnand %p4404_p13, %p4923_p8 }
  0xb5   : > { %p4411_p4 = por %p4410_p7, %p4409_p5 }
  0xb6   : > { %p4407_p3 = pneg %p4406_p0 }
  0xb7   : > { %p4413_p10 = por %p4412_p9, %p4411_p4 }
  0xb9   : > { %p4414_p6 = pnand %p4413_p10, %p4407_p3 }
  0xbb   : > { %4417 = shalt.err (!%p4414_p6)
}
  0xbc   : > { %s4418_s8 = scalar_lea.vmem %s5095_s3, 1024  ;;  %s4754_s15 = smov [#allocation21]  }
  0xbd   : > { %p4419_p11 = scmp.ne.s32.totalorder %s5095_s3, %s4418_s8  ;;  %s4423_s23 = sshll.u32 %s4754_s15, 4  ;;  %s4424_s23 = int_to_ptr.vmem [resolvable:$false] %s4423_s23 }
  0xbe   : > { %s4425_s28 = scalar_lea.vmem %s4424_s23, 2048  ;;  %p4426_p13 = scmp.lt.s32.totalorder %s5095_s3, %s4424_s23 }
  0xbf   : > { %p4421_p1 = pnand %p4419_p11, %p4923_p8  ;;  %p4427_p0 = scmp.lt.s32.totalorder %s4425_s28, %s4418_s8 }
  0xc1   : > { %p4422_p2 = pneg %p4421_p1  ;;  %p4428_p5 = por %p4427_p0, %p4426_p13 }
  0xc3   : > { %p4429_p7 = pnand %p4428_p5, %p4422_p2 }
  0xc5   : > { %4432 = shalt.err (!%p4429_p7)
}
  0xc6   : > { %3977 = dma.hbm_to_vmem [thread:$0]  (!%p6145_p12), %s5091_s1, 1024, %s5095_s3, %s6116_s10, %s6146_s16, %s6146_s16, %s4750_s13  }
  0xc7   : > { %s5125_s24 = sadd.s32 4294967295, %s4745_s30   ;;  %p101_p3 = scmp.ne.s32.totalorder %s4729_s26, %s4725_s25 }
  0xc8   : > { %p6118_p4 = scmp.eq.s32.totalorder %s5125_s24, 0  ;;  %p3505_p9 = scmp.ge.s32.totalorder %s4745_s30, 1 }
  0xc9   : > { %p424_p10 = scmp.lt.s32.totalorder %s4745_s30, 3  ;;  %s4755_s13 = smov [#allocation3]  }
  0xca   : > { %p5134_p6 = por %p6118_p4, %p101_p3  ;;  %s439_s16 = sshll.u32 %s4755_s13, 4  ;;  %s440_s16 = int_to_ptr.vmem [resolvable:$true] %s439_s16 }
  0xcb   : > { %p5138_p11 = pnand %p3505_p9, %p424_p10  ;;  %s5154_s5 = scalar_lea.hbm %s6092_s2, %s4897_s19 }
  0xcc   : > { %s6147_s20 = scalar_select %p5134_p6, 1, 0 }
  0xcd   : > { %s6148_s27 = scalar_select %p5138_p11, 1, 0 }
  0xce   : > { %p3940_p1 = pneg %p5138_p11  ;;  %s473_s8 = scalar_lea.vmem [#allocation8], %s4894_s18 }
  0xcf   : > { %s480_s15 = sshll.u32 %s473_s8, 4  ;;  %s6150_s0 = sld [smem:[#allocation37_spill]]  ;;  %s5157_s15 = int_to_ptr.vmem [resolvable:$true] %s480_s15 }
  0xd0   : > { %p5146_p2 = pnand %p3940_p1, %p6118_p4 }
  0xd2   : > { %p4435_p0 = pneg %p5146_p2 }
  0xd5   : > { %s4433_s13 = scalar_lea.hbm %s6150_s0, 1024 }
  0xd6   : > { %p4434_p13 = scmp.ne.s32.totalorder %s6150_s0, %s4433_s13  ;;  %p4440_p3 = scmp.lt.u32.totalorder %s4433_s13, %s6150_s0 }
  0xd8   : > { %p4436_p5 = pnand %p4435_p0, %p4434_p13 }
  0xda   : > { %p4437_p7 = pneg %p4436_p5 }
  0xdc   : > { %p4442_p9 = pnand %p4440_p3, %p4437_p7 }
  0xde   : > { %4445 = shalt.err (!%p4442_p9)
}
  0xdf   : > { %s4446_s8 = scalar_lea.vmem %s440_s16, 1024  ;;  %p4454_p6 = scmp.lt.s32.totalorder %s440_s16, %s440_s16 }
  0xe0   : > { %p4447_p10 = scmp.ne.s32.totalorder %s440_s16, %s4446_s8  ;;  %p4455_p11 = scmp.lt.s32.totalorder %s4446_s8, %s4446_s8 }
  0xe2   : > { %p4449_p1 = pnand %p4447_p10, %p4435_p0  ;;  %p4456_p12 = por %p4455_p11, %p4454_p6 }
  0xe4   : > { %p4450_p4 = pneg %p4449_p1 }
  0xe6   : > { %p4457_p8 = pnand %p4456_p12, %p4450_p4 }
  0xe8   : > { %4460 = shalt.err (!%p4457_p8)
}
  0xe9   : > { %s4756_s22 = smov 128   ;;  %s4757_s10 = smov 8  }
  0xea   : > { %3943 = dma.hbm_to_vmem [thread:$0]  (!%p5146_p2), %s6150_s0, 1024, %s440_s16, [#allocation4], %s4756_s22, %s4756_s22, %s4757_s10  }
  0xeb   : > { %s4461_s13 = scalar_lea.hbm %s5154_s5, 16  ;;  %p6151_p0 = scmp.ne.s32.totalorder %s6140_s21, 0 }
  0xec   : > { %p4462_p13 = scmp.ne.s32.totalorder %s5154_s5, %s4461_s13  ;;  %s4466_s8 = scalar_lea.hbm %s6092_s2, 32 }
  0xed   : > { %p4467_p8 = scmp.lt.u32.totalorder %s5154_s5, %s6092_s2  ;;  %p4468_p12 = scmp.lt.u32.totalorder %s4466_s8, %s4461_s13 }
  0xee   : > { %p4464_p5 = pnand %p4462_p13, %p6151_p0  ;;  %p4470_p11 = scmp.lt.u32.totalorder %s4461_s13, %s5154_s5 }
  0xef   : > { %p4469_p4 = por %p4468_p12, %p4467_p8 }
  0xf0   : > { %p4465_p6 = pneg %p4464_p5 }
  0xf1   : > { %p4471_p7 = por %p4470_p11, %p4469_p4 }
  0xf3   : > { %p4472_p3 = pnand %p4471_p7, %p4465_p6 }
  0xf5   : > { %4475 = shalt.err (!%p4472_p3)
}
  0xf6   : > { %s4476_s16 = scalar_lea.vmem %s5157_s15, 16  ;;  %s4758_s25 = smov [#allocation8]  }
  0xf7   : > { %p4477_p2 = scmp.ne.s32.totalorder %s5157_s15, %s4476_s16  ;;  %s4481_s22 = sshll.u32 %s4758_s25, 4  ;;  %s4482_s22 = int_to_ptr.vmem [resolvable:$false] %s4481_s22 }
  0xf8   : > { %s4483_s7 = scalar_lea.vmem %s4482_s22, 32  ;;  %p4484_p1 = scmp.lt.s32.totalorder %s5157_s15, %s4482_s22 }
  0xf9   : > { %p4479_p9 = pnand %p4477_p2, %p6151_p0  ;;  %p4485_p13 = scmp.lt.s32.totalorder %s4483_s7, %s4476_s16 }
  0xfb   : > { %p4480_p10 = pneg %p4479_p9  ;;  %p4486_p5 = por %p4485_p13, %p4484_p1 }
  0xfd   : > { %p4487_p8 = pnand %p4486_p5, %p4480_p10 }
  0xff   : > { %4490 = shalt.err (!%p4487_p8)
}
 0x100   : > { %p6152_p6 = scmp.ne.s32.totalorder %s6139_s14, 0  ;;  %s6153_s12 = scalar_lea.sflag [#allocation7], %s4891_s17 }
 0x101   : > { %s5202_s28 = scalar_lea.hbm %s6094_s4, %s4897_s19  ;;  %s511_s13 = scalar_lea.vmem [#allocation11], %s4894_s18 }
 0x102   : > { %3950 = dma.hbm_to_vmem [thread:$0]  (!%p6152_p6), %s5154_s5, 16, %s5157_s15, %s6153_s12  }
 0x103   : > { %s518_s1 = sshll.u32 %s511_s13, 4  ;;  %s4491_s3 = scalar_lea.hbm %s5202_s28, 16  ;;  %s519_s1 = int_to_ptr.vmem [resolvable:$true] %s518_s1 }
 0x104   : > { %p4492_p12 = scmp.ne.s32.totalorder %s5202_s28, %s4491_s3  ;;  %s4496_s5 = scalar_lea.hbm %s6094_s4, 32 }
 0x105   : > { %p4497_p7 = scmp.lt.u32.totalorder %s5202_s28, %s6094_s4  ;;  %p4498_p3 = scmp.lt.u32.totalorder %s4496_s5, %s4491_s3 }
 0x106   : > { %p4494_p4 = pnand %p4492_p12, %p6151_p0  ;;  %p4500_p9 = scmp.lt.u32.totalorder %s4491_s3, %s5202_s28 }
 0x107   : > { %p4499_p2 = por %p4498_p3, %p4497_p7 }
 0x108   : > { %p4495_p11 = pneg %p4494_p4 }
 0x109   : > { %p4501_p10 = por %p4500_p9, %p4499_p2 }
 0x10b   : > { %p4502_p1 = pnand %p4501_p10, %p4495_p11 }
 0x10d   : > { %4505 = shalt.err (!%p4502_p1)
}
 0x10e   : > { %s4506_s22 = scalar_lea.vmem %s519_s1, 16  ;;  %s4759_s7 = smov [#allocation11]  }
 0x10f   : > { %p4507_p13 = scmp.ne.s32.totalorder %s519_s1, %s4506_s22  ;;  %s4511_s12 = sshll.u32 %s4759_s7, 4  ;;  %s4512_s12 = int_to_ptr.vmem [resolvable:$false] %s4511_s12 }
 0x110   : > { %s4513_s10 = scalar_lea.vmem %s4512_s12, 32  ;;  %p4514_p12 = scmp.lt.s32.totalorder %s519_s1, %s4512_s12 }
 0x111   : > { %p4509_p5 = pnand %p4507_p13, %p6151_p0  ;;  %p4515_p4 = scmp.lt.s32.totalorder %s4513_s10, %s4506_s22 }
 0x113   : > { %p4510_p8 = pneg %p4509_p5  ;;  %p4516_p6 = por %p4515_p4, %p4514_p12 }
 0x115   : > { %p4517_p3 = pnand %p4516_p6, %p4510_p8 }
 0x117   : > { %4520 = shalt.err (!%p4517_p3)
}
 0x118   : > { %p6154_p7 = scmp.ne.s32.totalorder %s6139_s14, 0  ;;  %s6155_s23 = scalar_lea.sflag [#allocation10], %s4891_s17 }
 0x119   : > { %s5228_s8 = scalar_lea.hbm %s6096_s6, %s4897_s19  ;;  %s549_s16 = scalar_lea.vmem [#allocation14], %s4894_s18 }
 0x11a   : > { %3956 = dma.hbm_to_vmem [thread:$0]  (!%p6154_p7), %s5202_s28, 16, %s519_s1, %s6155_s23  }
 0x11b   : > { %s556_s5 = sshll.u32 %s549_s16, 4  ;;  %s4521_s15 = scalar_lea.hbm %s5228_s8, 16  ;;  %s557_s5 = int_to_ptr.vmem [resolvable:$true] %s556_s5 }
 0x11c   : > { %p4522_p6 = scmp.ne.s32.totalorder %s5228_s8, %s4521_s15  ;;  %s4526_s28 = scalar_lea.hbm %s6096_s6, 32 }
 0x11d   : > { %p4527_p9 = scmp.lt.u32.totalorder %s5228_s8, %s6096_s6  ;;  %p4528_p10 = scmp.lt.u32.totalorder %s4526_s28, %s4521_s15 }
 0x11e   : > { %p4524_p11 = pnand %p4522_p6, %p6151_p0  ;;  %p4530_p13 = scmp.lt.u32.totalorder %s4521_s15, %s5228_s8 }
 0x11f   : > { %p4529_p1 = por %p4528_p10, %p4527_p9 }
 0x120   : > { %p4525_p2 = pneg %p4524_p11 }
 0x121   : > { %p4531_p5 = por %p4530_p13, %p4529_p1 }
 0x123   : > { %p4532_p8 = pnand %p4531_p5, %p4525_p2 }
 0x125   : > { %4535 = shalt.err (!%p4532_p8)
}
 0x126   : > { %s4536_s12 = scalar_lea.vmem %s557_s5, 16  ;;  %s4760_s10 = smov [#allocation14]  }
 0x127   : > { %p4537_p12 = scmp.ne.s32.totalorder %s557_s5, %s4536_s12  ;;  %s4541_s23 = sshll.u32 %s4760_s10, 4  ;;  %s4542_s23 = int_to_ptr.vmem [resolvable:$false] %s4541_s23 }
 0x128   : > { %s4543_s13 = scalar_lea.vmem %s4542_s23, 32  ;;  %p4544_p6 = scmp.lt.s32.totalorder %s557_s5, %s4542_s23 }
 0x129   : > { %p4539_p4 = pnand %p4537_p12, %p6151_p0  ;;  %p4545_p11 = scmp.lt.s32.totalorder %s4543_s13, %s4536_s12 }
 0x12b   : > { %p4540_p3 = pneg %p4539_p4  ;;  %p4546_p7 = por %p4545_p11, %p4544_p6 }
 0x12d   : > { %p4547_p9 = pnand %p4546_p7, %p4540_p3 }
 0x12f   : > { %4550 = shalt.err (!%p4547_p9)
}
 0x130   : > { %p6156_p10 = scmp.ne.s32.totalorder %s6139_s14, 0  ;;  %s6157_s3 = scalar_lea.sflag [#allocation13], %s4891_s17 }
 0x131   : > { %s6158_s25 = sld [smem:[#allocation42_spill]]  ;;  %s583_s1 = scalar_lea.vmem [#allocation17], %s4894_s18 }
 0x132   : > { %3962 = dma.hbm_to_vmem [thread:$0]  (!%p6156_p10), %s5228_s8, 16, %s557_s5, %s6157_s3  }
 0x133   : > { %s590_s7 = sshll.u32 %s583_s1, 4  ;;  %s591_s7 = int_to_ptr.vmem [resolvable:$true] %s590_s7 }
 0x137   : > { %s6159_s22 = smov %s6158_s25  ;;  %s5254_s28 = scalar_lea.hbm %s6158_s25, %s4897_s19 }
 0x138   : > { %s4551_s12 = scalar_lea.hbm %s5254_s28, 16  ;;  %s4556_s8 = scalar_lea.hbm %s6159_s22, 32 }
 0x139   : > { %p4552_p7 = scmp.ne.s32.totalorder %s5254_s28, %s4551_s12  ;;  %p4557_p13 = scmp.lt.u32.totalorder %s5254_s28, %s6159_s22 }
 0x13a   : > { %p4558_p5 = scmp.lt.u32.totalorder %s4556_s8, %s4551_s12  ;;  %p4560_p12 = scmp.lt.u32.totalorder %s4551_s12, %s5254_s28 }
 0x13b   : > { %p4554_p2 = pnand %p4552_p7, %p6151_p0 }
 0x13c   : > { %p4559_p8 = por %p4558_p5, %p4557_p13 }
 0x13d   : > { %p4555_p1 = pneg %p4554_p2 }
 0x13e   : > { %p4561_p4 = por %p4560_p12, %p4559_p8 }
 0x140   : > { %p4562_p3 = pnand %p4561_p4, %p4555_p1 }
 0x142   : > { %4565 = shalt.err (!%p4562_p3)
}
 0x143   : > { %s4566_s3 = scalar_lea.vmem %s591_s7, 16  ;;  %s4761_s16 = smov [#allocation17]  }
 0x144   : > { %p4567_p6 = scmp.ne.s32.totalorder %s591_s7, %s4566_s3  ;;  %s4571_s15 = sshll.u32 %s4761_s16, 4  ;;  %s4572_s15 = int_to_ptr.vmem [resolvable:$false] %s4571_s15 }
 0x145   : > { %s4573_s25 = scalar_lea.vmem %s4572_s15, 32  ;;  %p4574_p7 = scmp.lt.s32.totalorder %s591_s7, %s4572_s15 }
 0x146   : > { %p4569_p11 = pnand %p4567_p6, %p6151_p0  ;;  %p4575_p2 = scmp.lt.s32.totalorder %s4573_s25, %s4566_s3 }
 0x148   : > { %p4570_p9 = pneg %p4569_p11  ;;  %p4576_p10 = por %p4575_p2, %p4574_p7 }
 0x14a   : > { %p4577_p5 = pnand %p4576_p10, %p4570_p9 }
 0x14c   : > { %4580 = shalt.err (!%p4577_p5)
}
 0x14d   : > { %p6160_p13 = scmp.ne.s32.totalorder %s6139_s14, 0  ;;  %s6161_s1 = scalar_lea.sflag [#allocation16], %s4891_s17 }
 0x14e   : > { %s6162_s23 = sld [smem:[#allocation43_spill]]  ;;  %s621_s5 = scalar_lea.vmem [#allocation20], %s4894_s18 }
 0x14f   : > { %3968 = dma.hbm_to_vmem [thread:$0]  (!%p6160_p13), %s5254_s28, 16, %s591_s7, %s6161_s1  }
 0x150   : > { %s628_s13 = sshll.u32 %s621_s5, 4  ;;  %s629_s13 = int_to_ptr.vmem [resolvable:$true] %s628_s13 }
 0x154   : > { %s5280_s8 = scalar_lea.hbm %s6162_s23, %s4897_s19  ;;  %s4586_s28 = scalar_lea.hbm %s6162_s23, 32 }
 0x155   : > { %s4581_s3 = scalar_lea.hbm %s5280_s8, 16  ;;  %p4587_p12 = scmp.lt.u32.totalorder %s5280_s8, %s6162_s23 }
 0x156   : > { %p4582_p10 = scmp.ne.s32.totalorder %s5280_s8, %s4581_s3  ;;  %p4588_p4 = scmp.lt.u32.totalorder %s4586_s28, %s4581_s3 }
 0x157   : > { %p4590_p6 = scmp.lt.u32.totalorder %s4581_s3, %s5280_s8 }
 0x158   : > { %p4584_p1 = pnand %p4582_p10, %p6151_p0  ;;  %p4589_p3 = por %p4588_p4, %p4587_p12 }
 0x15a   : > { %p4585_p8 = pneg %p4584_p1  ;;  %p4591_p11 = por %p4590_p6, %p4589_p3 }
 0x15c   : > { %p4592_p9 = pnand %p4591_p11, %p4585_p8 }
 0x15e   : > { %4595 = shalt.err (!%p4592_p9)
}
 0x15f   : > { %s4596_s1 = scalar_lea.vmem %s629_s13, 16  ;;  %s4762_s12 = smov [#allocation20]  }
 0x160   : > { %p4597_p7 = scmp.ne.s32.totalorder %s629_s13, %s4596_s1  ;;  %s4601_s10 = sshll.u32 %s4762_s12, 4  ;;  %s4602_s10 = int_to_ptr.vmem [resolvable:$false] %s4601_s10 }
 0x161   : > { %s4603_s5 = scalar_lea.vmem %s4602_s10, 32  ;;  %p4604_p10 = scmp.lt.s32.totalorder %s629_s13, %s4602_s10 }
 0x162   : > { %p4599_p2 = pnand %p4597_p7, %p6151_p0  ;;  %p4605_p1 = scmp.lt.s32.totalorder %s4603_s5, %s4596_s1 }
 0x164   : > { %p4600_p5 = pneg %p4599_p2  ;;  %p4606_p13 = por %p4605_p1, %p4604_p10 }
 0x166   : > { %p4607_p4 = pnand %p4606_p13, %p4600_p5 }
 0x168   : > { %4610 = shalt.err (!%p4607_p4)
}
 0x169   : > { %p6163_p12 = scmp.ne.s32.totalorder %s6139_s14, 0  ;;  %s6164_s3 = scalar_lea.sflag [#allocation19], %s4891_s17 }
 0x16a   : > { %s6165_s28 = sld [smem:[#allocation44_spill]]  ;;  %s659_s1 = scalar_lea.vmem [#allocation23], %s4894_s18 }
 0x16b   : > { %3974 = dma.hbm_to_vmem [thread:$0]  (!%p6163_p12), %s5280_s8, 16, %s629_s13, %s6164_s3  }
 0x16c   : > { %s666_s12 = sshll.u32 %s659_s1, 4  ;;  %s667_s12 = int_to_ptr.vmem [resolvable:$true] %s666_s12 }
 0x170   : > { %s6166_s7 = smov %s6165_s28  ;;  %s5306_s25 = scalar_lea.hbm %s6165_s28, %s4897_s19 }
 0x171   : > { %s4611_s10 = scalar_lea.hbm %s5306_s25, 16  ;;  %s4616_s8 = scalar_lea.hbm %s6166_s7, 32 }
 0x172   : > { %p4612_p13 = scmp.ne.s32.totalorder %s5306_s25, %s4611_s10  ;;  %p4617_p6 = scmp.lt.u32.totalorder %s5306_s25, %s6166_s7 }
 0x173   : > { %p4618_p11 = scmp.lt.u32.totalorder %s4616_s8, %s4611_s10  ;;  %p4620_p7 = scmp.lt.u32.totalorder %s4611_s10, %s5306_s25 }
 0x174   : > { %p4614_p8 = pnand %p4612_p13, %p6151_p0 }
 0x175   : > { %p4619_p9 = por %p4618_p11, %p4617_p6 }
 0x176   : > { %p4615_p3 = pneg %p4614_p8 }
 0x177   : > { %p4621_p2 = por %p4620_p7, %p4619_p9 }
 0x179   : > { %p4622_p5 = pnand %p4621_p2, %p4615_p3 }
 0x17b   : > { %4625 = shalt.err (!%p4622_p5)
}
 0x17c   : > { %s4626_s18 = scalar_lea.vmem %s667_s12, 16  ;;  %s4763_s19 = smov [#allocation23]  }
 0x17d   : > { %p4627_p10 = scmp.ne.s32.totalorder %s667_s12, %s4626_s18  ;;  %s4631_s16 = sshll.u32 %s4763_s19, 4  ;;  %s4632_s16 = int_to_ptr.vmem [resolvable:$false] %s4631_s16 }
 0x17e   : > { %s4633_s0 = scalar_lea.vmem %s4632_s16, 32  ;;  %p4634_p13 = scmp.lt.s32.totalorder %s667_s12, %s4632_s16 }
 0x17f   : > { %p4629_p1 = pnand %p4627_p10, %p6151_p0  ;;  %p4635_p8 = scmp.lt.s32.totalorder %s4633_s0, %s4626_s18 }
 0x181   : > { %p4630_p4 = pneg %p4629_p1  ;;  %p4636_p12 = por %p4635_p8, %p4634_p13 }
 0x183   : > { %p4637_p6 = pnand %p4636_p12, %p4630_p4 }
 0x185   : > { %4640 = shalt.err (!%p4637_p6)
}
 0x186   : > { %p6167_p11 = scmp.ne.s32.totalorder %s6139_s14, 0  ;;  %s6168_s15 = scalar_lea.sflag [#allocation22], %s4891_s17 }
 0x187   : > { %p6169_p3 = scmp.ne.s32.totalorder %s6148_s27, 0 }
 0x188   : > { %3980 = dma.hbm_to_vmem [thread:$0]  (!%p6167_p11), %s5306_s25, 16, %s667_s12, %s6168_s15  }
 0x189   : > { %675 = sbr.rel (%p6169_p3) target bundleno = 4107 (0x100b), region = 72  ;;  %p6170_p0 = scmp.eq.s32.totalorder (!%p6169_p3), %s5125_s24, 0 }
 0x190   : > { %4692 = dma.done.wait (%p6170_p0), [#allocation4], 1024   ;;  %p6171_p9 = pmov %p6170_p0 }
 0x191   : > { %s5335_s21 = sand.u32 1, %s5125_s24   ;;  %s5338_s14 = sand.u32 1, %s4729_s26  }
 0x192   : > { %4694 = vsyncadd (%p6171_p9), [#allocation4], 4294966272  ;;  %s682_s17 = scalar_lea.sflag [#allocation7], %s5335_s21  ;;  %s684_s28 = scalar_lea.vmem [#allocation6], %s5338_s14 }
 0x193   : > { %p6172_p12 = scmp.ne.s32.totalorder %s6147_s20, 0 }
 0x195   : > { %4696 = dma.done.wait (%p6172_p12), %s682_s17, 32  }
 0x196   : > { %4698 = vsyncadd (%p6172_p12), %s682_s17, 4294967264  ;;  %s5347_s27 = sshll.u32 %s5338_s14, 4  ;;  %s692_s25 = scalar_lea.vmem [#allocation8], %s5338_s14 }
 0x197   : > { %s698_s1 = scalar_lea.sflag [#allocation10], %s5335_s21  ;;  %s701_s12 = scalar_lea.vmem [#allocation9], %s5347_s27 }
 0x198   : > { %4700 = dma.done.wait (%p6172_p12), %s698_s1, 272  }
 0x199   : > { %4702 = vsyncadd (%p6172_p12), %s698_s1, 4294967024  ;;  %s709_s10 = scalar_lea.vmem [#allocation11], %s5338_s14  ;;  %s715_s5 = scalar_lea.sflag [#allocation13], %s5335_s21 }
 0x19a   : > { %s718_s8 = scalar_lea.vmem [#allocation12], %s5347_s27 }
 0x19b   : > { %4704 = dma.done.wait (%p6172_p12), %s715_s5, 272  }
 0x19c   : > { %4706 = vsyncadd (%p6172_p12), %s715_s5, 4294967024  ;;  %s726_s13 = scalar_lea.vmem [#allocation14], %s5338_s14  ;;  %s732_s3 = scalar_lea.sflag [#allocation16], %s5335_s21 }
 0x19d   : > { %s734_s18 = scalar_lea.vmem [#allocation15], %s5338_s14 }
 0x19e   : > { %4708 = dma.done.wait (%p6172_p12), %s732_s3, 32  }
 0x19f   : > { %4710 = vsyncadd (%p6172_p12), %s732_s3, 4294967264  ;;  %s748_s16 = scalar_lea.sflag [#allocation19], %s5335_s21  ;;  %s751_s0 = scalar_lea.vmem [#allocation18], %s5347_s27 }
 0x1a0   : > { %4712 = dma.done.wait (%p6172_p12), %s748_s16, 272  }
 0x1a1   : > { %4714 = vsyncadd (%p6172_p12), %s748_s16, 4294967024  ;;  %s3533_s15 = sshll.u32 %s5338_s14, 6  ;;  %s759_s17 = scalar_lea.vmem [#allocation20], %s5338_s14 }
 0x1a2   : > { %s765_s1 = scalar_lea.sflag [#allocation22], %s5335_s21  ;;  %s5380_s5 = scalar_lea.vmem [#allocation21], %s3533_s15 }
 0x1a3   : > { %4716 = dma.done.wait (%p6172_p12), %s765_s1, 1040  }
 0x1a4   : > { %4718 = vsyncadd (%p6172_p12), %s765_s1, 4294966256  ;;  %s776_s3 = scalar_lea.vmem [#allocation23], %s5338_s14  ;;  %s6173_s19 = sld [smem:[#allocation34_spill]] }
 0x1aa   : > { %p3534_p7 = scmp.ne.s32.totalorder %s6173_s19, 0 }
 0x1ab   : > { %v868_v0 = vld [vmem:[#allocation3] sm:$0xff] (!%p3534_p7)  ;;  %vm876_vm0 = vcmask (!%p3534_p7), 261120   ;;  %v869_v1 = vld [vmem:[#allocation3 + $0x8] sm:$0xff] (!%p3534_p7)  ;;  %v870_v2 = vld [vmem:[#allocation3 + $0x10] sm:$0xff] (!%p3534_p7) }
 0x1ac   : > { %867 = sbr.rel (%p3534_p7) target bundleno = 435 (0x1b3), region = 128  ;;  %877 = vst.msk [vmem:[#allocation2] sm:$0xff] (!%p3534_p7), %vm876_vm0, %v868_v0  ;;  %878 = vst.msk [vmem:[#allocation2 + $0x8] sm:$0xff] (!%p3534_p7), %vm876_vm0, %v869_v1  ;;  %v871_v3 = vld [vmem:[#allocation3 + $0x18] sm:$0xff] (!%p3534_p7)  ;;  %v872_v4 = vld [vmem:[#allocation3 + $0x20] sm:$0xff] (!%p3534_p7) }
 0x1ad   : > { %879 = vst.msk [vmem:[#allocation2 + $0x10] sm:$0xff] (!%p3534_p7), %vm876_vm0, %v870_v2  ;;  %v873_v5 = vld [vmem:[#allocation3 + $0x28] sm:$0xff] (!%p3534_p7)  ;;  %880 = vst.msk [vmem:[#allocation2 + $0x18] sm:$0xff] (!%p3534_p7), %vm876_vm0, %v871_v3  ;;  %v874_v6 = vld [vmem:[#allocation3 + $0x30] sm:$0xff] (!%p3534_p7) }
 0x1ae   : > { %881 = vst.msk [vmem:[#allocation2 + $0x20] sm:$0xff] (!%p3534_p7), %vm876_vm0, %v872_v4  ;;  %882 = vst.msk [vmem:[#allocation2 + $0x28] sm:$0xff] (!%p3534_p7), %vm876_vm0, %v873_v5  ;;  %v875_v7 = vld [vmem:[#allocation3 + $0x38] sm:$0xff] (!%p3534_p7) }
 0x1af   : > { %883 = vst.msk [vmem:[#allocation2 + $0x30] sm:$0xff] (!%p3534_p7), %vm876_vm0, %v874_v6  ;;  %884 = vst.msk [vmem:[#allocation2 + $0x38] sm:$0xff] (!%p3534_p7), %vm876_vm0, %v875_v7 }
 0x1b3 PF: > { %v885_v8 = vld [vmem:[#allocation2] sm:$0xff]  ;;  %vm895_vm1 = vcmask 261120   ;;  %v886_v10 = vld [vmem:[#allocation2 + $0x8] sm:$0xff]  ;;  %vm1143_vm2 = vcmask 64512   ;;  %s4764_s20 = smov 96   ;;  %s4765_s21 = smov 64  }
 0x1b4   : > { %v887_v9 = vld [vmem:[#allocation2 + $0x10] sm:$0xff]  ;;  %v896_v11 = vsel %vm895_vm1, %v885_v8, 0.0  ;;  %v888_v13 = vld [vmem:[#allocation2 + $0x18] sm:$0xff]  ;;  %v899_v16 = vsel %vm895_vm1, %v886_v10, 0.0  ;;  %s4770_s19 = smov 112   ;;  %s4771_s16 = smov 48  }
 0x1b5   : > { %v902_v12 = vsel %vm895_vm1, %v887_v9, 0.0  ;;  %v889_v14 = vld [vmem:[#allocation2 + $0x20] sm:$0xff]  ;;  %v890_v15 = vld [vmem:[#allocation2 + $0x28] sm:$0xff]  ;;  %897 = vadd.xlane.f32.xlu0 %v896_v11  ;;  %v905_v17 = vsel %vm895_vm1, %v888_v13, 0.0  ;;  %s4772_s15 = smov 72   ;;  %s4773_s1 = smov 104  }
 0x1b6   : > { %903 = vadd.xlane.f32.xlu1 %v902_v12  ;;  %v908_v18 = vsel %vm895_vm1, %v889_v14, 0.0  ;;  %v911_v19 = vsel %vm895_vm1, %v890_v15, 0.0  ;;  %v891_v20 = vld [vmem:[#allocation2 + $0x30] sm:$0xff]  ;;  %v892_v21 = vld [vmem:[#allocation2 + $0x38] sm:$0xff]  ;;  %vm2606_vm3 = vcmask 130048   ;;  %vm2615_vm4 = vcmask 195584  }
 0x1b7   : > { %v914_v22 = vsel %vm895_vm1, %v891_v20, 0.0  ;;  %v917_v23 = vsel %vm895_vm1, %v892_v21, 0.0  ;;  %v4055_v0 = vld [vmem:[%s701_s12] sm:$0xff]   ;;  %v4056_v1 = vld [vmem:[%s701_s12 + $0x8] sm:$0xff]   ;;  %s4768_s12 = smov 56   ;;  %s6174_s27 = scalar_lea.vmem [#allocation17], %s5338_s14 }
 0x1b8   : > { %3704 = vmatprep.subr.bf16.mxu0 %v4055_v0  ;;  %s6175_s14 = sld [smem:[#allocation34_spill]] }
 0x1b9   : > { %900 = vadd.xlane.f32.xlu0 %v899_v16  ;;  %3705 = vmatpush3.bf16.msra.mxu0 %v4055_v0 }
 0x1ba   : > { %906 = vadd.xlane.f32.xlu1 %v905_v17  ;;  %3706 = vmatprep.subr.bf16.mxu0 %v4056_v1 }
 0x1bd   : > { %909 = vadd.xlane.f32.xlu0 %v908_v18  ;;  %3707 = vmatpush3.bf16.msra.mxu0 %v4056_v1 }
 0x1be   : > { %912 = vadd.xlane.f32.xlu1 %v911_v19  ;;  %p3601_p2 = scmp.ne.s32.totalorder %s6175_s14, 1 }
 0x1c1   : > { %915 = vadd.xlane.f32.xlu0 %v914_v22 }
 0x1c2   : > { %918 = vadd.xlane.f32.xlu1 %v917_v23 }
 0x242   : > { %v898_v24 = vpop.xlane.xlu0 %897 }
 0x243   : > { %v904_v25 = vpop.xlane.xlu1 %903  ;;  %v921_v26 = vmul.f32 0.03125, %v898_v24 }
 0x244   : > { %v923_v27 = vmul.f32 0.03125, %v904_v25 }
 0x245   : > { %v5396_v28 = vsub.f32 %v885_v8, %v921_v26 }
 0x246   : > { %v5398_v29 = vsub.f32 %v887_v9, %v923_v27  ;;  %v901_v30 = vpop.xlane.xlu0 %900  ;;  %v3535_v27 = vld [vmem:[%s684_s28] ss:$0 sm:$0xff]  ;;  %s4766_s28 = smov 88  }
 0x247   : > { %v907_v31 = vpop.xlane.xlu1 %906  ;;  %v922_v32 = vmul.f32 0.03125, %v901_v30  ;;  %v937_v34 = vmul.f32 %v5396_v28, %v5396_v28 }
 0x248   : > { %v924_v33 = vmul.f32 0.03125, %v907_v31  ;;  %v939_v35 = vmul.f32 %v5398_v29, %v5398_v29 }
 0x249   : > { %v5404_v36 = vsub.f32 %v886_v10, %v922_v32  ;;  %v945_v38 = vsel %vm895_vm1, %v937_v34, 0.0 }
 0x24a   : > { %v5406_v37 = vsub.f32 %v888_v13, %v924_v33  ;;  %946 = vadd.xlane.f32.xlu0 %v945_v38  ;;  %v910_v39 = vpop.xlane.xlu0 %909  ;;  %v951_v41 = vsel %vm895_vm1, %v939_v35, 0.0  ;;  %v3536_v35 = vld [vmem:[%s692_s25] ss:$0 sm:$0xff]  ;;  %s4767_s25 = smov 120  }
 0x24b   : > { %v913_v40 = vpop.xlane.xlu1 %912  ;;  %v925_v42 = vmul.f32 0.03125, %v910_v39  ;;  %v938_v44 = vmul.f32 %v5404_v36, %v5404_v36 }
 0x24c   : > { %v926_v43 = vmul.f32 0.03125, %v913_v40  ;;  %v940_v45 = vmul.f32 %v5406_v37, %v5406_v37 }
 0x24d   : > { %v5414_v46 = vsub.f32 %v889_v14, %v925_v42  ;;  %v948_v48 = vsel %vm895_vm1, %v938_v44, 0.0 }
 0x24e   : > { %v5416_v47 = vsub.f32 %v890_v15, %v926_v43  ;;  %952 = vadd.xlane.f32.xlu0 %v951_v41  ;;  %949 = vadd.xlane.f32.xlu1 %v948_v48  ;;  %v916_v49 = vpop.xlane.xlu0 %915  ;;  %v954_v51 = vsel %vm895_vm1, %v940_v45, 0.0 }
 0x24f   : > { %v919_v50 = vpop.xlane.xlu1 %918  ;;  %v927_v52 = vmul.f32 0.03125, %v916_v49  ;;  %v941_v54 = vmul.f32 %v5414_v46, %v5414_v46 }
 0x250   : > { %v928_v53 = vmul.f32 0.03125, %v919_v50  ;;  %v942_v55 = vmul.f32 %v5416_v47, %v5416_v47 }
 0x251   : > { %v5424_v56 = vsub.f32 %v891_v20, %v927_v52  ;;  %v957_v58 = vsel %vm895_vm1, %v941_v54, 0.0 }
 0x252   : > { %v5426_v57 = vsub.f32 %v892_v21, %v928_v53  ;;  %955 = vadd.xlane.f32.xlu1 %v954_v51  ;;  %958 = vadd.xlane.f32.xlu0 %v957_v58  ;;  %v960_v59 = vsel %vm895_vm1, %v942_v55, 0.0 }
 0x253   : > { %v943_v60 = vmul.f32 %v5424_v56, %v5424_v56 }
 0x254   : > { %v944_v61 = vmul.f32 %v5426_v57, %v5426_v57 }
 0x255   : > { %v963_v62 = vsel %vm895_vm1, %v943_v60, 0.0 }
 0x256   : > { %961 = vadd.xlane.f32.xlu1 %v960_v59  ;;  %964 = vadd.xlane.f32.xlu0 %v963_v62  ;;  %v966_v63 = vsel %vm895_vm1, %v944_v61, 0.0 }
 0x25a   : > { %967 = vadd.xlane.f32.xlu1 %v966_v63 }
 0x2d7   : > { %v947_v2 = vpop.xlane.xlu0 %946 }
 0x2d8   : > { %v969_v3 = vmul.f32 0.03125, %v947_v2  ;;  %v3537_v2 = vld [vmem:[%s709_s10] ss:$0 sm:$0xff]  ;;  %s4769_s10 = smov 80  }
 0x2da   : > { %v977_v4 = vadd.f32 1e-05, %v969_v3 }
 0x2db   : > { %v950_v5 = vpop.xlane.xlu1 %949  ;;  %v953_v6 = vpop.xlane.xlu0 %952 }
 0x2dc   : > { %4069 = vrsqrt.f32 %v977_v4  ;;  %v970_v7 = vmul.f32 0.03125, %v950_v5  ;;  %v971_v8 = vmul.f32 0.03125, %v953_v6 }
 0x2de   : > { %v978_v9 = vadd.f32 1e-05, %v970_v7  ;;  %v979_v10 = vadd.f32 1e-05, %v971_v8 }
 0x2df   : > { %v956_v11 = vpop.xlane.xlu1 %955  ;;  %v959_v12 = vpop.xlane.xlu0 %958 }
 0x2e0   : > { %4071 = vrsqrt.f32 %v978_v9  ;;  %v972_v13 = vmul.f32 0.03125, %v956_v11  ;;  %v973_v14 = vmul.f32 0.03125, %v959_v12 }
 0x2e1   : > { %4073 = vrsqrt.f32 %v979_v10 }
 0x2e2   : > { %v980_v15 = vadd.f32 1e-05, %v972_v13  ;;  %v981_v16 = vadd.f32 1e-05, %v973_v14 }
 0x2e3   : > { %v962_v17 = vpop.xlane.xlu1 %961  ;;  %v965_v18 = vpop.xlane.xlu0 %964 }
 0x2e4   : > { %4075 = vrsqrt.f32 %v980_v15  ;;  %v974_v19 = vmul.f32 0.03125, %v962_v17  ;;  %v975_v20 = vmul.f32 0.03125, %v965_v18 }
 0x2e5   : > { %4077 = vrsqrt.f32 %v981_v16 }
 0x2e6   : > { %v4070_v21 = vpop.eup %4069  ;;  %v982_v22 = vadd.f32 1e-05, %v974_v19  ;;  %v983_v23 = vadd.f32 1e-05, %v975_v20 }
 0x2e7   : > { %v968_v24 = vpop.xlane.xlu1 %967  ;;  %v993_v25 = vmul.f32 %v4070_v21, %v5396_v28 }
 0x2e8   : > { %4079 = vrsqrt.f32 %v982_v22  ;;  %v976_v26 = vmul.f32 0.03125, %v968_v24 }
 0x2e9   : > { %4081 = vrsqrt.f32 %v983_v23  ;;  %v1007_v34 = vmul.f32 %v3535_v27, %v993_v25 }
 0x2ea   : > { %v4072_v30 = vpop.eup %4071  ;;  %v984_v31 = vadd.f32 1e-05, %v976_v26 }
 0x2eb   : > { %v4074_v32 = vpop.eup %4073  ;;  %v994_v33 = vmul.f32 %v4072_v30, %v5404_v36  ;;  %v1021_v28 = vadd.f32 %v3536_v35, %v1007_v34 }
 0x2ec   : > { %4083 = vrsqrt.f32 %v984_v31  ;;  %v995_v38 = vmul.f32 %v4074_v32, %v5398_v29 }
 0x2ed   : > { %v1008_v39 = vmul.f32 %v3535_v27, %v994_v33 }
 0x2ee   : > { %v4076_v40 = vpop.eup %4075  ;;  %v1009_v44 = vmul.f32 %v3535_v27, %v995_v38 }
 0x2ef   : > { %v4078_v41 = vpop.eup %4077  ;;  %v1022_v42 = vadd.f32 %v3536_v35, %v1008_v39  ;;  %v996_v43 = vmul.f32 %v4076_v40, %v5406_v37 }
 0x2f0   : > { %v997_v45 = vmul.f32 %v4078_v41, %v5414_v46  ;;  %v1023_v51 = vadd.f32 %v3536_v35, %v1009_v44 }
 0x2f1   : > { %v1029_v48 = vpack.c.bf16 %v1022_v42, %v1021_v28  ;;  %v1010_v49 = vmul.f32 %v3535_v27, %v996_v43 }
 0x2f2   : > { %v4080_v50 = vpop.eup %4079  ;;  %v1011_v53 = vmul.f32 %v3535_v27, %v997_v45 }
 0x2f3   : > { %v4082_v36 = vpop.eup %4081  ;;  %3708 = vmatprep.mubr.msk.bf16.mxu0 %vm895_vm1, %v1029_v48  ;;  %v1024_v52 = vadd.f32 %v3536_v35, %v1010_v49  ;;  %v998_v29 = vmul.f32 %v4080_v50, %v5416_v47 }
 0x2f4   : > { %v999_v54 = vmul.f32 %v4082_v36, %v5424_v56  ;;  %v1025_v46 = vadd.f32 %v3536_v35, %v1011_v53 }
 0x2f5   : > { %v1030_v55 = vpack.c.bf16 %v1024_v52, %v1023_v51  ;;  %v1012_v58 = vmul.f32 %v3535_v27, %v998_v29 }
 0x2f6   : > { %v4084_v37 = vpop.eup %4083  ;;  %v1013_v61 = vmul.f32 %v3535_v27, %v999_v54 }
 0x2f7   : > { %3709 = vmatmul.mubr.msk.bf16.vlgmr.msra.gmra.mrb[0].mxu0 %vm895_vm1, %v1030_v55  ;;  %v1026_v59 = vadd.f32 %v3536_v35, %v1012_v58  ;;  %v1000_v60 = vmul.f32 %v4084_v37, %v5426_v57 }
 0x2f8   : > { %v1027_v0 = vadd.f32 %v3536_v35, %v1013_v61 }
 0x2f9   : > { %v1031_v62 = vpack.c.bf16 %v1026_v59, %v1025_v46  ;;  %v1014_v63 = vmul.f32 %v3535_v27, %v1000_v60 }
 0x2fb   : > { %3712 = vmatprep.mubr.msk.bf16.mxu0 %vm895_vm1, %v1031_v62  ;;  %v1028_v47 = vadd.f32 %v3536_v35, %v1014_v63 }
 0x2fd   : > { %v1032_v1 = vpack.c.bf16 %v1028_v47, %v1027_v0 }
 0x2ff   : > { %3713 = vmatmul.mubr.msk.bf16.gmra.mrb[4].mxu0 %vm895_vm1, %v1032_v1 }
 0x3ca   : > { %v3710_v56 = vpop.f32.mrb[0].mxu0 }
 0x3cb   : > { %v1102_v3 = vpop.f32.mrb[1].mxu0  ;;  %v1111_v5 = vadd.f32 %v3710_v56, %v3537_v2 }
 0x3cc   : > { %v3711_v4 = vpop.f32.mrb[2].mxu0  ;;  %v1103_v8 = vadd.f32 %v3537_v2, %v1102_v3 }
 0x3cd   : > { %v1114_v6 = vadd.f32 %v3711_v4, %v3537_v2  ;;  %v1105_v7 = vpop.f32.mrb[3].mxu0 }
 0x3ce   : > { %v1106_v57 = vadd.f32 %v3537_v2, %v1105_v7 }
 0x3cf   : > { %v5458_v9 = vpack.c.bf16 %v1114_v6, %v1111_v5 }
 0x3d0   : > { %v5460_v10 = vpack.c.bf16 %v1106_v57, %v1103_v8 }
 0x3d1   : > { %1141 = vrot.lane.b32.xlu1 %v5458_v9, %s4764_s20 }
 0x3d2   : > { %1139 = vrot.lane.b32.xlu0 %v5460_v10, %s4764_s20  ;;  %v3714_v11 = vpop.f32.mrb[4].mxu0  ;;  %3720 = vmatprep.mubr.msk.bf16.mxu0 %vm1143_vm2, %v5460_v10 }
 0x3d3   : > { %v1118_v12 = vpop.f32.mrb[5].mxu0  ;;  %v1127_v14 = vadd.f32 %v3714_v11, %v3537_v2 }
 0x3d4   : > { %v3715_v13 = vpop.f32.mrb[6].mxu0  ;;  %v1119_v17 = vadd.f32 %v3537_v2, %v1118_v12 }
 0x3d5   : > { %v1130_v15 = vadd.f32 %v3715_v13, %v3537_v2  ;;  %v1121_v16 = vpop.f32.mrb[7].mxu0 }
 0x3d6   : > { %v1122_v18 = vadd.f32 %v3537_v2, %v1121_v16  ;;  %1348 = vrot.lane.b32.xlu0 %v5460_v10, %s4765_s21 }
 0x3d7   : > { %v5467_v19 = vpack.c.bf16 %v1130_v15, %v1127_v14 }
 0x3d8   : > { %v5469_v20 = vpack.c.bf16 %v1122_v18, %v1119_v17 }
 0x3da   : > { %1494 = vrot.lane.b32.xlu0 %v5460_v10, %s4766_s28  ;;  %1207 = vrot.lane.b32.xlu1 %v5469_v20, %s4764_s20 }
 0x3de   : > { %1209 = vrot.lane.b32.xlu1 %v5467_v19, %s4764_s20  ;;  %s4774_s20 = smov 40  }
 0x3e2   : > { %1350 = vrot.lane.b32.xlu1 %v5458_v9, %s4765_s21 }
 0x3e6   : > { %1411 = vrot.lane.b32.xlu1 %v5467_v19, %s4765_s21 }
 0x3ea   : > { %1496 = vrot.lane.b32.xlu1 %v5458_v9, %s4766_s28 }
 0x3ee   : > { %1409 = vrot.lane.b32.xlu1 %v5469_v20, %s4765_s21  ;;  %s4775_s21 = smov 8  }
 0x443   : > { %v1142_v23 = vpop.permute.xlu1 %1141 }
 0x444   : > { %v1140_v21 = vpop.permute.xlu0 %1139  ;;  %v1154_v26 = vsel %vm1143_vm2, %v1142_v23, 0 }
 0x445   : > { %3892 = vmatprep.subr.msk.bf16.mxu0 %vm1143_vm2, %v1140_v21  ;;  %v1151_v22 = vsel %vm1143_vm2, %v1140_v21, 0 }
 0x446   : > { %3717 = vmatpush3.bf16.xpose.msra.mxu0 %v1151_v22 }
 0x447   : > { %3893 = vmatprep.subr.msk.bf16.mxu0 %vm1143_vm2, %v1142_v23 }
 0x448   : > { %v1349_v24 = vpop.permute.xlu0 %1348 }
 0x449   : > { %3732 = vmatprep.subr.bf16.mxu1 %v1349_v24 }
 0x44a   : > { %3733 = vmatpush3.bf16.msra.mxu1 %v1349_v24 }
 0x44c   : > { %v1208_v25 = vpop.permute.xlu1 %1207  ;;  %v5490_v32 = vpop.permute.xlu0 %1494 }
 0x44d   : > { %v1218_v31 = vsel %vm1143_vm2, %v1208_v25, 0  ;;  %v1505_v23 = vsel %vm1143_vm2, %v5490_v32, 0 }
 0x44e   : > { %3719 = vmatpush3.bf16.xpose.msra.mxu0 %v1154_v26 }
 0x44f   : > { %3894 = vmatprep.subr.msk.bf16.mxu0 %vm1143_vm2, %v1208_v25 }
 0x450   : > { %v1210_v27 = vpop.permute.xlu1 %1209 }
 0x451   : > { %v1221_v35 = vsel %vm1143_vm2, %v1210_v27, 0 }
 0x454   : > { %v1351_v30 = vpop.permute.xlu1 %1350 }
 0x455   : > { %3721 = vmatmul.mubr.msk.bf16.vlgmr.msra.gmra.mrb[8].mxu0 %vm1143_vm2, %v5458_v9  ;;  %3734 = vmatprep.subr.bf16.mxu1 %v1351_v30 }
 0x456   : > { %3725 = vmatpush3.bf16.xpose.msra.mxu0 %v1218_v31  ;;  %3728 = vmatprep.mubr.msk.bf16.mxu0 %vm1143_vm2, %v5469_v20 }
 0x457   : > { %3735 = vmatpush3.bf16.msra.mxu1 %v1351_v30  ;;  %3895 = vmatprep.subr.msk.bf16.mxu0 %vm1143_vm2, %v1210_v27 }
 0x458   : > { %3896 = vmatprep.subr.msk.bf16.mxu1 %vm1143_vm2, %v5490_v32  ;;  %v1412_v33 = vpop.permute.xlu1 %1411 }
 0x45c   : > { %v5495_v34 = vpop.permute.xlu1 %1496 }
 0x45d   : > { %v1508_v31 = vsel %vm1143_vm2, %v5495_v34, 0 }
 0x45e   : > { %3727 = vmatpush3.bf16.xpose.msra.mxu0 %v1221_v35 }
 0x460   : > { %v1410_v38 = vpop.permute.xlu1 %1409 }
 0x461   : > { %3740 = vmatprep.subr.bf16.mxu0 %v1410_v38 }
 0x465   : > { %3729 = vmatmul.mubr.msk.bf16.vlgmr.msra.gmra.mrb[12].mxu0 %vm1143_vm2, %v5467_v19 }
 0x466   : > { %3741 = vmatpush3.bf16.msra.mxu0 %v1410_v38 }
 0x467   : > { %3742 = vmatprep.subr.bf16.mxu0 %v1412_v33 }
 0x46a   : > { %3743 = vmatpush3.bf16.msra.mxu0 %v1412_v33 }
 0x528   : > { %v3722_v39 = vpop.f32.mrb[8].mxu0 }
 0x529   : > { %v1190_v40 = vpop.f32.mrb[9].mxu0  ;;  %v1278_v41 = vsel %vm895_vm1, %v3722_v39, -inf }
 0x52a   : > { %1279 = vmax.xlane.f32.xlu0 %v1278_v41  ;;  %v3723_v28 = vpop.f32.mrb[10].mxu0  ;;  %v1272_v44 = vsel %vm895_vm1, %v1190_v40, -inf }
 0x52b   : > { %v1193_v42 = vpop.f32.mrb[11].mxu0  ;;  %v1281_v45 = vsel %vm895_vm1, %v3723_v28, -inf }
 0x52c   : > { %v1275_v43 = vsel %vm895_vm1, %v1193_v42, -inf }
 0x52d   : > { %1276 = vmax.xlane.f32.xlu1 %v1275_v43 }
 0x52e   : > { %1273 = vmax.xlane.f32.xlu0 %v1272_v44 }
 0x532   : > { %1282 = vmax.xlane.f32.xlu0 %v1281_v45 }
 0x538   : > { %v3730_v48 = vpop.f32.mrb[12].mxu0 }
 0x539   : > { %v1257_v49 = vpop.f32.mrb[13].mxu0  ;;  %v1290_v50 = vsel %vm895_vm1, %v3730_v48, -inf }
 0x53a   : > { %1291 = vmax.xlane.f32.xlu0 %v1290_v50  ;;  %v3731_v36 = vpop.f32.mrb[14].mxu0  ;;  %v1284_v29 = vsel %vm895_vm1, %v1257_v49, -inf }
 0x53b   : > { %v1260_v51 = vpop.f32.mrb[15].mxu0  ;;  %v1293_v52 = vsel %vm895_vm1, %v3731_v36, -inf }
 0x53c   : > { %1294 = vmax.xlane.f32.xlu1 %v1293_v52  ;;  %v1287_v53 = vsel %vm895_vm1, %v1260_v51, -inf }
 0x53e   : > { %1285 = vmax.xlane.f32.xlu0 %v1284_v29 }
 0x540   : > { %1288 = vmax.xlane.f32.xlu1 %v1287_v53 }
 0x551   : > { %1490 = vrot.lane.b32.xlu1 %v5460_v10, %s4767_s25 }
 0x554   : > { %1563 = vrot.lane.b32.xlu0 %v5469_v20, %s4766_s28 }
 0x555   : > { %1565 = vrot.lane.b32.xlu1 %v5467_v19, %s4766_s28  ;;  %s4776_s28 = smov 16  }
 0x558   : > { %1492 = vrot.lane.b32.xlu0 %v5458_v9, %s4767_s25 }
 0x559   : > { %1561 = vrot.lane.b32.xlu1 %v5467_v19, %s4767_s25 }
 0x55c   : > { %1559 = vrot.lane.b32.xlu0 %v5469_v20, %s4767_s25 }
 0x55d   : > { %1706 = vrot.lane.b32.xlu1 %v5458_v9, %s4768_s12 }
 0x560   : > { %1704 = vrot.lane.b32.xlu0 %v5460_v10, %s4768_s12 }
 0x561   : > { %1765 = vrot.lane.b32.xlu1 %v5469_v20, %s4768_s12 }
 0x564   : > { %1850 = vrot.lane.b32.xlu0 %v5460_v10, %s4769_s10 }
 0x565   : > { %1767 = vrot.lane.b32.xlu1 %v5467_v19, %s4768_s12 }
 0x569   : > { %1852 = vrot.lane.b32.xlu1 %v5458_v9, %s4769_s10 }
 0x5b7   : > { %v1280_v54 = vpop.xlane.xlu0 %1279 }
 0x5b8   : > { %v1298_v58 = vsub.f32 %v3722_v39, %v1280_v54 }
 0x5ba   : > { %v1277_v55 = vpop.xlane.xlu1 %1276  ;;  %v1308_v62 = vmul.f32 1.442695, %v1298_v58 }
 0x5bb   : > { %v1297_v37 = vsub.f32 %v1193_v42, %v1277_v55  ;;  %v1274_v46 = vpop.xlane.xlu0 %1273 }
 0x5bc   : > { %v1296_v59 = vsub.f32 %v1190_v40, %v1274_v46 }
 0x5bd   : > { %v1306_v60 = vmul.f32 1.442695, %v1297_v37 }
 0x5be   : > { %v1304_v61 = vmul.f32 1.442695, %v1296_v59 }
 0x5bf   : > { %4085 = vpow2.f32 %v1306_v60  ;;  %v1283_v63 = vpop.xlane.xlu0 %1282 }
 0x5c0   : > { %4087 = vpow2.f32 %v1304_v61  ;;  %v1299_v0 = vsub.f32 %v3723_v28, %v1283_v63 }
 0x5c1   : > { %4089 = vpow2.f32 %v1308_v62 }
 0x5c2   : > { %v1310_v47 = vmul.f32 1.442695, %v1299_v0 }
 0x5c4   : > { %4091 = vpow2.f32 %v1310_v47 }
 0x5c7   : > { %v1292_v1 = vpop.xlane.xlu0 %1291 }
 0x5c8   : > { %v1302_v56 = vsub.f32 %v3730_v48, %v1292_v1 }
 0x5c9   : > { %v5524_v2 = vpop.eup %4085  ;;  %v1295_v3 = vpop.xlane.xlu1 %1294 }
 0x5ca   : > { %v5526_v4 = vpop.eup %4087  ;;  %v1316_v5 = vmul.f32 1.442695, %v1302_v56  ;;  %v1303_v6 = vsub.f32 %v3731_v36, %v1295_v3 }
 0x5cb   : > { %v1286_v7 = vpop.xlane.xlu0 %1285  ;;  %v1344_v8 = vpack.c.bf16 %v5524_v2, %v5526_v4  ;;  %v5530_v12 = vpop.eup %4089 }
 0x5cc   : > { %v1318_v57 = vmul.f32 1.442695, %v1303_v6  ;;  %v1300_v11 = vsub.f32 %v1257_v49, %v1286_v7  ;;  %4093 = vpow2.f32 %v1316_v5 }
 0x5cd   : > { %v1289_v13 = vpop.xlane.xlu1 %1288  ;;  %3736 = vmatprep.mubr.msk.bf16.mxu1 %vm895_vm1, %v1344_v8 }
 0x5ce   : > { %v5533_v14 = vpop.eup %4091  ;;  %4095 = vpow2.f32 %v1318_v57  ;;  %v1312_v15 = vmul.f32 1.442695, %v1300_v11  ;;  %v1301_v16 = vsub.f32 %v1260_v51, %v1289_v13 }
 0x5cf   : > { %v1564_v17 = vpop.permute.xlu0 %1563  ;;  %v1345_v18 = vpack.c.bf16 %v5533_v14, %v5530_v12 }
 0x5d0   : > { %v1314_v21 = vmul.f32 1.442695, %v1301_v16  ;;  %3898 = vmatprep.subr.msk.bf16.mxu0 %vm1143_vm2, %v1564_v17  ;;  %4097 = vpow2.f32 %v1312_v15 }
 0x5d1   : > { %v1491_v22 = vpop.permute.xlu1 %1490  ;;  %3737 = vmatmul.mubr.msk.bf16.vlgmr.msra.gmra.mrb[0].mxu1 %vm895_vm1, %v1345_v18 }
 0x5d2   : > { %4099 = vpow2.f32 %v1314_v21  ;;  %3749 = vmatpush3.bf16.xpose.msra.mxu1 %v1505_v23  ;;  %3752 = vmatprep.mubr.msk.bf16.mxu1 %vm1143_vm2, %v1491_v22 }
 0x5d3   : > { %3897 = vmatprep.subr.msk.bf16.mxu1 %vm1143_vm2, %v5495_v34  ;;  %v1493_v24 = vpop.permute.xlu0 %1492  ;;  %v1574_v34 = vsel %vm1143_vm2, %v1564_v17, 0 }
 0x5d5   : > { %v1566_v26 = vpop.permute.xlu1 %1565 }
 0x5d6   : > { %v5544_v25 = vpop.eup %4093  ;;  %v1577_v42 = vsel %vm1143_vm2, %v1566_v26, 0 }
 0x5d7   : > { %v1560_v27 = vpop.permute.xlu0 %1559 }
 0x5d8   : > { %v5546_v30 = vpop.eup %4095 }
 0x5d9   : > { %v1347_v32 = vpack.c.bf16 %v5546_v30, %v5544_v25  ;;  %v1562_v39 = vpop.permute.xlu1 %1561 }
 0x5da   : > { %3751 = vmatpush3.bf16.xpose.msra.mxu1 %v1508_v31  ;;  %v5552_v33 = vpop.eup %4097 }
 0x5db   : > { %v1705_v35 = vpop.permute.xlu0 %1704 }
 0x5dc   : > { %v5554_v38 = vpop.eup %4099  ;;  %3764 = vmatprep.subr.bf16.mxu1 %v1705_v35 }
 0x5dd   : > { %v1346_v40 = vpack.c.bf16 %v5554_v38, %v5552_v33  ;;  %v1707_v41 = vpop.permute.xlu1 %1706 }
 0x5df   : > { %3744 = vmatprep.mubr.msk.bf16.mxu0 %vm895_vm1, %v1346_v40  ;;  %v5564_v28 = vpop.permute.xlu0 %1850 }
 0x5e0   : > { %3745 = vmatmul.mubr.msk.bf16.vlgmr.msra.gmra.mrb[16].mxu0 %vm895_vm1, %v1347_v32 }
 0x5e1   : > { %3753 = vmatmul.mubr.msk.bf16.vlgmr.msra.gmra.mrb[4].mxu1 %vm1143_vm2, %v1493_v24  ;;  %3757 = vmatpush3.bf16.xpose.msra.mxu0 %v1574_v34  ;;  %v1766_v43 = vpop.permute.xlu1 %1765 }
 0x5e2   : > { %3899 = vmatprep.subr.msk.bf16.mxu0 %vm1143_vm2, %v1566_v26  ;;  %3760 = vmatprep.mubr.msk.bf16.mxu0 %vm1143_vm2, %v1560_v27 }
 0x5e3   : > { %3765 = vmatpush3.bf16.msra.mxu1 %v1705_v35 }
 0x5e4   : > { %3766 = vmatprep.subr.bf16.mxu1 %v1707_v41 }
 0x5e5   : > { %v1768_v44 = vpop.permute.xlu1 %1767 }
 0x5e7   : > { %3767 = vmatpush3.bf16.msra.mxu1 %v1707_v41 }
 0x5e8   : > { %3900 = vmatprep.subr.msk.bf16.mxu1 %vm1143_vm2, %v5564_v28 }
 0x5e9   : > { %3759 = vmatpush3.bf16.xpose.msra.mxu0 %v1577_v42  ;;  %v1853_v5 = vpop.permute.xlu1 %1852 }
 0x5ea   : > { %3772 = vmatprep.subr.bf16.mxu0 %v1766_v43 }
 0x5f0   : > { %3761 = vmatmul.mubr.msk.bf16.vlgmr.msra.gmra.mrb[20].mxu0 %vm1143_vm2, %v1562_v39 }
 0x5f1   : > { %3773 = vmatpush3.bf16.msra.mxu0 %v1766_v43 }
 0x5f2   : > { %3774 = vmatprep.subr.bf16.mxu0 %v1768_v44 }
 0x5f5   : > { %3775 = vmatpush3.bf16.msra.mxu0 %v1768_v44 }
 0x6a4   : > { %v5570_v45 = vpop.f32.mrb[0].mxu1 }
 0x6a5   : > { %v5572_v48 = vpop.f32.mrb[1].mxu1 }
 0x6a6   : > { %v5574_v49 = vpop.f32.mrb[2].mxu1 }
 0x6a7   : > { %v5576_v50 = vpop.f32.mrb[3].mxu1 }
 0x6b3   : > { %v5578_v36 = vpop.f32.mrb[16].mxu0 }
 0x6b4   : > { %v3754_v51 = vpop.f32.mrb[4].mxu1  ;;  %v5580_v52 = vpop.f32.mrb[17].mxu0 }
 0x6b5   : > { %v1544_v29 = vpop.f32.mrb[5].mxu1  ;;  %v5582_v53 = vpop.f32.mrb[18].mxu0  ;;  %v1634_v54 = vsel %vm895_vm1, %v3754_v51, -inf }
 0x6b6   : > { %1635 = vmax.xlane.f32.xlu0 %v1634_v54  ;;  %v3755_v55 = vpop.f32.mrb[6].mxu1  ;;  %v5585_v58 = vpop.f32.mrb[19].mxu0  ;;  %v1628_v59 = vsel %vm895_vm1, %v1544_v29, -inf }
 0x6b7   : > { %v1547_v37 = vpop.f32.mrb[7].mxu1  ;;  %v1637_v60 = vsel %vm895_vm1, %v3755_v55, -inf }
 0x6b8   : > { %v1631_v46 = vsel %vm895_vm1, %v1547_v37, -inf }
 0x6b9   : > { %1632 = vmax.xlane.f32.xlu1 %v1631_v46 }
 0x6ba   : > { %1629 = vmax.xlane.f32.xlu0 %v1628_v59  ;;  %v1861_v59 = vsel %vm1143_vm2, %v5564_v28, 0 }
 0x6be   : > { %1638 = vmax.xlane.f32.xlu0 %v1637_v60 }
 0x6c3   : > { %v3762_v61 = vpop.f32.mrb[20].mxu0 }
 0x6c4   : > { %v1613_v62 = vpop.f32.mrb[21].mxu0  ;;  %v1646_v63 = vsel %vm895_vm1, %v3762_v61, -inf }
 0x6c5   : > { %1647 = vmax.xlane.f32.xlu0 %v1646_v63  ;;  %v3763_v0 = vpop.f32.mrb[22].mxu0  ;;  %v1640_v56 = vsel %vm895_vm1, %v1613_v62, -inf }
 0x6c6   : > { %v1616_v47 = vpop.f32.mrb[23].mxu0  ;;  %v1649_v1 = vsel %vm895_vm1, %v3763_v0, -inf }
 0x6c7   : > { %1650 = vmax.xlane.f32.xlu1 %v1649_v1  ;;  %v1643_v3 = vsel %vm895_vm1, %v1616_v47, -inf  ;;  %v1864_v1 = vsel %vm1143_vm2, %v1853_v5, 0 }
 0x6c9   : > { %1641 = vmax.xlane.f32.xlu0 %v1640_v56 }
 0x6cb   : > { %1644 = vmax.xlane.f32.xlu1 %v1643_v3 }
 0x6dc   : > { %1846 = vrot.lane.b32.xlu1 %v5460_v10, %s4770_s19 }
 0x6df   : > { %1919 = vrot.lane.b32.xlu0 %v5469_v20, %s4769_s10 }
 0x6e0   : > { %1921 = vrot.lane.b32.xlu1 %v5467_v19, %s4769_s10 }
 0x6e3   : > { %1848 = vrot.lane.b32.xlu0 %v5458_v9, %s4770_s19 }
 0x6e4   : > { %1917 = vrot.lane.b32.xlu1 %v5467_v19, %s4770_s19 }
 0x6e7   : > { %1915 = vrot.lane.b32.xlu0 %v5469_v20, %s4770_s19 }
 0x6e8   : > { %2062 = vrot.lane.b32.xlu1 %v5458_v9, %s4771_s16 }
 0x6eb   : > { %2060 = vrot.lane.b32.xlu0 %v5460_v10, %s4771_s16 }
 0x6ec   : > { %2121 = vrot.lane.b32.xlu1 %v5469_v20, %s4771_s16 }
 0x6ef   : > { %2206 = vrot.lane.b32.xlu0 %v5460_v10, %s4772_s15 }
 0x6f0   : > { %2123 = vrot.lane.b32.xlu1 %v5467_v19, %s4771_s16 }
 0x6f4   : > { %2208 = vrot.lane.b32.xlu1 %v5458_v9, %s4772_s15 }
 0x743   : > { %v1636_v6 = vpop.xlane.xlu0 %1635 }
 0x744   : > { %v1654_v8 = vsub.f32 %v3754_v51, %v1636_v6 }
 0x746   : > { %v1633_v7 = vpop.xlane.xlu1 %1632  ;;  %v1664_v17 = vmul.f32 1.442695, %v1654_v8 }
 0x747   : > { %v1653_v57 = vsub.f32 %v1547_v37, %v1633_v7  ;;  %v1630_v11 = vpop.xlane.xlu0 %1629 }
 0x748   : > { %v1652_v13 = vsub.f32 %v1544_v29, %v1630_v11 }
 0x749   : > { %v1662_v15 = vmul.f32 1.442695, %v1653_v57 }
 0x74a   : > { %v1660_v16 = vmul.f32 1.442695, %v1652_v13 }
 0x74b   : > { %4101 = vpow2.f32 %v1662_v15  ;;  %v1639_v18 = vpop.xlane.xlu0 %1638 }
 0x74c   : > { %4103 = vpow2.f32 %v1660_v16  ;;  %v1655_v21 = vsub.f32 %v3755_v55, %v1639_v18 }
 0x74d   : > { %4105 = vpow2.f32 %v1664_v17 }
 0x74e   : > { %v1666_v22 = vmul.f32 1.442695, %v1655_v21 }
 0x750   : > { %4107 = vpow2.f32 %v1666_v22 }
 0x752   : > { %v1648_v23 = vpop.xlane.xlu0 %1647 }
 0x753   : > { %v1658_v24 = vsub.f32 %v3762_v61, %v1648_v23 }
 0x754   : > { %v1651_v26 = vpop.xlane.xlu1 %1650 }
 0x755   : > { %v5610_v27 = vpop.eup %4101  ;;  %v1672_v31 = vmul.f32 1.442695, %v1658_v24  ;;  %v1659_v32 = vsub.f32 %v3763_v0, %v1651_v26 }
 0x756   : > { %v5612_v35 = vpop.eup %4103  ;;  %v1642_v39 = vpop.xlane.xlu0 %1641 }
 0x757   : > { %v1674_v40 = vmul.f32 1.442695, %v1659_v32  ;;  %v1656_v34 = vsub.f32 %v1613_v62, %v1642_v39  ;;  %v1700_v41 = vpack.c.bf16 %v5610_v27, %v5612_v35  ;;  %4109 = vpow2.f32 %v1672_v31  ;;  %v5616_v43 = vpop.eup %4105 }
 0x758   : > { %v1645_v42 = vpop.xlane.xlu1 %1644 }
 0x759   : > { %4111 = vpow2.f32 %v1674_v40  ;;  %v1668_v44 = vmul.f32 1.442695, %v1656_v34  ;;  %v1657_v51 = vsub.f32 %v1616_v47, %v1645_v42  ;;  %3768 = vmatprep.mubr.msk.bf16.mxu1 %vm895_vm1, %v1700_v41 }
 0x75a   : > { %v5619_v29 = vpop.eup %4107  ;;  %v1920_v54 = vpop.permute.xlu0 %1919 }
 0x75b   : > { %v1670_v55 = vmul.f32 1.442695, %v1657_v51  ;;  %3902 = vmatprep.subr.msk.bf16.mxu0 %vm1143_vm2, %v1920_v54  ;;  %v1701_v37 = vpack.c.bf16 %v5619_v29, %v5616_v43  ;;  %4113 = vpow2.f32 %v1668_v44  ;;  %v1930_v8 = vsel %vm1143_vm2, %v1920_v54, 0 }
 0x75c   : > { %v1847_v46 = vpop.permute.xlu1 %1846 }
 0x75d   : > { %4115 = vpow2.f32 %v1670_v55  ;;  %3769 = vmatmul.mubr.msk.bf16.vlgmr.msra.gmra.mrb[8].mxu1 %vm895_vm1, %v1701_v37 }
 0x75e   : > { %3781 = vmatpush3.bf16.xpose.msra.mxu1 %v1861_v59  ;;  %3784 = vmatprep.mubr.msk.bf16.mxu1 %vm1143_vm2, %v1847_v46  ;;  %v1849_v60 = vpop.permute.xlu0 %1848 }
 0x75f   : > { %3901 = vmatprep.subr.msk.bf16.mxu1 %vm1143_vm2, %v1853_v5 }
 0x760   : > { %v1922_v62 = vpop.permute.xlu1 %1921 }
 0x761   : > { %v5629_v61 = vpop.eup %4109  ;;  %v1933_v11 = vsel %vm1143_vm2, %v1922_v62, 0 }
 0x762   : > { %v1916_v63 = vpop.permute.xlu0 %1915 }
 0x763   : > { %v5631_v0 = vpop.eup %4111 }
 0x764   : > { %v1703_v47 = vpack.c.bf16 %v5631_v0, %v5629_v61  ;;  %v1918_v6 = vpop.permute.xlu1 %1917 }
 0x765   : > { %v5636_v56 = vpop.eup %4113 }
 0x766   : > { %3783 = vmatpush3.bf16.xpose.msra.mxu1 %v1864_v1  ;;  %v2061_v28 = vpop.permute.xlu0 %2060 }
 0x767   : > { %v5638_v3 = vpop.eup %4115  ;;  %3796 = vmatprep.subr.bf16.mxu1 %v2061_v28 }
 0x768   : > { %v1702_v7 = vpack.c.bf16 %v5638_v3, %v5636_v56  ;;  %v2063_v5 = vpop.permute.xlu1 %2062 }
 0x76a   : > { %3776 = vmatprep.mubr.msk.bf16.mxu0 %vm895_vm1, %v1702_v7  ;;  %v5648_v57 = vpop.permute.xlu0 %2206 }
 0x76b   : > { %3777 = vmatmul.mubr.msk.bf16.vlgmr.msra.gmra.mrb[24].mxu0 %vm895_vm1, %v1703_v47 }
 0x76c   : > { %3789 = vmatpush3.bf16.xpose.msra.mxu0 %v1930_v8  ;;  %3792 = vmatprep.mubr.msk.bf16.mxu0 %vm1143_vm2, %v1916_v63  ;;  %v2122_v13 = vpop.permute.xlu1 %2121 }
 0x76d   : > { %3785 = vmatmul.mubr.msk.bf16.vlgmr.msra.gmra.mrb[12].mxu1 %vm1143_vm2, %v1849_v60  ;;  %3903 = vmatprep.subr.msk.bf16.mxu0 %vm1143_vm2, %v1922_v62 }
 0x76e   : > { %3797 = vmatpush3.bf16.msra.mxu1 %v2061_v28 }
 0x76f   : > { %3798 = vmatprep.subr.bf16.mxu1 %v2063_v5 }
 0x770   : > { %v2124_v15 = vpop.permute.xlu1 %2123 }
 0x772   : > { %3799 = vmatpush3.bf16.msra.mxu1 %v2063_v5 }
 0x773   : > { %3904 = vmatprep.subr.msk.bf16.mxu1 %vm1143_vm2, %v5648_v57 }
 0x774   : > { %3791 = vmatpush3.bf16.xpose.msra.mxu0 %v1933_v11  ;;  %v2209_v63 = vpop.permute.xlu1 %2208 }
 0x775   : > { %3804 = vmatprep.subr.bf16.mxu0 %v2122_v13 }
 0x77b   : > { %3793 = vmatmul.mubr.msk.bf16.vlgmr.msra.gmra.mrb[28].mxu0 %vm1143_vm2, %v1918_v6 }
 0x77c   : > { %3805 = vmatpush3.bf16.msra.mxu0 %v2122_v13 }
 0x77d   : > { %3806 = vmatprep.subr.bf16.mxu0 %v2124_v15 }
 0x780   : > { %3807 = vmatpush3.bf16.msra.mxu0 %v2124_v15 }
 0x830   : > { %v5654_v16 = vpop.f32.mrb[8].mxu1 }
 0x831   : > { %v5656_v17 = vpop.f32.mrb[9].mxu1 }
 0x832   : > { %v5658_v18 = vpop.f32.mrb[10].mxu1 }
 0x833   : > { %v5660_v21 = vpop.f32.mrb[11].mxu1 }
 0x83e   : > { %v5662_v22 = vpop.f32.mrb[24].mxu0 }
 0x83f   : > { %v5664_v23 = vpop.f32.mrb[25].mxu0 }
 0x840   : > { %v3786_v24 = vpop.f32.mrb[12].mxu1  ;;  %v5666_v26 = vpop.f32.mrb[26].mxu0 }
 0x841   : > { %v1900_v31 = vpop.f32.mrb[13].mxu1  ;;  %v5668_v32 = vpop.f32.mrb[27].mxu0  ;;  %v1990_v39 = vsel %vm895_vm1, %v3786_v24, -inf }
 0x842   : > { %1991 = vmax.xlane.f32.xlu0 %v1990_v39  ;;  %v3787_v40 = vpop.f32.mrb[14].mxu1  ;;  %v1984_v42 = vsel %vm895_vm1, %v1900_v31, -inf }
 0x843   : > { %v1903_v34 = vpop.f32.mrb[15].mxu1  ;;  %v1993_v44 = vsel %vm895_vm1, %v3787_v40, -inf }
 0x844   : > { %v1987_v41 = vsel %vm895_vm1, %v1903_v34, -inf }
 0x845   : > { %1988 = vmax.xlane.f32.xlu1 %v1987_v41 }
 0x846   : > { %1985 = vmax.xlane.f32.xlu0 %v1984_v42 }
 0x84a   : > { %1994 = vmax.xlane.f32.xlu0 %v1993_v44 }
 0x84e   : > { %v3794_v51 = vpop.f32.mrb[28].mxu0 }
 0x84f   : > { %v1969_v54 = vpop.f32.mrb[29].mxu0  ;;  %v2002_v55 = vsel %vm895_vm1, %v3794_v51, -inf }
 0x850   : > { %2003 = vmax.xlane.f32.xlu0 %v2002_v55  ;;  %v3795_v37 = vpop.f32.mrb[30].mxu0  ;;  %v1996_v60 = vsel %vm895_vm1, %v1969_v54, -inf }
 0x851   : > { %v1972_v46 = vpop.f32.mrb[31].mxu0  ;;  %v2005_v59 = vsel %vm895_vm1, %v3795_v37, -inf }
 0x852   : > { %2006 = vmax.xlane.f32.xlu1 %v2005_v59  ;;  %v1999_v62 = vsel %vm895_vm1, %v1972_v46, -inf }
 0x854   : > { %1997 = vmax.xlane.f32.xlu0 %v1996_v60 }
 0x856   : > { %2000 = vmax.xlane.f32.xlu1 %v1999_v62 }
 0x867   : > { %2202 = vrot.lane.b32.xlu1 %v5460_v10, %s4773_s1 }
 0x86a   : > { %2275 = vrot.lane.b32.xlu0 %v5469_v20, %s4772_s15 }
 0x86b   : > { %2277 = vrot.lane.b32.xlu1 %v5467_v19, %s4772_s15 }
 0x86e   : > { %2204 = vrot.lane.b32.xlu0 %v5458_v9, %s4773_s1 }
 0x86f   : > { %2273 = vrot.lane.b32.xlu1 %v5467_v19, %s4773_s1 }
 0x872   : > { %2271 = vrot.lane.b32.xlu0 %v5469_v20, %s4773_s1 }
 0x8cf   : > { %v1992_v47 = vpop.xlane.xlu0 %1991 }
 0x8d0   : > { %v2010_v28 = vsub.f32 %v3786_v24, %v1992_v47 }
 0x8d2   : > { %v1989_v1 = vpop.xlane.xlu1 %1988  ;;  %v2020_v13 = vmul.f32 1.442695, %v2010_v28 }
 0x8d3   : > { %v2009_v6 = vsub.f32 %v1903_v34, %v1989_v1  ;;  %v1986_v7 = vpop.xlane.xlu0 %1985 }
 0x8d4   : > { %v2008_v8 = vsub.f32 %v1900_v31, %v1986_v7 }
 0x8d5   : > { %v2018_v5 = vmul.f32 1.442695, %v2009_v6 }
 0x8d6   : > { %v2016_v11 = vmul.f32 1.442695, %v2008_v8 }
 0x8d7   : > { %4117 = vpow2.f32 %v2018_v5  ;;  %v1995_v15 = vpop.xlane.xlu0 %1994  ;;  %v2217_v5 = vsel %vm1143_vm2, %v5648_v57, 0  ;;  %v2220_v57 = vsel %vm1143_vm2, %v2209_v63, 0 }
 0x8d8   : > { %4119 = vpow2.f32 %v2016_v11  ;;  %v2011_v39 = vsub.f32 %v3787_v40, %v1995_v15 }
 0x8d9   : > { %4121 = vpow2.f32 %v2020_v13 }
 0x8da   : > { %v2022_v41 = vmul.f32 1.442695, %v2011_v39 }
 0x8dc   : > { %4123 = vpow2.f32 %v2022_v41 }
 0x8dd   : > { %v2004_v42 = vpop.xlane.xlu0 %2003 }
 0x8de   : > { %v2014_v44 = vsub.f32 %v3794_v51, %v2004_v42 }
 0x8df   : > { %v2007_v55 = vpop.xlane.xlu1 %2006 }
 0x8e0   : > { %v2028_v59 = vmul.f32 1.442695, %v2014_v44  ;;  %v2015_v60 = vsub.f32 %v3795_v37, %v2007_v55 }
 0x8e1   : > { %v5686_v62 = vpop.eup %4117  ;;  %v1998_v24 = vpop.xlane.xlu0 %1997 }
 0x8e2   : > { %v5688_v34 = vpop.eup %4119  ;;  %v2030_v31 = vmul.f32 1.442695, %v2015_v60  ;;  %v2012_v47 = vsub.f32 %v1969_v54, %v1998_v24  ;;  %4125 = vpow2.f32 %v2028_v59 }
 0x8e3   : > { %v2001_v1 = vpop.xlane.xlu1 %2000  ;;  %v2056_v40 = vpack.c.bf16 %v5686_v62, %v5688_v34  ;;  %v5692_v7 = vpop.eup %4121 }
 0x8e4   : > { %4127 = vpow2.f32 %v2030_v31  ;;  %v2024_v28 = vmul.f32 1.442695, %v2012_v47  ;;  %v2013_v6 = vsub.f32 %v1972_v46, %v2001_v1 }
 0x8e5   : > { %3800 = vmatprep.mubr.msk.bf16.mxu1 %vm895_vm1, %v2056_v40  ;;  %v2276_v51 = vpop.permute.xlu0 %2275 }
 0x8e6   : > { %v5695_v37 = vpop.eup %4123  ;;  %v2026_v8 = vmul.f32 1.442695, %v2013_v6  ;;  %3906 = vmatprep.subr.msk.bf16.mxu0 %vm1143_vm2, %v2276_v51  ;;  %4129 = vpow2.f32 %v2024_v28  ;;  %v2286_v55 = vsel %vm1143_vm2, %v2276_v51, 0 }
 0x8e7   : > { %v2057_v54 = vpack.c.bf16 %v5695_v37, %v5692_v7  ;;  %v2203_v11 = vpop.permute.xlu1 %2202 }
 0x8e8   : > { %4131 = vpow2.f32 %v2026_v8 }
 0x8e9   : > { %3801 = vmatmul.mubr.msk.bf16.vlgmr.msra.gmra.mrb[16].mxu1 %vm895_vm1, %v2057_v54  ;;  %v2205_v39 = vpop.permute.xlu0 %2204 }
 0x8ea   : > { %3813 = vmatpush3.bf16.xpose.msra.mxu1 %v2217_v5  ;;  %3816 = vmatprep.mubr.msk.bf16.mxu1 %vm1143_vm2, %v2203_v11 }
 0x8eb   : > { %3905 = vmatprep.subr.msk.bf16.mxu1 %vm1143_vm2, %v2209_v63  ;;  %v2278_v60 = vpop.permute.xlu1 %2277 }
 0x8ec   : > { %v5705_v46 = vpop.eup %4125  ;;  %v2289_v63 = vsel %vm1143_vm2, %v2278_v60, 0 }
 0x8ed   : > { %v2272_v59 = vpop.permute.xlu0 %2271 }
 0x8ee   : > { %v5707_v13 = vpop.eup %4127 }
 0x8ef   : > { %v2059_v15 = vpack.c.bf16 %v5707_v13, %v5705_v46  ;;  %v2274_v24 = vpop.permute.xlu1 %2273 }
 0x8f0   : > { %v5711_v41 = vpop.eup %4129 }
 0x8f2   : > { %v5714_v42 = vpop.eup %4131  ;;  %3815 = vmatpush3.bf16.xpose.msra.mxu1 %v2220_v57 }
 0x8f3   : > { %v2058_v44 = vpack.c.bf16 %v5714_v42, %v5711_v41 }
 0x8f5   : > { %3808 = vmatprep.mubr.msk.bf16.mxu0 %vm895_vm1, %v2058_v44 }
 0x8f6   : > { %3809 = vmatmul.mubr.msk.bf16.vlgmr.msra.gmra.mrb[32].mxu0 %vm895_vm1, %v2059_v15 }
 0x8f7   : > { %3821 = vmatpush3.bf16.xpose.msra.mxu0 %v2286_v55  ;;  %3824 = vmatprep.mubr.msk.bf16.mxu0 %vm1143_vm2, %v2272_v59 }
 0x8f8   : > { %3907 = vmatprep.subr.msk.bf16.mxu0 %vm1143_vm2, %v2278_v60 }
 0x8f9   : > { %3817 = vmatmul.mubr.msk.bf16.vlgmr.msra.gmra.mrb[20].mxu1 %vm1143_vm2, %v2205_v39 }
 0x8ff   : > { %3823 = vmatpush3.bf16.xpose.msra.mxu0 %v2289_v63 }
 0x906   : > { %3825 = vmatmul.mubr.msk.bf16.vlgmr.msra.gmra.mrb[36].mxu0 %vm1143_vm2, %v2274_v24 }
 0x9bc   : > { %v5726_v31 = vpop.f32.mrb[16].mxu1 }
 0x9bd   : > { %v5728_v47 = vpop.f32.mrb[17].mxu1 }
 0x9be   : > { %v5730_v1 = vpop.f32.mrb[18].mxu1 }
 0x9bf   : > { %v5732_v40 = vpop.f32.mrb[19].mxu1 }
 0x9c9   : > { %v5734_v28 = vpop.f32.mrb[32].mxu0 }
 0x9ca   : > { %v5736_v6 = vpop.f32.mrb[33].mxu0 }
 0x9cb   : > { %v5738_v51 = vpop.f32.mrb[34].mxu0 }
 0x9cc   : > { %v3818_v8 = vpop.f32.mrb[20].mxu1  ;;  %v5740_v54 = vpop.f32.mrb[35].mxu0 }
 0x9cd   : > { %v5742_v5 = vpop.f32.mrb[21].mxu1  ;;  %v2346_v11 = vsel %vm895_vm1, %v3818_v8, -inf }
 0x9ce   : > { %2347 = vmax.xlane.f32.xlu0 %v2346_v11  ;;  %v5745_v15 = vpop.f32.mrb[22].mxu1  ;;  %v2340_v44 = vsel %vm895_vm1, %v5742_v5, -inf }
 0x9cf   : > { %v2259_v39 = vpop.f32.mrb[23].mxu1  ;;  %v2349_v55 = vsel %vm895_vm1, %v5745_v15, -inf }
 0x9d0   : > { %v2343_v57 = vsel %vm895_vm1, %v2259_v39, -inf }
 0x9d1   : > { %2344 = vmax.xlane.f32.xlu1 %v2343_v57 }
 0x9d2   : > { %2341 = vmax.xlane.f32.xlu0 %v2340_v44 }
 0x9d6   : > { %2350 = vmax.xlane.f32.xlu0 %v2349_v55 }
 0x9d9   : > { %v5752_v59 = vpop.f32.mrb[36].mxu0 }
 0x9da   : > { %v5754_v60 = vpop.f32.mrb[37].mxu0  ;;  %v2358_v63 = vsel %vm895_vm1, %v5752_v59, -inf }
 0x9db   : > { %2359 = vmax.xlane.f32.xlu0 %v2358_v63  ;;  %v5758_v24 = vpop.f32.mrb[38].mxu0  ;;  %v2352_v57 = vsel %vm895_vm1, %v5754_v60, -inf  ;;  %v1676_v63 = vsel %vm895_vm1, %v5612_v35, 0.0  ;;  %v1688_v35 = vsel %vm895_vm1, %v5636_v56, 0.0  ;;  %v2041_v56 = vsel %vm895_vm1, %v5695_v37, 0.0 }
 0x9dc   : > { %v5760_v11 = vpop.f32.mrb[39].mxu0  ;;  %v2361_v44 = vsel %vm895_vm1, %v5758_v24, -inf }
 0x9dd   : > { %v2355_v55 = vsel %vm895_vm1, %v5760_v11, -inf }
 0x9df   : > { %2353 = vmax.xlane.f32.xlu0 %v2352_v57  ;;  %v1682_v57 = vsel %vm895_vm1, %v5616_v43, 0.0  ;;  %v1694_v43 = vsel %vm895_vm1, %v5629_v61, 0.0  ;;  %v1691_v61 = vsel %vm895_vm1, %v5638_v3, 0.0 }
 0x9e2   : > { %2418 = vrot.lane.b32.xlu1 %v5458_v9, %s4774_s20  ;;  %v1685_v9 = vsel %vm895_vm1, %v5619_v29, 0.0  ;;  %v2044_v29 = vsel %vm895_vm1, %v5711_v41, 0.0 }
 0x9e6   : > { %2477 = vrot.lane.b32.xlu1 %v5469_v20, %s4774_s20  ;;  %v2038_v20 = vsel %vm895_vm1, %v5692_v7, 0.0  ;;  %v1697_v7 = vsel %vm895_vm1, %v5631_v0, 0.0 }
 0x9f5   : > { %2416 = vrot.lane.b32.xlu0 %v5460_v10, %s4774_s20  ;;  %v2032_v10 = vsel %vm895_vm1, %v5688_v34, 0.0  ;;  %v2035_v34 = vsel %vm895_vm1, %v5686_v62, 0.0 }
 0xa0a   : > { %2362 = vmax.xlane.f32.xlu1 %v2361_v44 }
 0xa0e   : > { %2356 = vmax.xlane.f32.xlu1 %v2355_v55 }
 0xa14   : > { %1677 = vadd.xlane.f32.xlu0 %v1676_v63 }
 0xa18   : > { %1683 = vadd.xlane.f32.xlu0 %v1682_v57 }
 0xa1c   : > { %1686 = vadd.xlane.f32.xlu0 %v1685_v9 }
 0xa1f   : > { %2479 = vrot.lane.b32.xlu1 %v5467_v19, %s4774_s20  ;;  %v1679_v19 = vsel %vm895_vm1, %v5610_v27, 0.0  ;;  %v2047_v27 = vsel %vm895_vm1, %v5714_v42, 0.0 }
 0xa20   : > { %2033 = vadd.xlane.f32.xlu0 %v2032_v10 }
 0xa24   : > { %2039 = vadd.xlane.f32.xlu0 %v2038_v20 }
 0xa28   : > { %1689 = vadd.xlane.f32.xlu0 %v1688_v35 }
 0xa2c   : > { %1695 = vadd.xlane.f32.xlu0 %v1694_v43 }
 0xa30   : > { %2045 = vadd.xlane.f32.xlu0 %v2044_v29 }
 0xa43   : > { %1680 = vadd.xlane.f32.xlu1 %v1679_v19 }
 0xa47   : > { %2036 = vadd.xlane.f32.xlu1 %v2035_v34 }
 0xa4b   : > { %2042 = vadd.xlane.f32.xlu1 %v2041_v56 }
 0xa4f   : > { %1692 = vadd.xlane.f32.xlu1 %v1691_v61 }
 0xa53   : > { %1698 = vadd.xlane.f32.xlu1 %v1697_v7 }
 0xa57   : > { %2048 = vadd.xlane.f32.xlu1 %v2047_v27 }
 0xa5b   : > { %v2348_v41 = vpop.xlane.xlu0 %2347 }
 0xa5c   : > { %v2366_v44 = vsub.f32 %v3818_v8, %v2348_v41 }
 0xa5e   : > { %v2376_v62 = vmul.f32 1.442695, %v2366_v44  ;;  %v2345_v55 = vpop.xlane.xlu1 %2344  ;;  %v2050_v44 = vsel %vm895_vm1, %v5705_v46, 0.0 }
 0xa5f   : > { %v2365_v63 = vsub.f32 %v2259_v39, %v2345_v55  ;;  %v2342_v57 = vpop.xlane.xlu0 %2341 }
 0xa60   : > { %4133 = vpow2.f32 %v2376_v62  ;;  %v2364_v37 = vsub.f32 %v5742_v5, %v2342_v57  ;;  %v2053_v57 = vsel %vm895_vm1, %v5707_v13, 0.0  ;;  %v1338_v13 = vsel %vm895_vm1, %v5544_v25, 0.0 }
 0xa61   : > { %v2374_v9 = vmul.f32 1.442695, %v2365_v63 }
 0xa62   : > { %v2372_v3 = vmul.f32 1.442695, %v2364_v37  ;;  %v2419_v10 = vpop.permute.xlu1 %2418 }
 0xa63   : > { %4135 = vpow2.f32 %v2374_v9  ;;  %v2351_v20 = vpop.xlane.xlu0 %2350 }
 0xa64   : > { %4137 = vpow2.f32 %v2372_v3  ;;  %v2367_v0 = vsub.f32 %v5745_v15, %v2351_v20  ;;  %v1320_v3 = vsel %vm895_vm1, %v5526_v4, 0.0  ;;  %v1332_v20 = vsel %vm895_vm1, %v5552_v33, 0.0 }
 0xa66   : > { %v2378_v35 = vmul.f32 1.442695, %v2367_v0  ;;  %v2478_v42 = vpop.permute.xlu1 %2477 }
 0xa67   : > { %3836 = vmatprep.subr.bf16.mxu0 %v2478_v42 }
 0xa68   : > { %4139 = vpow2.f32 %v2378_v35  ;;  %3837 = vmatpush3.bf16.msra.mxu0 %v2478_v42  ;;  %v2360_v8 = vpop.xlane.xlu0 %2359 }
 0xa69   : > { %v2370_v39 = vsub.f32 %v5752_v59, %v2360_v8 }
 0xa6a   : > { %v4134_v43 = vpop.eup %4133 }
 0xa6b   : > { %v2394_v29 = vsel %vm895_vm1, %v4134_v43, 0.0  ;;  %v2384_v61 = vmul.f32 1.442695, %v2370_v39 }
 0xa6c   : > { %2395 = vadd.xlane.f32.xlu0 %v2394_v29  ;;  %v2354_v5 = vpop.xlane.xlu0 %2353 }
 0xa6d   : > { %v4136_v19 = vpop.eup %4135  ;;  %v2368_v34 = vsub.f32 %v5754_v60, %v2354_v5 }
 0xa6e   : > { %v4138_v56 = vpop.eup %4137  ;;  %v2391_v55 = vsel %vm895_vm1, %v4136_v19, 0.0 }
 0xa6f   : > { %v2380_v7 = vmul.f32 1.442695, %v2368_v34  ;;  %v2388_v15 = vsel %vm895_vm1, %v4138_v56, 0.0  ;;  %v2412_v27 = vpack.c.bf16 %v4136_v19, %v4138_v56 }
 0xa70   : > { %2389 = vadd.xlane.f32.xlu0 %v2388_v15  ;;  %v2417_v41 = vpop.permute.xlu0 %2416 }
 0xa71   : > { %4141 = vpow2.f32 %v2380_v7  ;;  %3828 = vmatprep.subr.bf16.mxu1 %v2417_v41  ;;  %3832 = vmatprep.mubr.msk.bf16.mxu1 %vm895_vm1, %v2412_v27 }
 0xa72   : > { %v4140_v59 = vpop.eup %4139  ;;  %3829 = vmatpush3.bf16.msra.mxu1 %v2417_v41  ;;  %4143 = vpow2.f32 %v2384_v61  ;;  %v1323_v61 = vsel %vm895_vm1, %v5524_v2, 0.0  ;;  %v1329_v41 = vsel %vm895_vm1, %v5533_v14, 0.0 }
 0xa73   : > { %3830 = vmatprep.subr.bf16.mxu1 %v2419_v10  ;;  %v2397_v60 = vsel %vm895_vm1, %v4140_v59, 0.0  ;;  %v2413_v62 = vpack.c.bf16 %v4140_v59, %v4134_v43 }
 0xa74   : > { %2051 = vadd.xlane.f32.xlu0 %v2050_v44  ;;  %2398 = vadd.xlane.f32.xlu1 %v2397_v60  ;;  %v1335_v44 = vsel %vm895_vm1, %v5554_v38, 0.0  ;;  %v1341_v60 = vsel %vm895_vm1, %v5546_v30, 0.0 }
 0xa76   : > { %3831 = vmatpush3.bf16.msra.mxu1 %v2419_v10  ;;  %v1326_v10 = vsel %vm895_vm1, %v5530_v12, 0.0 }
 0xa78   : > { %2392 = vadd.xlane.f32.xlu1 %v2391_v55 }
 0xa79   : > { %3833 = vmatmul.mubr.msk.bf16.vlgmr.msra.gmra.mrb[24].mxu1 %vm895_vm1, %v2413_v62 }
 0xa7b   : > { %v4142_v63 = vpop.eup %4141 }
 0xa7c   : > { %2054 = vadd.xlane.f32.xlu1 %v2053_v57  ;;  %v2400_v37 = vsel %vm895_vm1, %v4142_v63, 0.0  ;;  %v4144_v9 = vpop.eup %4143 }
 0xa7d   : > { %2401 = vadd.xlane.f32.xlu0 %v2400_v37  ;;  %v2406_v46 = vsel %vm895_vm1, %v4144_v9, 0.0 }
 0xa81   : > { %2407 = vadd.xlane.f32.xlu0 %v2406_v46 }
 0xa85   : > { %1321 = vadd.xlane.f32.xlu0 %v1320_v3 }
 0xa89   : > { %1327 = vadd.xlane.f32.xlu0 %v1326_v10 }
 0xa8d   : > { %1333 = vadd.xlane.f32.xlu0 %v1332_v20 }
 0xa91   : > { %1339 = vadd.xlane.f32.xlu0 %v1338_v13 }
 0xa97   : > { %v2363_v0 = vpop.xlane.xlu1 %2362 }
 0xa98   : > { %v2371_v35 = vsub.f32 %v5758_v24, %v2363_v0 }
 0xa9a   : > { %v2386_v42 = vmul.f32 1.442695, %v2371_v35 }
 0xa9b   : > { %v2357_v8 = vpop.xlane.xlu1 %2356 }
 0xa9c   : > { %4145 = vpow2.f32 %v2386_v42  ;;  %v2369_v4 = vsub.f32 %v5760_v11, %v2357_v8 }
 0xa9e   : > { %v2382_v43 = vmul.f32 1.442695, %v2369_v4 }
 0xa9f   : > { %v2480_v39 = vpop.permute.xlu1 %2479 }
 0xaa0   : > { %4147 = vpow2.f32 %v2382_v43  ;;  %3838 = vmatprep.subr.bf16.mxu0 %v2480_v39 }
 0xaa1   : > { %3839 = vmatpush3.bf16.msra.mxu0 %v2480_v39  ;;  %v1678_v12 = vpop.xlane.xlu0 %1677 }
 0xaa5   : > { %v1684_v33 = vpop.xlane.xlu0 %1683 }
 0xaa6   : > { %v4146_v29 = vpop.eup %4145  ;;  %4149 = vrcp.f32 %v1684_v33 }
 0xaa7   : > { %v2415_v5 = vpack.c.bf16 %v4146_v29, %v4144_v9  ;;  %v2409_v11 = vsel %vm895_vm1, %v4146_v29, 0.0 }
 0xaa9   : > { %v1687_v25 = vpop.xlane.xlu0 %1686 }
 0xaaa   : > { %v4148_v19 = vpop.eup %4147  ;;  %4151 = vrcp.f32 %v1687_v25 }
 0xaab   : > { %v2403_v24 = vsel %vm895_vm1, %v4148_v19, 0.0  ;;  %v2414_v34 = vpack.c.bf16 %v4148_v19, %v4142_v63  ;;  %4153 = vrcp.f32 %v1678_v12 }
 0xaac   : > { %2404 = vadd.xlane.f32.xlu1 %v2403_v24 }
 0xaad   : > { %3840 = vmatprep.mubr.msk.bf16.mxu0 %vm895_vm1, %v2414_v34  ;;  %v2034_v2 = vpop.xlane.xlu0 %2033 }
 0xaae   : > { %3841 = vmatmul.mubr.msk.bf16.vlgmr.msra.gmra.mrb[40].mxu0 %vm895_vm1, %v2415_v5 }
 0xab0   : > { %2410 = vadd.xlane.f32.xlu1 %v2409_v11  ;;  %v4150_v56 = vpop.eup %4149 }
 0xab1   : > { %v1836_v15 = vmul.f32 %v4150_v56, %v5654_v16  ;;  %v2040_v62 = vpop.xlane.xlu0 %2039 }
 0xab4   : > { %v4152_v7 = vpop.eup %4151  ;;  %1324 = vadd.xlane.f32.xlu1 %v1323_v61 }
 0xab5   : > { %v1837_v27 = vmul.f32 %v4152_v7, %v5658_v18  ;;  %v1690_v14 = vpop.xlane.xlu0 %1689  ;;  %v4154_v38 = vpop.eup %4153 }
 0xab6   : > { %v1834_v37 = vmul.f32 %v4154_v38, %v5656_v17 }
 0xab7   : > { %v1843_v59 = vpack.c.bf16 %v1837_v27, %v1836_v15  ;;  %v4057_v27 = vld [vmem:[%s718_s8] sm:$0xff]  }
 0xab8   : > { %1330 = vadd.xlane.f32.xlu1 %v1329_v41  ;;  %v4058_v41 = vld [vmem:[%s718_s8 + $0x8] sm:$0xff]   ;;  %3844 = vmatprep.subr.bf16.mxu1 %v4057_v27  ;;  %s4777_s8 = smov 24  }
 0xab9   : > { %v1696_v63 = vpop.xlane.xlu0 %1695  ;;  %3845 = vmatpush3.bf16.msra.mxu1 %v4057_v27 }
 0xaba   : > { %3846 = vmatprep.subr.bf16.mxu1 %v4058_v41 }
 0xabc   : > { %1336 = vadd.xlane.f32.xlu1 %v1335_v44 }
 0xabd   : > { %v2046_v20 = vpop.xlane.xlu0 %2045  ;;  %3847 = vmatpush3.bf16.msra.mxu1 %v4058_v41 }
 0xac0   : > { %1342 = vadd.xlane.f32.xlu1 %v1341_v60 }
 0xad0   : > { %v1681_v55 = vpop.xlane.xlu1 %1680 }
 0xad1   : > { %4155 = vrcp.f32 %v1681_v55  ;;  %2564 = vrot.lane.b32.xlu1 %v1843_v59, %s4775_s21 }
 0xad2   : > { %4157 = vrcp.f32 %v2034_v2 }
 0xad4   : > { %v2037_v16 = vpop.xlane.xlu1 %2036 }
 0xad5   : > { %4159 = vrcp.f32 %v2037_v16 }
 0xad6   : > { %4161 = vrcp.f32 %v2040_v62 }
 0xad8   : > { %v2043_v18 = vpop.xlane.xlu1 %2042 }
 0xad9   : > { %4163 = vrcp.f32 %v2043_v18 }
 0xada   : > { %4165 = vrcp.f32 %v1690_v14 }
 0xadb   : > { %v4156_v57 = vpop.eup %4155 }
 0xadc   : > { %v1693_v30 = vpop.xlane.xlu1 %1692  ;;  %v1835_v9 = vmul.f32 %v4156_v57, %v5660_v21  ;;  %v4158_v46 = vpop.eup %4157 }
 0xadd   : > { %4167 = vrcp.f32 %v1693_v30  ;;  %v2190_v0 = vmul.f32 %v4158_v46, %v5728_v47 }
 0xade   : > { %v1842_v3 = vpack.c.bf16 %v1835_v9, %v1834_v37  ;;  %4169 = vrcp.f32 %v1696_v63 }
 0xadf   : > { %v4160_v10 = vpop.eup %4159 }
 0xae0   : > { %v1699_v13 = vpop.xlane.xlu1 %1698  ;;  %2562 = vrot.lane.b32.xlu0 %v1842_v3, %s4775_s21  ;;  %v2191_v35 = vmul.f32 %v4160_v10, %v5732_v40  ;;  %v4162_v42 = vpop.eup %4161 }
 0xae1   : > { %4171 = vrcp.f32 %v1699_v13  ;;  %v2192_v21 = vmul.f32 %v4162_v42, %v5726_v31 }
 0xae2   : > { %v2198_v8 = vpack.c.bf16 %v2191_v35, %v2190_v0  ;;  %4173 = vrcp.f32 %v2046_v20 }
 0xae3   : > { %v4164_v4 = vpop.eup %4163 }
 0xae4   : > { %v2049_v17 = vpop.xlane.xlu1 %2048  ;;  %2574 = vrot.lane.b32.xlu1 %v2198_v8, %s4776_s28  ;;  %v2193_v43 = vmul.f32 %v4164_v4, %v5730_v1  ;;  %v4166_v39 = vpop.eup %4165 }
 0xae5   : > { %4175 = vrcp.f32 %v2049_v17  ;;  %v1838_v47 = vmul.f32 %v4166_v39, %v5664_v23 }
 0xae6   : > { %v2199_v12 = vpack.c.bf16 %v2193_v43, %v2192_v21 }
 0xae7   : > { %v4168_v33 = vpop.eup %4167 }
 0xae8   : > { %2576 = vrot.lane.b32.xlu1 %v2199_v12, %s4776_s28  ;;  %v1839_v40 = vmul.f32 %v4168_v33, %v5668_v32  ;;  %v4170_v29 = vpop.eup %4169 }
 0xae9   : > { %v1840_v19 = vmul.f32 %v4170_v29, %v5662_v22 }
 0xaea   : > { %v1844_v5 = vpack.c.bf16 %v1839_v40, %v1838_v47 }
 0xaeb   : > { %v4172_v25 = vpop.eup %4171 }
 0xaec   : > { %2566 = vrot.lane.b32.xlu0 %v1844_v5, %s4775_s21  ;;  %v1841_v31 = vmul.f32 %v4172_v25, %v5666_v26  ;;  %v4174_v1 = vpop.eup %4173 }
 0xaed   : > { %v5857_v23 = vmul.f32 %v4174_v1, %v5736_v6 }
 0xaee   : > { %v1845_v24 = vpack.c.bf16 %v1841_v31, %v1840_v19 }
 0xaef   : > { %v4176_v34 = vpop.eup %4175 }
 0xaf0   : > { %2568 = vrot.lane.b32.xlu1 %v1845_v24, %s4775_s21  ;;  %v5860_v32 = vmul.f32 %v4176_v34, %v5740_v54 }
 0xaf2   : > { %v2200_v11 = vpack.c.bf16 %v5860_v32, %v5857_v23 }
 0xaf9   : > { %v2396_v56 = vpop.xlane.xlu0 %2395 }
 0xafd   : > { %v2390_v22 = vpop.xlane.xlu0 %2389 }
 0xb01   : > { %v2399_v61 = vpop.xlane.xlu1 %2398  ;;  %v2052_v7 = vpop.xlane.xlu0 %2051 }
 0xb02   : > { %4177 = vrcp.f32 %v2052_v7 }
 0xb05   : > { %v2393_v26 = vpop.xlane.xlu1 %2392 }
 0xb09   : > { %v2055_v15 = vpop.xlane.xlu1 %2054 }
 0xb0a   : > { %4179 = vrcp.f32 %v2055_v15  ;;  %v5870_v2 = vpop.xlane.xlu0 %2401 }
 0xb0b   : > { %4181 = vrcp.f32 %v2396_v56 }
 0xb0c   : > { %v4178_v6 = vpop.eup %4177 }
 0xb0d   : > { %v2196_v59 = vmul.f32 %v4178_v6, %v5734_v28 }
 0xb0e   : > { %v2408_v62 = vpop.xlane.xlu0 %2407 }
 0xb12   : > { %v1322_v55 = vpop.xlane.xlu0 %1321 }
 0xb13   : > { %4183 = vrcp.f32 %v1322_v55 }
 0xb14   : > { %v4180_v54 = vpop.eup %4179  ;;  %4185 = vrcp.f32 %v2390_v22 }
 0xb15   : > { %v2197_v44 = vmul.f32 %v4180_v54, %v5738_v51  ;;  %v4182_v51 = vpop.eup %4181 }
 0xb16   : > { %v1328_v16 = vpop.xlane.xlu0 %1327 }
 0xb17   : > { %v2201_v60 = vpack.c.bf16 %v2197_v44, %v2196_v59 }
 0xb1a   : > { %v1334_v63 = vpop.xlane.xlu0 %1333 }
 0xb1d   : > { %v4184_v37 = vpop.eup %4183 }
 0xb1e   : > { %v1340_v57 = vpop.xlane.xlu0 %1339  ;;  %v4186_v9 = vpop.eup %4185  ;;  %v5873_v0 = vmul.f32 %v4184_v37, %v5572_v48 }
 0xb39   : > { %v2405_v14 = vpop.xlane.xlu1 %2404 }
 0xb3d   : > { %v2411_v18 = vpop.xlane.xlu1 %2410 }
 0xb41   : > { %v1325_v38 = vpop.xlane.xlu1 %1324 }
 0xb42   : > { %4187 = vrcp.f32 %v1325_v38 }
 0xb43   : > { %4189 = vrcp.f32 %v2399_v61 }
 0xb44   : > { %4191 = vrcp.f32 %v1328_v16 }
 0xb45   : > { %4193 = vrcp.f32 %v2393_v26  ;;  %v1331_v28 = vpop.xlane.xlu1 %1330 }
 0xb46   : > { %4195 = vrcp.f32 %v1331_v28 }
 0xb47   : > { %4197 = vrcp.f32 %v1334_v63 }
 0xb49   : > { %v1337_v30 = vpop.xlane.xlu1 %1336 }
 0xb4a   : > { %4199 = vrcp.f32 %v1337_v30 }
 0xb4b   : > { %4201 = vrcp.f32 %v1340_v57 }
 0xb4c   : > { %v4188_v46 = vpop.eup %4187  ;;  %v3834_v3 = vpop.f32.mrb[24].mxu1 }
 0xb4d   : > { %v4190_v10 = vpop.eup %4189  ;;  %v1343_v20 = vpop.xlane.xlu1 %1342  ;;  %v1479_v35 = vmul.f32 %v4188_v46, %v5576_v50  ;;  %v2548_v17 = vmul.f32 %v4182_v51, %v3834_v3 }
 0xb4e   : > { %v2462_v13 = vpop.f32.mrb[25].mxu1  ;;  %v4192_v42 = vpop.eup %4191  ;;  %4203 = vrcp.f32 %v1343_v20 }
 0xb4f   : > { %v3835_v8 = vpop.f32.mrb[26].mxu1  ;;  %v4194_v4 = vpop.eup %4193  ;;  %v1486_v39 = vpack.c.bf16 %v1479_v35, %v5873_v0  ;;  %v2546_v33 = vmul.f32 %v4186_v9, %v2462_v13  ;;  %v1480_v48 = vmul.f32 %v4192_v42, %v5570_v45  ;;  %4205 = vrcp.f32 %v5870_v2  ;;  %v3576_v35 = vld [vmem:[%s726_s13] ss:$0 sm:$0xff] }
 0xb50   : > { %v2549_v21 = vmul.f32 %v4190_v10, %v3835_v8  ;;  %v2465_v43 = vpop.f32.mrb[27].mxu1  ;;  %v4196_v12 = vpop.eup %4195  ;;  %4207 = vrcp.f32 %v2408_v62 }
 0xb51   : > { %v2547_v47 = vmul.f32 %v4194_v4, %v2465_v43  ;;  %v1481_v29 = vmul.f32 %v4196_v12, %v5574_v49  ;;  %v4198_v5 = vpop.eup %4197  ;;  %4209 = vrcp.f32 %v2411_v18  ;;  %v2565_v54 = vpop.permute.xlu1 %2564 }
 0xb52   : > { %v2555_v40 = vpack.c.bf16 %v2549_v21, %v2548_v17  ;;  %v1482_v31 = vmul.f32 %v4198_v5, %v5580_v52  ;;  %4211 = vrcp.f32 %v2405_v14 }
 0xb53   : > { %v2554_v25 = vpack.c.bf16 %v2547_v47, %v2546_v33  ;;  %v1487_v50 = vpack.c.bf16 %v1481_v29, %v1480_v48  ;;  %v4246_v47 = vld [vmem:[#allocation2 + $0x10] sm:$0xff]  ;;  %v4247_v48 = vld [vmem:[#allocation2 + $0x8] sm:$0xff] }
 0xb54   : > { %2588 = vrot.lane.b32.xlu1 %v2555_v40, %s4777_s8  ;;  %v4200_v19 = vpop.eup %4199 }
 0xb55   : > { %2586 = vrot.lane.b32.xlu0 %v2554_v25, %s4777_s8  ;;  %v1483_v1 = vmul.f32 %v4200_v19, %v5585_v58  ;;  %v4202_v24 = vpop.eup %4201  ;;  %v2599_v16 = vsel %vm1143_vm2, %v1487_v50, %v2565_v54  ;;  %v4248_v19 = vld [vmem:[#allocation2 + $0x18] sm:$0xff] }
 0xb56   : > { %v1484_v56 = vmul.f32 %v4202_v24, %v5578_v36  ;;  %v2575_v59 = vpop.permute.xlu1 %2574 }
 0xb57   : > { %v1488_v34 = vpack.c.bf16 %v1483_v1, %v1482_v31 }
 0xb58   : > { %2580 = vrot.lane.b32.xlu1 %v2201_v60, %s4776_s28  ;;  %v4204_v49 = vpop.eup %4203  ;;  %v2563_v60 = vpop.permute.xlu0 %2562 }
 0xb59   : > { %2578 = vrot.lane.b32.xlu0 %v2200_v11, %s4776_s28  ;;  %v1485_v45 = vmul.f32 %v4204_v49, %v5582_v53  ;;  %v4206_v52 = vpop.eup %4205  ;;  %v2596_v55 = vsel %vm1143_vm2, %v1486_v39, %v2563_v60  ;;  %v4245_v39 = vld [vmem:[#allocation2] sm:$0xff] }
 0xb5a   : > { %v4208_v61 = vpop.eup %4207  ;;  %v2577_v44 = vpop.permute.xlu1 %2576  ;;  %v2608_v18 = vsel %vm2606_vm3, %v2596_v55, %v2575_v59 }
 0xb5b   : > { %v1489_v22 = vpack.c.bf16 %v1485_v45, %v1484_v56  ;;  %v4210_v26 = vpop.eup %4209  ;;  %v2610_v63 = vsel %vm2606_vm3, %v2599_v16, %v2577_v44 }
 0xb5c   : > { %v4212_v27 = vpop.eup %4211 }
 0xb5e   : > { %v2567_v62 = vpop.permute.xlu0 %2566 }
 0xb5f   : > { %v2602_v37 = vsel %vm1143_vm2, %v1488_v34, %v2567_v62 }
 0xb62   : > { %v2569_v2 = vpop.permute.xlu1 %2568 }
 0xb63   : > { %v2605_v46 = vsel %vm1143_vm2, %v1489_v22, %v2569_v2 }
 0xb81   : > { %v3842_v58 = vpop.f32.mrb[40].mxu0 }
 0xb82   : > { %v2523_v7 = vpop.f32.mrb[41].mxu0  ;;  %v2552_v41 = vmul.f32 %v4208_v61, %v3842_v58  ;;  %v4249_v58 = vld [vmem:[#allocation2 + $0x20] sm:$0xff] }
 0xb83   : > { %v3843_v15 = vpop.f32.mrb[42].mxu0  ;;  %v2550_v11 = vmul.f32 %v4206_v52, %v2523_v7 }
 0xb84   : > { %v2553_v23 = vmul.f32 %v4210_v26, %v3843_v15  ;;  %v2526_v32 = vpop.f32.mrb[43].mxu0  ;;  %v4250_v15 = vld [vmem:[#allocation2 + $0x30] sm:$0xff] }
 0xb85   : > { %v2551_v53 = vmul.f32 %v4212_v27, %v2526_v32 }
 0xb86   : > { %v2557_v6 = vpack.c.bf16 %v2553_v23, %v2552_v41  ;;  %v4251_v41 = vld [vmem:[#allocation2 + $0x28] sm:$0xff] }
 0xb87   : > { %v2556_v36 = vpack.c.bf16 %v2551_v53, %v2550_v11  ;;  %v4252_v11 = vld [vmem:[#allocation2 + $0x38] sm:$0xff] }
 0xb88   : > { %2592 = vrot.lane.b32.xlu1 %v2557_v6, %s4777_s8 }
 0xb89   : > { %2590 = vrot.lane.b32.xlu0 %v2556_v36, %s4777_s8 }
 0xbc6   : > { %v2589_v14 = vpop.permute.xlu1 %2588 }
 0xbc7   : > { %v2587_v38 = vpop.permute.xlu0 %2586  ;;  %v2619_v51 = vsel %vm2615_vm4, %v2610_v63, %v2589_v14 }
 0xbc8   : > { %v2617_v28 = vsel %vm2615_vm4, %v2608_v18, %v2587_v38 }
 0xbc9   : > { %3848 = vmatprep.mubr.msk.bf16.mxu1 %vm895_vm1, %v2617_v28 }
 0xbca   : > { %3849 = vmatmul.mubr.msk.bf16.vlgmr.msra.gmra.mrb[28].mxu1 %vm895_vm1, %v2619_v51  ;;  %v2581_v57 = vpop.permute.xlu1 %2580 }
 0xbcb   : > { %v2579_v30 = vpop.permute.xlu0 %2578  ;;  %v2614_v20 = vsel %vm2606_vm3, %v2605_v46, %v2581_v57 }
 0xbcc   : > { %v2612_v3 = vsel %vm2606_vm3, %v2602_v37, %v2579_v30 }
 0xbfa   : > { %v2593_v9 = vpop.permute.xlu1 %2592 }
 0xbfb   : > { %v2591_v10 = vpop.permute.xlu0 %2590  ;;  %v2623_v0 = vsel %vm2615_vm4, %v2614_v20, %v2593_v9  ;;  %v4059_v20 = vld [vmem:[%s751_s0] sm:$0xff]  }
 0xbfc   : > { %v2621_v13 = vsel %vm2615_vm4, %v2612_v3, %v2591_v10  ;;  %3856 = vmatprep.subr.bf16.mxu0 %v4059_v20 }
 0xbfd   : > { %3852 = vmatprep.mubr.msk.bf16.mxu1 %vm895_vm1, %v2621_v13  ;;  %3857 = vmatpush3.bf16.msra.mxu0 %v4059_v20  ;;  %v4060_v13 = vld [vmem:[%s751_s0 + $0x8] sm:$0xff]  }
 0xbfe   : > { %3853 = vmatmul.mubr.msk.bf16.gmra.mrb[32].mxu1 %vm895_vm1, %v2623_v0  ;;  %3858 = vmatprep.subr.bf16.mxu0 %v4060_v13 }
 0xc01   : > { %3859 = vmatpush3.bf16.msra.mxu0 %v4060_v13 }
 0xc9d   : > { %v3850_v42 = vpop.f32.mrb[28].mxu1 }
 0xc9e   : > { %v2689_v8 = vpop.f32.mrb[29].mxu1  ;;  %v2698_v4 = vadd.f32 %v3850_v42, %v3576_v35 }
 0xc9f   : > { %v2690_v17 = vadd.f32 %v3576_v35, %v2689_v8  ;;  %v3851_v21 = vpop.f32.mrb[30].mxu1 }
 0xca0   : > { %v2692_v43 = vpop.f32.mrb[31].mxu1  ;;  %v5913_v40 = vadd.f32 %v4246_v47, %v2698_v4  ;;  %v2701_v29 = vadd.f32 %v3851_v21, %v3576_v35 }
 0xca1   : > { %v5911_v12 = vadd.f32 %v4245_v39, %v2690_v17  ;;  %v2693_v33 = vadd.f32 %v3576_v35, %v2692_v43 }
 0xca2   : > { %v5921_v31 = vadd.f32 %v4248_v19, %v2701_v29  ;;  %v2736_v1 = vsel %vm895_vm1, %v5913_v40, 0.0 }
 0xca3   : > { %v5915_v5 = vadd.f32 %v4247_v48, %v2693_v33  ;;  %v2730_v25 = vsel %vm895_vm1, %v5911_v12, 0.0 }
 0xca4   : > { %2731 = vadd.xlane.f32.xlu0 %v2730_v25  ;;  %v2739_v24 = vsel %vm895_vm1, %v5921_v31, 0.0 }
 0xca5   : > { %v2733_v50 = vsel %vm895_vm1, %v5915_v5, 0.0 }
 0xca6   : > { %2734 = vadd.xlane.f32.xlu1 %v2733_v50 }
 0xca8   : > { %2737 = vadd.xlane.f32.xlu0 %v2736_v1 }
 0xcac   : > { %2740 = vadd.xlane.f32.xlu0 %v2739_v24 }
 0xcd1   : > { %v3854_v34 = vpop.f32.mrb[32].mxu1 }
 0xcd2   : > { %v2705_v49 = vpop.f32.mrb[33].mxu1  ;;  %v2714_v45 = vadd.f32 %v3854_v34, %v3576_v35 }
 0xcd3   : > { %v2706_v56 = vadd.f32 %v3576_v35, %v2705_v49  ;;  %v3855_v22 = vpop.f32.mrb[34].mxu1 }
 0xcd4   : > { %v2708_v52 = vpop.f32.mrb[35].mxu1  ;;  %v2717_v7 = vadd.f32 %v3855_v22, %v3576_v35  ;;  %v5929_v27 = vadd.f32 %v4250_v15, %v2714_v45 }
 0xcd5   : > { %v5927_v61 = vadd.f32 %v4249_v58, %v2706_v56  ;;  %v2709_v26 = vadd.f32 %v3576_v35, %v2708_v52 }
 0xcd6   : > { %v5935_v53 = vadd.f32 %v4252_v11, %v2717_v7  ;;  %v2748_v36 = vsel %vm895_vm1, %v5929_v27, 0.0 }
 0xcd7   : > { %v5931_v23 = vadd.f32 %v4251_v41, %v2709_v26  ;;  %v2742_v32 = vsel %vm895_vm1, %v5927_v61, 0.0 }
 0xcd8   : > { %2743 = vadd.xlane.f32.xlu0 %v2742_v32  ;;  %v2751_v54 = vsel %vm895_vm1, %v5935_v53, 0.0 }
 0xcd9   : > { %v2745_v6 = vsel %vm895_vm1, %v5931_v23, 0.0 }
 0xcda   : > { %2746 = vadd.xlane.f32.xlu1 %v2745_v6 }
 0xcdc   : > { %2749 = vadd.xlane.f32.xlu0 %v2748_v36 }
 0xcde   : > { %2752 = vadd.xlane.f32.xlu1 %v2751_v54  ;;  %v3583_v54 = vld [vmem:[%s734_s18] ss:$0 sm:$0xff] }
 0xd31   : > { %v2732_v59 = vpop.xlane.xlu0 %2731 }
 0xd32   : > { %v2754_v44 = vmul.f32 0.03125, %v2732_v59 }
 0xd33   : > { %v2735_v60 = vpop.xlane.xlu1 %2734 }
 0xd34   : > { %v5944_v2 = vsub.f32 %v5911_v12, %v2754_v44  ;;  %v2755_v62 = vmul.f32 0.03125, %v2735_v60 }
 0xd35   : > { %v2738_v55 = vpop.xlane.xlu0 %2737 }
 0xd36   : > { %v5947_v14 = vsub.f32 %v5915_v5, %v2755_v62  ;;  %v2756_v16 = vmul.f32 0.03125, %v2738_v55  ;;  %v2770_v18 = vmul.f32 %v5944_v2, %v5944_v2 }
 0xd38   : > { %v5952_v38 = vsub.f32 %v5913_v40, %v2756_v16  ;;  %v2778_v63 = vsel %vm895_vm1, %v2770_v18, 0.0  ;;  %v2771_v28 = vmul.f32 %v5947_v14, %v5947_v14  ;;  %v3584_v16 = vld [vmem:[%s6174_s27] ss:$0 sm:$0xff] }
 0xd39   : > { %2779 = vadd.xlane.f32.xlu0 %v2778_v63  ;;  %v2741_v51 = vpop.xlane.xlu0 %2740 }
 0xd3a   : > { %v2757_v57 = vmul.f32 0.03125, %v2741_v51  ;;  %v2781_v30 = vsel %vm895_vm1, %v2771_v28, 0.0  ;;  %v2772_v37 = vmul.f32 %v5952_v38, %v5952_v38 }
 0xd3b   : > { %2782 = vadd.xlane.f32.xlu1 %v2781_v30 }
 0xd3c   : > { %v5961_v9 = vsub.f32 %v5921_v31, %v2757_v57  ;;  %v2784_v46 = vsel %vm895_vm1, %v2772_v37, 0.0 }
 0xd3d   : > { %2785 = vadd.xlane.f32.xlu0 %v2784_v46 }
 0xd3e   : > { %v2773_v3 = vmul.f32 %v5961_v9, %v5961_v9 }
 0xd40   : > { %v2787_v10 = vsel %vm895_vm1, %v2773_v3, 0.0 }
 0xd41   : > { %2788 = vadd.xlane.f32.xlu1 %v2787_v10 }
 0xd65   : > { %v2744_v0 = vpop.xlane.xlu0 %2743 }
 0xd66   : > { %v2758_v35 = vmul.f32 0.03125, %v2744_v0 }
 0xd67   : > { %v2747_v42 = vpop.xlane.xlu1 %2746 }
 0xd68   : > { %v5972_v8 = vsub.f32 %v5927_v61, %v2758_v35  ;;  %v2759_v4 = vmul.f32 0.03125, %v2747_v42 }
 0xd69   : > { %v2750_v17 = vpop.xlane.xlu0 %2749 }
 0xd6a   : > { %v5975_v21 = vsub.f32 %v5931_v23, %v2759_v4  ;;  %v2760_v43 = vmul.f32 0.03125, %v2750_v17  ;;  %v2774_v39 = vmul.f32 %v5972_v8, %v5972_v8 }
 0xd6b   : > { %v2753_v33 = vpop.xlane.xlu1 %2752 }
 0xd6c   : > { %v5980_v47 = vsub.f32 %v5929_v27, %v2760_v43  ;;  %v2761_v29 = vmul.f32 0.03125, %v2753_v33  ;;  %v2790_v48 = vsel %vm895_vm1, %v2774_v39, 0.0  ;;  %v2775_v25 = vmul.f32 %v5975_v21, %v5975_v21 }
 0xd6d   : > { %2791 = vadd.xlane.f32.xlu0 %v2790_v48 }
 0xd6e   : > { %v5986_v50 = vsub.f32 %v5935_v53, %v2761_v29  ;;  %v2793_v19 = vsel %vm895_vm1, %v2775_v25, 0.0  ;;  %v2776_v1 = vmul.f32 %v5980_v47, %v5980_v47 }
 0xd6f   : > { %2794 = vadd.xlane.f32.xlu1 %v2793_v19 }
 0xd70   : > { %v2796_v24 = vsel %vm895_vm1, %v2776_v1, 0.0  ;;  %v2777_v34 = vmul.f32 %v5986_v50, %v5986_v50 }
 0xd71   : > { %2797 = vadd.xlane.f32.xlu0 %v2796_v24 }
 0xd72   : > { %v2799_v49 = vsel %vm895_vm1, %v2777_v34, 0.0 }
 0xd73   : > { %2800 = vadd.xlane.f32.xlu1 %v2799_v49 }
 0xdc6   : > { %v2780_v45 = vpop.xlane.xlu0 %2779 }
 0xdc7   : > { %v2802_v56 = vmul.f32 0.03125, %v2780_v45 }
 0xdc8   : > { %v2783_v22 = vpop.xlane.xlu1 %2782 }
 0xdc9   : > { %v2810_v52 = vadd.f32 1e-05, %v2802_v56  ;;  %v2803_v58 = vmul.f32 0.03125, %v2783_v22 }
 0xdca   : > { %v2786_v7 = vpop.xlane.xlu0 %2785 }
 0xdcb   : > { %4213 = vrsqrt.f32 %v2810_v52  ;;  %v2811_v26 = vadd.f32 1e-05, %v2803_v58  ;;  %v2804_v15 = vmul.f32 0.03125, %v2786_v7 }
 0xdcd   : > { %4215 = vrsqrt.f32 %v2811_v26  ;;  %v2812_v41 = vadd.f32 1e-05, %v2804_v15 }
 0xdce   : > { %v2789_v32 = vpop.xlane.xlu1 %2788 }
 0xdcf   : > { %4217 = vrsqrt.f32 %v2812_v41  ;;  %v2805_v11 = vmul.f32 0.03125, %v2789_v32  ;;  %v4063_v41 = vld [vmem:[%s5380_s5 + $0x10] sm:$0xff]   ;;  %v4064_v32 = vld [vmem:[%s5380_s5 + $0x18] sm:$0xff]  }
 0xdd1   : > { %v2813_v6 = vadd.f32 1e-05, %v2805_v11  ;;  %v4065_v11 = vld [vmem:[%s5380_s5 + $0x20] sm:$0xff]  }
 0xdd3   : > { %4219 = vrsqrt.f32 %v2813_v6  ;;  %v4066_v6 = vld [vmem:[%s5380_s5 + $0x28] sm:$0xff]  }
 0xdd5   : > { %v4214_v36 = vpop.eup %4213 }
 0xdd6   : > { %v2826_v59 = vmul.f32 %v4214_v36, %v5944_v2  ;;  %v4067_v36 = vld [vmem:[%s5380_s5 + $0x30] sm:$0xff]  }
 0xdd7   : > { %v4216_v44 = vpop.eup %4215 }
 0xdd8   : > { %v2827_v60 = vmul.f32 %v4216_v44, %v5947_v14  ;;  %v2840_v62 = vmul.f32 %v3583_v54, %v2826_v59  ;;  %v3585_v59 = vld [vmem:[%s759_s17] ss:$0 sm:$0xff] }
 0xdd9   : > { %v4218_v55 = vpop.eup %4217 }
 0xdda   : > { %v2828_v18 = vmul.f32 %v4218_v55, %v5952_v38  ;;  %v2841_v63 = vmul.f32 %v3583_v54, %v2827_v60  ;;  %v2854_v28 = vadd.f32 %v3584_v16, %v2840_v62 }
 0xddc   : > { %v2855_v51 = vadd.f32 %v3584_v16, %v2841_v63  ;;  %v2842_v30 = vmul.f32 %v3583_v54, %v2828_v18 }
 0xddd   : > { %v4220_v57 = vpop.eup %4219 }
 0xdde   : > { %v2829_v37 = vmul.f32 %v4220_v57, %v5961_v9  ;;  %v2862_v46 = vpack.c.bf16 %v2855_v51, %v2854_v28  ;;  %v2856_v2 = vadd.f32 %v3584_v16, %v2842_v30 }
 0xde0   : > { %v2843_v3 = vmul.f32 %v3583_v54, %v2829_v37  ;;  %3860 = vmatprep.mubr.msk.bf16.mxu0 %vm895_vm1, %v2862_v46 }
 0xde2   : > { %v2857_v10 = vadd.f32 %v3584_v16, %v2843_v3 }
 0xde4   : > { %v2863_v14 = vpack.c.bf16 %v2857_v10, %v2856_v2 }
 0xde6   : > { %3861 = vmatmul.mubr.msk.bf16.vlgmr.msra.gmra.mrb[44].mxu0 %vm895_vm1, %v2863_v14 }
 0xdfa   : > { %v2792_v20 = vpop.xlane.xlu0 %2791 }
 0xdfb   : > { %v2806_v13 = vmul.f32 0.03125, %v2792_v20 }
 0xdfc   : > { %v2795_v0 = vpop.xlane.xlu1 %2794 }
 0xdfd   : > { %v2814_v38 = vadd.f32 1e-05, %v2806_v13  ;;  %v2807_v35 = vmul.f32 0.03125, %v2795_v0 }
 0xdfe   : > { %v2798_v42 = vpop.xlane.xlu0 %2797 }
 0xdff   : > { %4221 = vrsqrt.f32 %v2814_v38  ;;  %v2815_v4 = vadd.f32 1e-05, %v2807_v35  ;;  %v2808_v17 = vmul.f32 0.03125, %v2798_v42 }
 0xe00   : > { %v2801_v43 = vpop.xlane.xlu1 %2800 }
 0xe01   : > { %4223 = vrsqrt.f32 %v2815_v4  ;;  %v2816_v9 = vadd.f32 1e-05, %v2808_v17  ;;  %v2809_v39 = vmul.f32 0.03125, %v2801_v43 }
 0xe03   : > { %4225 = vrsqrt.f32 %v2816_v9  ;;  %v2817_v33 = vadd.f32 1e-05, %v2809_v39 }
 0xe05   : > { %4227 = vrsqrt.f32 %v2817_v33 }
 0xe09   : > { %v4222_v29 = vpop.eup %4221 }
 0xe0a   : > { %v2830_v48 = vmul.f32 %v4222_v29, %v5972_v8 }
 0xe0b   : > { %v4224_v25 = vpop.eup %4223 }
 0xe0c   : > { %v2831_v19 = vmul.f32 %v4224_v25, %v5975_v21  ;;  %v2844_v1 = vmul.f32 %v3583_v54, %v2830_v48 }
 0xe0d   : > { %v4226_v24 = vpop.eup %4225 }
 0xe0e   : > { %v2832_v34 = vmul.f32 %v4226_v24, %v5980_v47  ;;  %v2845_v49 = vmul.f32 %v3583_v54, %v2831_v19  ;;  %v2858_v22 = vadd.f32 %v3584_v16, %v2844_v1  ;;  %v4061_v47 = vld [vmem:[%s5380_s5] sm:$0xff]  }
 0xe0f   : > { %v4228_v45 = vpop.eup %4227  ;;  %3868 = vmatprep.subr.bf16.mxu1 %v4061_v47 }
 0xe10   : > { %v2833_v56 = vmul.f32 %v4228_v45, %v5986_v50  ;;  %v2859_v52 = vadd.f32 %v3584_v16, %v2845_v49  ;;  %v2846_v58 = vmul.f32 %v3583_v54, %v2832_v34  ;;  %3869 = vmatpush3.bf16.msra.mxu1 %v4061_v47  ;;  %v4062_v50 = vld [vmem:[%s5380_s5 + $0x8] sm:$0xff]  }
 0xe11   : > { %3870 = vmatprep.subr.bf16.mxu1 %v4062_v50 }
 0xe12   : > { %v2864_v7 = vpack.c.bf16 %v2859_v52, %v2858_v22  ;;  %v2847_v8 = vmul.f32 %v3583_v54, %v2833_v56  ;;  %v2860_v21 = vadd.f32 %v3584_v16, %v2846_v58  ;;  %v4068_v54 = vld [vmem:[%s5380_s5 + $0x38] sm:$0xff]  }
 0xe14   : > { %3864 = vmatprep.mubr.msk.bf16.mxu0 %vm895_vm1, %v2864_v7  ;;  %v2861_v26 = vadd.f32 %v3584_v16, %v2847_v8  ;;  %3871 = vmatpush3.bf16.msra.mxu1 %v4062_v50 }
 0xe15   : > { %3872 = vmatprep.subr.bf16.mxu1 %v4063_v41 }
 0xe16   : > { %v2865_v15 = vpack.c.bf16 %v2861_v26, %v2860_v21 }
 0xe18   : > { %3865 = vmatmul.mubr.msk.bf16.gmra.mrb[48].mxu0 %vm895_vm1, %v2865_v15  ;;  %3873 = vmatpush3.bf16.msra.mxu1 %v4063_v41 }
 0xe19   : > { %3874 = vmatprep.subr.bf16.mxu1 %v4064_v32 }
 0xe1c   : > { %3875 = vmatpush3.bf16.msra.mxu1 %v4064_v32 }
 0xe1d   : > { %3876 = vmatprep.subr.bf16.mxu1 %v4065_v11 }
 0xe20   : > { %3877 = vmatpush3.bf16.msra.mxu1 %v4065_v11 }
 0xe21   : > { %3878 = vmatprep.subr.bf16.mxu1 %v4066_v6 }
 0xe24   : > { %3879 = vmatpush3.bf16.msra.mxu1 %v4066_v6 }
 0xe25   : > { %3880 = vmatprep.subr.bf16.mxu1 %v4067_v36 }
 0xe28   : > { %3881 = vmatpush3.bf16.msra.mxu1 %v4067_v36 }
 0xe29   : > { %3882 = vmatprep.subr.bf16.mxu1 %v4068_v54 }
 0xe2c   : > { %3883 = vmatpush3.bf16.msra.mxu1 %v4068_v54 }
 0xeb9   : > { %v3862_v44 = vpop.f32.mrb[44].mxu0 }
 0xeba   : > { %v2944_v60 = vadd.f32 %v3862_v44, %v3585_v59  ;;  %v2935_v62 = vpop.f32.mrb[45].mxu0 }
 0xebb   : > { %v2936_v55 = vadd.f32 %v3585_v59, %v2935_v62  ;;  %v3863_v16 = vpop.f32.mrb[46].mxu0 }
 0xebc   : > { %v2968_v18 = vmul.f32 %v2944_v60, %v2944_v60  ;;  %v2947_v63 = vadd.f32 %v3863_v16, %v3585_v59  ;;  %v2938_v28 = vpop.f32.mrb[47].mxu0 }
 0xebd   : > { %v2966_v51 = vmul.f32 %v2936_v55, %v2936_v55  ;;  %v2939_v57 = vadd.f32 %v3585_v59, %v2938_v28 }
 0xebe   : > { %v2976_v30 = vmul.f32 %v2968_v18, %v2944_v60  ;;  %v2969_v37 = vmul.f32 %v2947_v63, %v2947_v63 }
 0xebf   : > { %v2974_v46 = vmul.f32 %v2966_v51, %v2936_v55  ;;  %v2967_v3 = vmul.f32 %v2939_v57, %v2939_v57 }
 0xec0   : > { %v2984_v2 = vmul.f32 0.044715, %v2976_v30  ;;  %v2977_v10 = vmul.f32 %v2969_v37, %v2947_v63 }
 0xec1   : > { %v2982_v14 = vmul.f32 0.044715, %v2974_v46  ;;  %v2975_v20 = vmul.f32 %v2967_v3, %v2939_v57 }
 0xec2   : > { %v2992_v13 = vadd.f32 %v2984_v2, %v2944_v60  ;;  %v2985_v0 = vmul.f32 0.044715, %v2977_v10 }
 0xec3   : > { %v2990_v38 = vadd.f32 %v2982_v14, %v2936_v55  ;;  %v2983_v35 = vmul.f32 0.044715, %v2975_v20 }
 0xec4   : > { %v3000_v42 = vmul.f32 0.7978846, %v2992_v13  ;;  %v2993_v4 = vadd.f32 %v2985_v0, %v2947_v63 }
 0xec5   : > { %v2998_v17 = vmul.f32 0.7978846, %v2990_v38  ;;  %v2991_v43 = vadd.f32 %v2983_v35, %v2939_v57 }
 0xec6   : > { %4229 = vtanh.f32 %v3000_v42  ;;  %v3001_v9 = vmul.f32 0.7978846, %v2993_v4 }
 0xec7   : > { %4231 = vtanh.f32 %v2998_v17  ;;  %v2999_v39 = vmul.f32 0.7978846, %v2991_v43 }
 0xec8   : > { %4233 = vtanh.f32 %v3001_v9 }
 0xec9   : > { %4235 = vtanh.f32 %v2999_v39 }
 0xed0   : > { %v4230_v33 = vpop.eup %4229 }
 0xed1   : > { %v4232_v29 = vpop.eup %4231  ;;  %v3016_v48 = vadd.f32 1.0, %v4230_v33 }
 0xed2   : > { %v4234_v25 = vpop.eup %4233  ;;  %v3014_v19 = vadd.f32 1.0, %v4232_v29 }
 0xed3   : > { %v4236_v1 = vpop.eup %4235  ;;  %v3024_v24 = vmul.f32 0.5, %v3016_v48  ;;  %v3017_v34 = vadd.f32 1.0, %v4234_v25 }
 0xed4   : > { %v3015_v49 = vadd.f32 1.0, %v4236_v1  ;;  %v3022_v45 = vmul.f32 0.5, %v3014_v19 }
 0xed5   : > { %v3025_v56 = vmul.f32 0.5, %v3017_v34  ;;  %v3032_v52 = vmul.f32 %v3024_v24, %v2944_v60 }
 0xed6   : > { %v3023_v22 = vmul.f32 0.5, %v3015_v49  ;;  %v3030_v7 = vmul.f32 %v3022_v45, %v2936_v55  ;;  %v3592_v49 = vld [vmem:[%s776_s3] ss:$0 sm:$0xff] }
 0xed7   : > { %v3033_v58 = vmul.f32 %v3025_v56, %v2947_v63 }
 0xed8   : > { %v3031_v8 = vmul.f32 %v3023_v22, %v2939_v57 }
 0xed9   : > { %v3039_v21 = vpack.c.bf16 %v3033_v58, %v3032_v52 }
 0xeda   : > { %v3038_v26 = vpack.c.bf16 %v3031_v8, %v3030_v7 }
 0xedc   : > { %3884 = vmatprep.mubr.bf16.mxu1 %v3038_v26 }
 0xedd   : > { %3885 = vmatmul.mubr.bf16.vlgmr.msra.gmra.mrb[36].mxu1 %v3039_v21 }
 0xeeb   : > { %v3866_v15 = vpop.f32.mrb[48].mxu0 }
 0xeec   : > { %v2960_v47 = vadd.f32 %v3866_v15, %v3585_v59  ;;  %v2951_v50 = vpop.f32.mrb[49].mxu0 }
 0xeed   : > { %v2952_v41 = vadd.f32 %v3585_v59, %v2951_v50  ;;  %v3867_v32 = vpop.f32.mrb[50].mxu0 }
 0xeee   : > { %v2972_v11 = vmul.f32 %v2960_v47, %v2960_v47  ;;  %v2963_v6 = vadd.f32 %v3867_v32, %v3585_v59  ;;  %v2954_v36 = vpop.f32.mrb[51].mxu0 }
 0xeef   : > { %v2970_v54 = vmul.f32 %v2952_v41, %v2952_v41  ;;  %v2955_v44 = vadd.f32 %v3585_v59, %v2954_v36 }
 0xef0   : > { %v2980_v62 = vmul.f32 %v2972_v11, %v2960_v47  ;;  %v2973_v16 = vmul.f32 %v2963_v6, %v2963_v6 }
 0xef1   : > { %v2978_v60 = vmul.f32 %v2970_v54, %v2952_v41  ;;  %v2971_v18 = vmul.f32 %v2955_v44, %v2955_v44 }
 0xef2   : > { %v2988_v55 = vmul.f32 0.044715, %v2980_v62  ;;  %v2981_v63 = vmul.f32 %v2973_v16, %v2963_v6 }
 0xef3   : > { %v2986_v28 = vmul.f32 0.044715, %v2978_v60  ;;  %v2979_v51 = vmul.f32 %v2971_v18, %v2955_v44 }
 0xef4   : > { %v2996_v57 = vadd.f32 %v2988_v55, %v2960_v47  ;;  %v2989_v30 = vmul.f32 0.044715, %v2981_v63 }
 0xef5   : > { %v2994_v37 = vadd.f32 %v2986_v28, %v2952_v41  ;;  %v2987_v46 = vmul.f32 0.044715, %v2979_v51 }
 0xef6   : > { %v3004_v3 = vmul.f32 0.7978846, %v2996_v57  ;;  %v2997_v2 = vadd.f32 %v2989_v30, %v2963_v6 }
 0xef7   : > { %v3002_v10 = vmul.f32 0.7978846, %v2994_v37  ;;  %v2995_v14 = vadd.f32 %v2987_v46, %v2955_v44 }
 0xef8   : > { %4237 = vtanh.f32 %v3004_v3  ;;  %v3005_v20 = vmul.f32 0.7978846, %v2997_v2 }
 0xef9   : > { %4239 = vtanh.f32 %v3002_v10  ;;  %v3003_v59 = vmul.f32 0.7978846, %v2995_v14 }
 0xefa   : > { %4241 = vtanh.f32 %v3005_v20 }
 0xefb   : > { %4243 = vtanh.f32 %v3003_v59 }
 0xf02   : > { %v4238_v13 = vpop.eup %4237 }
 0xf03   : > { %v4240_v0 = vpop.eup %4239  ;;  %v3020_v38 = vadd.f32 1.0, %v4238_v13 }
 0xf04   : > { %v4242_v35 = vpop.eup %4241  ;;  %v3018_v42 = vadd.f32 1.0, %v4240_v0 }
 0xf05   : > { %v4244_v4 = vpop.eup %4243  ;;  %v3021_v17 = vadd.f32 1.0, %v4242_v35  ;;  %v3028_v43 = vmul.f32 0.5, %v3020_v38 }
 0xf06   : > { %v3019_v9 = vadd.f32 1.0, %v4244_v4  ;;  %v3026_v39 = vmul.f32 0.5, %v3018_v42 }
 0xf07   : > { %v3029_v33 = vmul.f32 0.5, %v3021_v17  ;;  %v3036_v48 = vmul.f32 %v3028_v43, %v2960_v47 }
 0xf08   : > { %v3027_v29 = vmul.f32 0.5, %v3019_v9  ;;  %v3034_v19 = vmul.f32 %v3026_v39, %v2952_v41 }
 0xf09   : > { %v3037_v25 = vmul.f32 %v3029_v33, %v2963_v6 }
 0xf0a   : > { %v3035_v1 = vmul.f32 %v3027_v29, %v2955_v44 }
 0xf0b   : > { %v3041_v24 = vpack.c.bf16 %v3037_v25, %v3036_v48 }
 0xf0c   : > { %v3040_v34 = vpack.c.bf16 %v3035_v1, %v3034_v19 }
 0xf0e   : > { %3888 = vmatprep.mubr.bf16.mxu1 %v3040_v34 }
 0xf0f   : > { %3889 = vmatmul.mubr.bf16.gmra.mrb[40].mxu1 %v3041_v24 }
 0xfb0   : > { %v3886_v45 = vpop.f32.mrb[36].mxu1 }
 0xfb1   : > { %v3156_v56 = vadd.f32 %v3886_v45, %v3592_v49  ;;  %v3147_v22 = vpop.f32.mrb[37].mxu1 }
 0xfb2   : > { %v3148_v52 = vadd.f32 %v3592_v49, %v3147_v22  ;;  %v3887_v58 = vpop.f32.mrb[38].mxu1 }
 0xfb3   : > { %v3180_v7 = vadd.f32 %v3156_v56, %v5913_v40  ;;  %v3159_v8 = vadd.f32 %v3887_v58, %v3592_v49  ;;  %v3150_v21 = vpop.f32.mrb[39].mxu1 }
 0xfb4   : > { %v3178_v26 = vadd.f32 %v3148_v52, %v5911_v12  ;;  %v3151_v15 = vadd.f32 %v3592_v49, %v3150_v21 }
 0xfb5   : > { %3188 = vst.msk [vmem:[#allocation2 + $0x10] sm:$0xff] %vm895_vm1, %v3180_v7  ;;  %v3181_v47 = vadd.f32 %v3159_v8, %v5921_v31  ;;  %3200 = vst.msk [vmem:[#allocation24 + $0x10] sm:$0xff] (!%p3601_p2), %vm895_vm1, %v3180_v7 }
 0xfb6   : > { %3186 = vst.msk [vmem:[#allocation2] sm:$0xff] %vm895_vm1, %v3178_v26  ;;  %v3179_v50 = vadd.f32 %v3151_v15, %v5915_v5  ;;  %3198 = vst.msk [vmem:[#allocation24] sm:$0xff] (!%p3601_p2), %vm895_vm1, %v3178_v26 }
 0xfb7   : > { %3189 = vst.msk [vmem:[#allocation2 + $0x18] sm:$0xff] %vm895_vm1, %v3181_v47  ;;  %3201 = vst.msk [vmem:[#allocation24 + $0x18] sm:$0xff] (!%p3601_p2), %vm895_vm1, %v3181_v47 }
 0xfb8   : > { %3187 = vst.msk [vmem:[#allocation2 + $0x8] sm:$0xff] %vm895_vm1, %v3179_v50  ;;  %3199 = vst.msk [vmem:[#allocation24 + $0x8] sm:$0xff] (!%p3601_p2), %vm895_vm1, %v3179_v50 }
 0xfe2   : > { %v3890_v41 = vpop.f32.mrb[40].mxu1 }
 0xfe3   : > { %v3172_v32 = vadd.f32 %v3890_v41, %v3592_v49  ;;  %v3163_v40 = vpop.f32.mrb[41].mxu1 }
 0xfe4   : > { %v3164_v11 = vadd.f32 %v3592_v49, %v3163_v40  ;;  %v3891_v6 = vpop.f32.mrb[42].mxu1  ;;  %3197 = sbr.rel (%p3601_p2) target bundleno = 4075 (0xfeb), region = 132 }
 0xfe5   : > { %v3184_v12 = vadd.f32 %v3172_v32, %v5929_v27  ;;  %v3175_v36 = vadd.f32 %v3891_v6, %v3592_v49  ;;  %v3166_v54 = vpop.f32.mrb[43].mxu1 }
 0xfe6   : > { %v3182_v44 = vadd.f32 %v3164_v11, %v5927_v61  ;;  %v3167_v31 = vadd.f32 %v3592_v49, %v3166_v54 }
 0xfe7   : > { %3192 = vst.msk [vmem:[#allocation2 + $0x30] sm:$0xff] %vm895_vm1, %v3184_v12  ;;  %v3185_v5 = vadd.f32 %v3175_v36, %v5935_v53  ;;  %3204 = vst.msk [vmem:[#allocation24 + $0x30] sm:$0xff] (!%p3601_p2), %vm895_vm1, %v3184_v12 }
 0xfe8   : > { %3190 = vst.msk [vmem:[#allocation2 + $0x20] sm:$0xff] %vm895_vm1, %v3182_v44  ;;  %v3183_v62 = vadd.f32 %v3167_v31, %v5931_v23  ;;  %3202 = vst.msk [vmem:[#allocation24 + $0x20] sm:$0xff] (!%p3601_p2), %vm895_vm1, %v3182_v44 }
 0xfe9   : > { %3193 = vst.msk [vmem:[#allocation2 + $0x38] sm:$0xff] %vm895_vm1, %v3185_v5  ;;  %3205 = vst.msk [vmem:[#allocation24 + $0x38] sm:$0xff] (!%p3601_p2), %vm895_vm1, %v3185_v5 }
 0xfea   : > { %3191 = vst.msk [vmem:[#allocation2 + $0x28] sm:$0xff] %vm895_vm1, %v3183_v62  ;;  %3203 = vst.msk [vmem:[#allocation24 + $0x28] sm:$0xff] (!%p3601_p2), %vm895_vm1, %v3183_v62 }
 0xfeb PF: > { %p3984_p5 = scmp.eq.s32.totalorder %s5125_s24, 1  ;;  %s4778_s13 = smov [#allocation24]  }
 0xfec   : > { %s3215_s18 = sshll.u32 %s4778_s13, 4  ;;  %s3216_s18 = int_to_ptr.vmem [resolvable:$true] %s3215_s18 }
 0xfed   : > { %s4641_s0 = scalar_lea.vmem %s3216_s18, 1024  ;;  %p4648_p13 = scmp.lt.s32.totalorder %s3216_s18, %s3216_s18 }
 0xfee   : > { %p4642_p10 = scmp.ne.s32.totalorder %s3216_s18, %s4641_s0  ;;  %p4649_p8 = scmp.lt.s32.totalorder %s4641_s0, %s4641_s0 }
 0xff0   : > { %p4643_p1 = pnand %p4642_p10, %p3984_p5  ;;  %p4650_p6 = por %p4649_p8, %p4648_p13 }
 0xff2   : > { %p4644_p4 = pneg %p4643_p1 }
 0xff4   : > { %p4651_p11 = pnand %p4650_p6, %p4644_p4 }
 0xff6   : > { %4654 = shalt.err (!%p4651_p11)
}
 0xff7   : > { %s6176_s3 = sld [smem:[#allocation45_spill]] }
 0xffd   : > { %s4655_s25 = scalar_lea.hbm %s6176_s3, 1024 }
 0xffe   : > { %p4656_p3 = scmp.ne.s32.totalorder %s6176_s3, %s4655_s25  ;;  %p4661_p12 = scmp.lt.u32.totalorder %s4655_s25, %s6176_s3 }
0x1000   : > { %p4657_p0 = pnand %p4656_p3, %p3984_p5 }
0x1002   : > { %p4658_p9 = pneg %p4657_p0 }
0x1004   : > { %p4663_p7 = pnand %p4661_p12, %p4658_p9 }
0x1006   : > { %4666 = shalt.err (!%p4663_p7)
}
0x1007   : > { %s4779_s15 = smov 128  }
0x1008   : > { %3937 = dma.vmem_to_hbm [thread:$0]  (%p3984_p5), %s3216_s18, 1024, %s6176_s3, [#allocation5], %s4779_s15, %s4779_s15, %s4775_s21  }
0x1009   : > { %4720 = dma.done.wait (%p3984_p5), [#allocation5], 1024  }
0x100a   : > { %4722 = vsyncadd (%p3984_p5), [#allocation5], 4294966272 }
0x100b PF: > { %s43_s30 = sadd.s32 1, %s4745_s30   ;;  %s6177_s28 = sld [smem:[#allocation33_spill]] }
0x100c   : > { %p40_p2 = scmp.ge.s32.totalorder %s43_s30, 4   ;;  %s6178_s27 = sld [smem:[#allocation36_spill]] }
0x100d   : > { %s6179_s8 = sld [smem:[#allocation35_spill]]  ;;  %s6180_s25 = smov %s4729_s26 }
0x100e   :  { %42 = sbr.rel (!%p40_p2) target bundleno = 26 (0x1a), region = 255 }
0x1011   : > { %s6181_s26 = smov %s6177_s28  ;;  %s6182_s28 = smov %s4741_s29 }
0x1013   : > { %s6183_s29 = smov %s6179_s8 }
0x1015   :  { %3231 = vsyncpa [#allocation4], 1 }
0x1016   :  { %3233 = vsyncpa [#allocation4 + $0x1], 1 }
0x1017   :  { %3234 = vsyncpa [#allocation7], 1 }
0x1018   :  { %3236 = vsyncpa [#allocation7 + $0x1], 1 }
0x1019   :  { %3237 = vsyncpa [#allocation10], 1 }
0x101a   :  { %3239 = vsyncpa [#allocation10 + $0x1], 1 }
0x101b   :  { %3240 = vsyncpa [#allocation13], 1 }
0x101c   :  { %3242 = vsyncpa [#allocation13 + $0x1], 1 }
0x101d   :  { %3243 = vsyncpa [#allocation16], 1 }
0x101e   :  { %3245 = vsyncpa [#allocation16 + $0x1], 1 }
0x101f   :  { %3246 = vsyncpa [#allocation19], 1 }
0x1020   :  { %3248 = vsyncpa [#allocation19 + $0x1], 1 }
0x1021   :  { %3249 = vsyncpa [#allocation22], 1 }
0x1022   :  { %3251 = vsyncpa [#allocation22 + $0x1], 1 }
0x1023   :  { %3252 = vsyncpa [#allocation5], 1 }
0x1024   :  { %3254 = vsyncpa [#allocation5 + $0x1], 1 }

</bundles_post_ra>
